<compile_context>
chip_gen: v6e
topology: v6e:2x2x1
jax: 0.10.0
libtpu: 0.0.40
codegen_flags: <defaults>
</compile_context>

<pallas_src>
import functools
import math

import jax
import jax.numpy as jnp
from jax.experimental import pallas as pl
from jax.experimental.pallas import tpu as pltpu


def _round_up(x, m):
    return ((x + m - 1) // m) * m


def _nbytes(shape, dtype):
    return math.prod(shape) * jnp.dtype(dtype).itemsize


def _vmem_limit(est_bytes):
    # Explicit scoped-VMEM limit (defaults are only 16 MiB on v5e / 32 MiB on
    # v6e & v7x).  2x headroom over the estimated working set, capped at
    # 64 MiB so the plan also fits v7x's 64 MiB physical VMEM.
    return int(min(max(2 * est_bytes, 32 * 1024 * 1024), 64 * 1024 * 1024))


# -----------------------------------------------------------------------------
# Kernel 1: hoisted input projection  gates_x = X @ W_ih^T + (b_ih + b_hh)
#   maxlen_ref : (1,) int32 SMEM   max(lengths), via scalar prefetch
#   x_ref      : (tc1, Bp, D)      time-chunk of inputs
#   wih_ref    : (D, 4Hp)          W_ih^T   (constant block index -> fetched once)
#   b_ref      : (1, 4Hp) f32      combined bias
#   gx_ref     : (tc1, Bp, 4Hp)    precomputed input gates (compute_dtype)
# -----------------------------------------------------------------------------
def input_proj_kernel(maxlen_ref, x_ref, wih_ref, b_ref, gx_ref, *, tc1, bp):
    # Skip chunks that lie entirely past the longest sequence in the batch
    # (their gates are never consumed: kernel 2 zero-fills those outputs).
    @pl.when(pl.program_id(0) * tc1 < maxlen_ref[0])
    def _():
        d = x_ref.shape[-1]
        g4 = gx_ref.shape[-1]
        x2 = x_ref[...].reshape(tc1 * bp, d)               # merge leading dims
        g = jnp.dot(x2, wih_ref[...], preferred_element_type=jnp.float32)
        g = g + b_ref[...]
        gx_ref[...] = g.astype(gx_ref.dtype).reshape(tc1, bp, g4)


# -----------------------------------------------------------------------------
# Kernel 2: LSTM recurrence, `tc` timesteps per grid step.
#   grid = (batch_chunks, time_chunks)   -- ("parallel", "arbitrary")
#   maxlen_ref : (1,) int32 SMEM
#   gx_ref     : (tc, Bc, 4Hp)     precomputed input gates for this chunk
#   len_ref    : (Bc, 1) int32     sequence lengths
#   whh_hbm    : (Hp, 4Hp) ANY     W_hh^T left in HBM (no auto double-buffer)
#   out_ref    : (tc, Bc, Hp) f32  hidden outputs for this chunk
#   whh_vmem   : (Hp, 4Hp)         single-buffered VMEM copy of W_hh^T
#   h_sc, c_sc : (Bc, Hp) f32      recurrent state (persists across time chunks)
# -----------------------------------------------------------------------------
def lstm_recurrence_kernel(maxlen_ref, gx_ref, len_ref, whh_hbm, out_ref,
                           whh_vmem, h_sc, c_sc, *, tc, hp, fast_sigmoid):
    c_idx = pl.program_id(1)

    @pl.when(c_idx == 0)
    def _():
        # One-time (per batch chunk) staging of the loop-invariant W_hh^T and
        # state reset.  Keeps exactly ONE copy of W_hh^T in VMEM for the whole
        # sequential sweep instead of a re-DMA'd double buffer per chunk.
        pltpu.sync_copy(whh_hbm, whh_vmem)
        h_sc[...] = jnp.zeros_like(h_sc)
        c_sc[...] = jnp.zeros_like(c_sc)

    active = c_idx * tc < maxlen_ref[0]

    @pl.when(active)
    def _():
        lens = len_ref[...]                     # (Bc,1) hoisted out of the loop

        def sigmoid(x):
            if fast_sigmoid:
                # EUP-only path: exp + approx reciprocal (skips Newton refine).
                return pl.reciprocal(1.0 + jnp.exp(-x), approx=True)
            return jax.nn.sigmoid(x)

        def step(i, carry):
            t = c_idx * tc + i                  # global timestep
            gates = jnp.dot(h_sc[...].astype(whh_vmem.dtype), whh_vmem[...],
                            preferred_element_type=jnp.float32)
            gates = gates + gx_ref[i].astype(jnp.float32)

            # PyTorch gate order i, f, g, o — each slice is a whole lane block.
            i_g = sigmoid(gates[:, 0 * hp:1 * hp])
            f_g = sigmoid(gates[:, 1 * hp:2 * hp])
            g_g = jnp.tanh(gates[:, 2 * hp:3 * hp])
            o_g = sigmoid(gates[:, 3 * hp:4 * hp])

            c_new = f_g * c_sc[...] + i_g * g_g
            h_new = o_g * jnp.tanh(c_new)

            # pack_padded_sequence: freeze state past each row's length;
            # pad_packed_sequence: zero-fill the output there.
            valid = t < lens                    # (Bc,1), broadcasts over hp
            c_sc[...] = jnp.where(valid, c_new, c_sc[...])
            h_sc[...] = jnp.where(valid, h_new, h_sc[...])
            out_ref[i] = jnp.where(valid, h_new, 0.0)
            return carry

        jax.lax.fori_loop(0, tc, step, 0, unroll=True)

    @pl.when(jnp.logical_not(active))
    def _():
        # Chunk entirely past the longest sequence: just emit zeros.
        out_ref[...] = jnp.zeros_like(out_ref)


def seq2seq_encoder(sequences_batch, sequences_lengths, w_ih, w_hh, b_ih, b_hh,
                    *, time_chunk=16, batch_chunks=1,
                    compute_dtype=jnp.float32):
    """Pallas equivalent of Seq2SeqEncoder.forward (unidirectional LSTM).

    sequences_batch   : (B, T, D) float32, batch-first
    sequences_lengths : (B,)      int32
    w_ih : (4H, D), w_hh : (4H, H), b_ih/b_hh : (4H,)   (PyTorch shapes)
    time_chunk   : timesteps per sequential grid step (sweep per generation).
    batch_chunks : set to 2 on v7x to shard the recurrence over both TCs.
    compute_dtype: jnp.bfloat16 for MXU-native matmuls + bf16 gates_x stream.
    returns (B, T, H) float32, zero-padded past each sequence length.
    """
    B, T, D = sequences_batch.shape
    H = w_hh.shape[1]
    G = 4

    compute_dtype = jnp.dtype(compute_dtype)
    fast_sigmoid = compute_dtype == jnp.dtype(jnp.bfloat16)

    Hp = _round_up(max(H, 128), 128)           # lane-dense hidden size
    nb = max(1, int(batch_chunks))             # batch chunks (v7x: 2)
    Bc = _round_up(max(-(-B // nb), 8), 8)     # sublane-dense per-chunk batch
    Bp = Bc * nb
    tc = max(1, min(time_chunk, T))            # timesteps per recurrence chunk
    Tp = _round_up(T, tc)
    n_chunks = Tp // tc

    # Kernel-1 time chunk decoupled from tc: aim for >= 512 MXU rows per block.
    tc1 = min(Tp, max(tc, -(-512 // Bp)))
    Tp1 = _round_up(Tp, tc1)
    n1 = Tp1 // tc1

    # --- pad weights so gate k occupies lane columns [k*Hp, (k+1)*Hp) --------
    def pad_gate_dim(w):                       # (4H, X) -> (4Hp, X), zero-padded
        w4 = w.reshape(G, H, -1)
        w4 = jnp.pad(w4, ((0, 0), (0, Hp - H), (0, 0)))
        return w4.reshape(G * Hp, -1)

    wih_t = pad_gate_dim(w_ih).T.astype(compute_dtype)                # (D, 4Hp)
    whh_t = jnp.pad(pad_gate_dim(w_hh), ((0, 0), (0, Hp - H))).T      # (Hp, 4Hp)
    whh_t = whh_t.astype(compute_dtype)
    bias = jnp.pad((b_ih + b_hh).reshape(G, H), ((0, 0), (0, Hp - H)))
    bias = bias.reshape(1, G * Hp).astype(jnp.float32)

    # --- time-major, padded activations / lengths ----------------------------
    x_tm = jnp.transpose(sequences_batch, (1, 0, 2))                  # (T, B, D)
    x_tm = jnp.pad(x_tm, ((0, Tp1 - T), (0, Bp - B), (0, 0)))
    x_tm = x_tm.astype(compute_dtype)                                 # (Tp1,Bp,D)

    lens = jnp.pad(sequences_lengths.astype(jnp.int32), (0, Bp - B))
    lens = lens.reshape(Bp, 1)                                        # (Bp, 1)
    max_len = jnp.max(sequences_lengths).astype(jnp.int32).reshape(1)

    # --- kernel 1: hoisted input projection (grid-parallel) ------------------
    est1 = (2 * _nbytes((tc1, Bp, D), compute_dtype)
            + 2 * _nbytes((tc1, Bp, G * Hp), compute_dtype)
            + 2 * _nbytes((D, G * Hp), compute_dtype)
            + 2 * _nbytes((1, G * Hp), jnp.float32))
    cost1 = pl.CostEstimate(
        flops=2 * Tp1 * Bp * D * (G * Hp),
        transcendentals=0,
        bytes_accessed=(_nbytes((Tp1, Bp, D), compute_dtype)
                        + _nbytes((D, G * Hp), compute_dtype)
                        + _nbytes((Tp1, Bp, G * Hp), compute_dtype)),
    )
    gates_x = pl.pallas_call(
        functools.partial(input_proj_kernel, tc1=tc1, bp=Bp),
        out_shape=jax.ShapeDtypeStruct((Tp1, Bp, G * Hp), compute_dtype),
        grid_spec=pltpu.PrefetchScalarGridSpec(
            num_scalar_prefetch=1,
            grid=(n1,),
            in_specs=[
                pl.BlockSpec((tc1, Bp, D), lambda c, ml: (c, 0, 0)),      # X chunk
                # Constant block index: the Pallas pipeline reuses the fetched
                # buffer (no per-chunk re-DMA of W_ih^T / bias).
                pl.BlockSpec((D, G * Hp), lambda c, ml: (0, 0)),          # W_ih^T
                pl.BlockSpec((1, G * Hp), lambda c, ml: (0, 0)),          # bias
            ],
            out_specs=pl.BlockSpec((tc1, Bp, G * Hp), lambda c, ml: (c, 0, 0)),
        ),
        compiler_params=pltpu.CompilerParams(
            dimension_semantics=("parallel",),
            vmem_limit_bytes=_vmem_limit(est1),
        ),
        cost_estimate=cost1,
    )(max_len, x_tm, wih_t, bias)

    # --- kernel 2: sequential recurrence, chunked over time ------------------
    est2 = (_nbytes((Hp, G * Hp), compute_dtype)             # single-buffered W_hh^T
            + 2 * _nbytes((tc, Bc, G * Hp), compute_dtype)   # gates_x blocks
            + 2 * _nbytes((tc, Bc, Hp), jnp.float32)         # output blocks
            + 2 * _nbytes((Bc, Hp), jnp.float32)             # h/c state
            + 2 * _nbytes((Bc, 1), jnp.int32))
    out_tm = pl.pallas_call(
        functools.partial(lstm_recurrence_kernel, tc=tc, hp=Hp,
                          fast_sigmoid=fast_sigmoid),
        out_shape=jax.ShapeDtypeStruct((Tp, Bp, Hp), jnp.float32),
        grid_spec=pltpu.PrefetchScalarGridSpec(
            num_scalar_prefetch=1,
            grid=(nb, n_chunks),
            in_specs=[
                pl.BlockSpec((tc, Bc, G * Hp), lambda b, c, ml: (c, b, 0)),
                pl.BlockSpec((Bc, 1), lambda b, c, ml: (b, 0)),
                # W_hh^T stays in HBM; staged once into VMEM scratch at chunk 0.
                pl.BlockSpec(memory_space=pl.ANY),
            ],
            out_specs=pl.BlockSpec((tc, Bc, Hp), lambda b, c, ml: (c, b, 0)),
            scratch_shapes=[
                pltpu.VMEM((Hp, G * Hp), compute_dtype),   # single-buffered W_hh^T
                pltpu.VMEM((Bc, Hp), jnp.float32),         # h state
                pltpu.VMEM((Bc, Hp), jnp.float32),         # c state
            ],
        ),
        compiler_params=pltpu.CompilerParams(
            # batch chunks are independent ("parallel" => v7x megacore can
            # shard them); time chunks carry state ("arbitrary").
            dimension_semantics=("parallel", "arbitrary"),
            vmem_limit_bytes=_vmem_limit(est2),
        ),
    )(max_len, gates_x, lens, whh_t)

    out = out_tm[:T, :B, :H]
    return jnp.transpose(out, (1, 0, 2))                   # back to (B, T, H)


def seq2seq_encoder_ref(x, lengths, w_ih, w_hh, b_ih, b_hh):
    """Pure-JAX reference (mirrors PyTorch LSTM + pack/pad semantics)."""
    B, T, D = x.shape
    H = w_hh.shape[1]

    def step(carry, x_t):
        h, c = carry
        gates = x_t @ w_ih.T + h @ w_hh.T + b_ih + b_hh
        i, f, g, o = jnp.split(gates, 4, axis=1)
        c = jax.nn.sigmoid(f) * c + jax.nn.sigmoid(i) * jnp.tanh(g)
        h = jax.nn.sigmoid(o) * jnp.tanh(c)
        return (h, c), h

    init = (jnp.zeros((B, H), jnp.float32), jnp.zeros((B, H), jnp.float32))
    _, hs = jax.lax.scan(step, init, jnp.transpose(x, (1, 0, 2)))
    outs = jnp.transpose(hs, (1, 0, 2))                    # (B, T, H)
    mask = jnp.arange(T)[None, :, None] < lengths[:, None, None]
    return jnp.where(mask, outs, 0.0)


if __name__ == "__main__":
    # Module config: rnn_type=nn.LSTM, input_size=32, hidden_size=32,
    # num_layers=1, bias=True, dropout=0.0, bidirectional=False
    B, T, D, H = 2, 8, 32, 32

    key = jax.random.PRNGKey(0)
    k_x, k_wih, k_whh, k_bih, k_bhh = jax.random.split(key, 5)
    scale = 1.0 / jnp.sqrt(jnp.float32(H))   # PyTorch LSTM default init range

    x = jax.random.normal(k_x, (B, T, D), dtype=jnp.float32)
    lengths = jnp.array([T, 5], dtype=jnp.int32)   # variable sequence lengths

    w_ih = jax.random.uniform(k_wih, (4 * H, D), jnp.float32, -scale, scale)
    w_hh = jax.random.uniform(k_whh, (4 * H, H), jnp.float32, -scale, scale)
    b_ih = jax.random.uniform(k_bih, (4 * H,), jnp.float32, -scale, scale)
    b_hh = jax.random.uniform(k_bhh, (4 * H,), jnp.float32, -scale, scale)

    ref = seq2seq_encoder_ref(x, lengths, w_ih, w_hh, b_ih, b_hh)

    # f32 path: tight numerical validation against the f32 reference.
    enc_f32 = jax.jit(functools.partial(seq2seq_encoder,
                                        compute_dtype=jnp.float32))
    out_f32 = jax.block_until_ready(enc_f32(x, lengths, w_ih, w_hh, b_ih, b_hh))
    assert out_f32.shape == (B, T, H)
    assert jnp.allclose(out_f32, ref, atol=1e-5, rtol=1e-5), "f32 mismatch"

    # bf16 production path (MXU-native matmuls, bf16 gates_x HBM stream,
    # EUP fast sigmoid): looser tolerance as expected for bf16 gates.
    enc_bf16 = jax.jit(functools.partial(seq2seq_encoder,
                                         compute_dtype=jnp.bfloat16))
    out_bf16 = jax.block_until_ready(
        enc_bf16(x, lengths, w_ih, w_hh, b_ih, b_hh))
    assert out_bf16.shape == (B, T, H)
    assert jnp.allclose(out_bf16, ref, atol=6e-2, rtol=6e-2), "bf16 mismatch"

    # TODO(synk): when max(lengths) is statically known outside jit, also clamp
    # the time grid host-side (and zero-pad the tail) to skip the gates_x DMA
    # for all-padding chunks, not just their compute.

    print("KERNEL_OK")
</pallas_src>

<mosaic_0001>
module attributes {stable_mosaic.version = 11 : i64} {
  func.func @input_proj_kernel(%arg0: i32, %arg1: memref<1xi32, #tpu.memory_space<smem>>, %arg2: memref<8x8x32xf32, #tpu.memory_space<vmem>>, %arg3: memref<32x512xf32, #tpu.memory_space<vmem>>, %arg4: memref<1x512xf32, #tpu.memory_space<vmem>>, %arg5: memref<8x8x512xf32, #tpu.memory_space<vmem>>) attributes {dimension_semantics = [#tpu.dimension_semantics<parallel>], iteration_bounds = array<i64: 1>, scalar_prefetch = 1 : i64, scratch_operands = 0 : i64, tpu.core_type = #tpu.core_type<tc>, window_params = [{transform_indices = @transform_0, window_bounds = array<i64: 8, 8, 32>}, {pipeline_mode = #tpu.pipeline_mode<synchronous>, transform_indices = @transform_1, window_bounds = array<i64: 32, 512>}, {pipeline_mode = #tpu.pipeline_mode<synchronous>, transform_indices = @transform_2, window_bounds = array<i64: 1, 512>}, {transform_indices = @transform_3, window_bounds = array<i64: 8, 8, 512>}]} {
    %c8_i32 = arith.constant 8 : i32
    %0 = arith.muli %arg0, %c8_i32 : i32
    %c0 = arith.constant 0 : index
    %1 = memref.load %arg1[%c0] : memref<1xi32, #tpu.memory_space<smem>>
    %2 = arith.cmpi slt, %0, %1 : i32
    %3 = arith.extui %2 : i1 to i32
    %c0_i32 = arith.constant 0 : i32
    %4 = arith.cmpi ne, %3, %c0_i32 : i32
    scf.if %4 {
      %c0_0 = arith.constant 0 : index
      %c0_1 = arith.constant 0 : index
      %c0_2 = arith.constant 0 : index
      %5 = vector.load %arg2[%c0_0, %c0_1, %c0_2] : memref<8x8x32xf32, #tpu.memory_space<vmem>>, vector<8x8x32xf32>
      %6 = vector.shape_cast %5 : vector<8x8x32xf32> to vector<64x32xf32>
      %c0_3 = arith.constant 0 : index
      %c0_4 = arith.constant 0 : index
      %7 = vector.load %arg3[%c0_3, %c0_4] : memref<32x512xf32, #tpu.memory_space<vmem>>, vector<32x512xf32>
      %cst = arith.constant dense<0.000000e+00> : vector<64x512xf32>
      %8 = tpu.matmul %6, %7, %cst {dimension_numbers = #tpu.dot_dimension_numbers<[1], [0], [0], [1], [0, 0, 1, 1], [], []>} : vector<64x32xf32>, vector<32x512xf32>, vector<64x512xf32> -> vector<64x512xf32>
      %c0_5 = arith.constant 0 : index
      %c0_6 = arith.constant 0 : index
      %9 = vector.load %arg4[%c0_5, %c0_6] : memref<1x512xf32, #tpu.memory_space<vmem>>, vector<1x512xf32>
      %10 = vector.broadcast %9 : vector<1x512xf32> to vector<64x512xf32>
      %11 = arith.addf %8, %10 : vector<64x512xf32>
      %12 = vector.shape_cast %11 : vector<64x512xf32> to vector<8x8x512xf32>
      %c0_7 = arith.constant 0 : index
      %c0_8 = arith.constant 0 : index
      %c0_9 = arith.constant 0 : index
      %13 = vector.load %arg5[%c0_7, %c0_8, %c0_9] : memref<8x8x512xf32, #tpu.memory_space<vmem>>, vector<8x8x512xf32>
      tpu.vector_store %arg5[%c0_7, %c0_8, %c0_9], %12 {strides = array<i32>} : memref<8x8x512xf32, #tpu.memory_space<vmem>>, vector<8x8x512xf32>,
    } else {
    }
    return
  }
  func.func @transform_0(%arg0: i32, %arg1: memref<1xi32, #tpu.memory_space<smem>>) -> (i32, i32, i32) {
    %c0_i32 = arith.constant 0 : i32
    %c0_i32_0 = arith.constant 0 : i32
    %c0_i32_1 = arith.constant 0 : i32
    return %arg0, %c0_i32, %c0_i32_0 : i32, i32, i32
  }
  func.func @transform_1(%arg0: i32, %arg1: memref<1xi32, #tpu.memory_space<smem>>) -> (i32, i32) {
    %c0_i32 = arith.constant 0 : i32
    %c0_i32_0 = arith.constant 0 : i32
    %c0_i32_1 = arith.constant 0 : i32
    return %c0_i32, %c0_i32_0 : i32, i32
  }
  func.func @transform_2(%arg0: i32, %arg1: memref<1xi32, #tpu.memory_space<smem>>) -> (i32, i32) {
    %c0_i32 = arith.constant 0 : i32
    %c0_i32_0 = arith.constant 0 : i32
    %c0_i32_1 = arith.constant 0 : i32
    return %c0_i32, %c0_i32_0 : i32, i32
  }
  func.func @transform_3(%arg0: i32, %arg1: memref<1xi32, #tpu.memory_space<smem>>) -> (i32, i32, i32) {
    %c0_i32 = arith.constant 0 : i32
    %c0_i32_0 = arith.constant 0 : i32
    %c0_i32_1 = arith.constant 0 : i32
    return %arg0, %c0_i32, %c0_i32_0 : i32, i32, i32
  }
}

module attributes {stable_mosaic.version = 11 : i64} {
  func.func @lstm_recurrence_kernel(%arg0: i32, %arg1: i32, %arg2: memref<1xi32, #tpu.memory_space<smem>>, %arg3: memref<8x8x512xf32, #tpu.memory_space<vmem>>, %arg4: memref<8x1xi32, #tpu.memory_space<vmem>>, %arg5: memref<128x512xf32, #tpu.memory_space<any>>, %arg6: memref<8x8x128xf32, #tpu.memory_space<vmem>>, %arg7: memref<128x512xf32, #tpu.memory_space<vmem>>, %arg8: memref<8x128xf32, #tpu.memory_space<vmem>>, %arg9: memref<8x128xf32, #tpu.memory_space<vmem>>) attributes {dimension_semantics = [#tpu.dimension_semantics<parallel>, #tpu.dimension_semantics<arbitrary>], iteration_bounds = array<i64: 1, 1>, scalar_prefetch = 1 : i64, scratch_operands = 3 : i64, tpu.core_type = #tpu.core_type<tc>, window_params = [{transform_indices = @transform_0, window_bounds = array<i64: 8, 8, 512>}, {transform_indices = @transform_1, window_bounds = array<i64: 8, 1>}, {}, {transform_indices = @transform_3, window_bounds = array<i64: 8, 8, 128>}]} {
    %c0_i32 = arith.constant 0 : i32
    %0 = arith.cmpi eq, %arg1, %c0_i32 : i32
    %1 = arith.extui %0 : i1 to i32
    %c0_i32_0 = arith.constant 0 : i32
    %2 = arith.cmpi ne, %1, %c0_i32_0 : i32
    scf.if %2 {
      "tpu.region"() ({
        %15 = tpu.sem_alloc : memref<!tpu.dma_semaphore, #tpu.memory_space<semaphore_mem>>
        tpu.enqueue_dma source(%arg5 : memref<128x512xf32, #tpu.memory_space<any>>) target(%arg7 : memref<128x512xf32, #tpu.memory_space<vmem>>) target_semaphore(%15 : memref<!tpu.dma_semaphore, #tpu.memory_space<semaphore_mem>>)
        tpu.wait_dma2 semaphore(%15 : memref<!tpu.dma_semaphore, #tpu.memory_space<semaphore_mem>>) src(%arg5 : memref<128x512xf32, #tpu.memory_space<any>>) dst(%arg7 : memref<128x512xf32, #tpu.memory_space<vmem>>)
        tpu.yield
      }) : () -> ()
      %cst = arith.constant 0.000000e+00 : f32
      %11 = vector.broadcast %cst : f32 to vector<8x128xf32>
      %c0_3 = arith.constant 0 : index
      %c0_4 = arith.constant 0 : index
      %12 = vector.load %arg8[%c0_3, %c0_4] : memref<8x128xf32, #tpu.memory_space<vmem>>, vector<8x128xf32>
      tpu.vector_store %arg8[%c0_3, %c0_4], %11 {strides = array<i32>} : memref<8x128xf32, #tpu.memory_space<vmem>>, vector<8x128xf32>,
      %cst_5 = arith.constant 0.000000e+00 : f32
      %13 = vector.broadcast %cst_5 : f32 to vector<8x128xf32>
      %c0_6 = arith.constant 0 : index
      %c0_7 = arith.constant 0 : index
      %14 = vector.load %arg9[%c0_6, %c0_7] : memref<8x128xf32, #tpu.memory_space<vmem>>, vector<8x128xf32>
      tpu.vector_store %arg9[%c0_6, %c0_7], %13 {strides = array<i32>} : memref<8x128xf32, #tpu.memory_space<vmem>>, vector<8x128xf32>,
    } else {
    }
    %c8_i32 = arith.constant 8 : i32
    %3 = arith.muli %arg1, %c8_i32 : i32
    %c0 = arith.constant 0 : index
    %4 = memref.load %arg2[%c0] : memref<1xi32, #tpu.memory_space<smem>>
    %5 = arith.cmpi slt, %3, %4 : i32
    %6 = arith.extui %5 : i1 to i32
    %c0_i32_1 = arith.constant 0 : i32
    %7 = arith.cmpi ne, %6, %c0_i32_1 : i32
    scf.if %7 {
      %c0_3 = arith.constant 0 : index
      %c0_4 = arith.constant 0 : index
      %11 = vector.load %arg4[%c0_3, %c0_4] : memref<8x1xi32, #tpu.memory_space<vmem>>, vector<8x1xi32>
      %c0_i32_5 = arith.constant 0 : i32
      %c8_i32_6 = arith.constant 8 : i32
      %12 = arith.muli %arg1, %c8_i32_6 : i32
      %13 = arith.addi %12, %c0_i32_5 : i32
      %c0_7 = arith.constant 0 : index
      %c0_8 = arith.constant 0 : index
      %14 = vector.load %arg8[%c0_7, %c0_8] : memref<8x128xf32, #tpu.memory_space<vmem>>, vector<8x128xf32>
      %c0_9 = arith.constant 0 : index
      %c0_10 = arith.constant 0 : index
      %15 = vector.load %arg7[%c0_9, %c0_10] : memref<128x512xf32, #tpu.memory_space<vmem>>, vector<128x512xf32>
      %cst = arith.constant dense<0.000000e+00> : vector<8x512xf32>
      %16 = tpu.matmul %14, %15, %cst {dimension_numbers = #tpu.dot_dimension_numbers<[1], [0], [0], [1], [0, 0, 1, 1], [], []>} : vector<8x128xf32>, vector<128x512xf32>, vector<8x512xf32> -> vector<8x512xf32>
      %17 = arith.index_cast %c0_i32_5 : i32 to index
      %c0_11 = arith.constant 0 : index
      %c0_12 = arith.constant 0 : index
      %18 = vector.load %arg3[%17, %c0_11, %c0_12] : memref<8x8x512xf32, #tpu.memory_space<vmem>>, vector<1x8x512xf32>
      %19 = vector.shape_cast %18 : vector<1x8x512xf32> to vector<8x512xf32>
      %20 = arith.addf %16, %19 : vector<8x512xf32>
      %21 = vector.extract_strided_slice %20 {offsets = [0, 0], sizes = [8, 128], strides = [1, 1]} : vector<8x512xf32> to vector<8x128xf32>
      %22 = arith.negf %21 : vector<8x128xf32>
      %23 = math.exp %22 : vector<8x128xf32>
      %cst_13 = arith.constant 1.000000e+00 : f32
      %24 = vector.broadcast %cst_13 : f32 to vector<8x128xf32>
      %25 = arith.addf %24, %23 : vector<8x128xf32>
      %26 = arith.divf %24, %25 : vector<8x128xf32>
      %27 = vector.extract_strided_slice %20 {offsets = [0, 128], sizes = [8, 128], strides = [1, 1]} : vector<8x512xf32> to vector<8x128xf32>
      %28 = arith.negf %27 : vector<8x128xf32>
      %29 = math.exp %28 : vector<8x128xf32>
      %cst_14 = arith.constant 1.000000e+00 : f32
      %30 = vector.broadcast %cst_14 : f32 to vector<8x128xf32>
      %31 = arith.addf %30, %29 : vector<8x128xf32>
      %32 = arith.divf %30, %31 : vector<8x128xf32>
      %33 = vector.extract_strided_slice %20 {offsets = [0, 256], sizes = [8, 128], strides = [1, 1]} : vector<8x512xf32> to vector<8x128xf32>
      %34 = math.tanh %33 : vector<8x128xf32>
      %35 = vector.extract_strided_slice %20 {offsets = [0, 384], sizes = [8, 128], strides = [1, 1]} : vector<8x512xf32> to vector<8x128xf32>
      %36 = arith.negf %35 : vector<8x128xf32>
      %37 = math.exp %36 : vector<8x128xf32>
      %cst_15 = arith.constant 1.000000e+00 : f32
      %38 = vector.broadcast %cst_15 : f32 to vector<8x128xf32>
      %39 = arith.addf %38, %37 : vector<8x128xf32>
      %40 = arith.divf %38, %39 : vector<8x128xf32>
      %c0_16 = arith.constant 0 : index
      %c0_17 = arith.constant 0 : index
      %41 = vector.load %arg9[%c0_16, %c0_17] : memref<8x128xf32, #tpu.memory_space<vmem>>, vector<8x128xf32>
      %42 = arith.mulf %32, %41 : vector<8x128xf32>
      %43 = arith.mulf %26, %34 : vector<8x128xf32>
      %44 = arith.addf %42, %43 : vector<8x128xf32>
      %45 = math.tanh %44 : vector<8x128xf32>
      %46 = arith.mulf %40, %45 : vector<8x128xf32>
      %47 = vector.broadcast %13 : i32 to vector<8x1xi32>
      %48 = arith.cmpi slt, %47, %11 : vector<8x1xi32>
      %c0_18 = arith.constant 0 : index
      %c0_19 = arith.constant 0 : index
      %49 = vector.load %arg9[%c0_18, %c0_19] : memref<8x128xf32, #tpu.memory_space<vmem>>, vector<8x128xf32>
      %50 = vector.shape_cast %48 : vector<8x1xi1> to vector<8x1xi1>
      %51 = vector.broadcast %50 : vector<8x1xi1> to vector<8x128xi1>
      %52 = arith.select %51, %44, %49 : vector<8x128xi1>, vector<8x128xf32>
      %c0_20 = arith.constant 0 : index
      %c0_21 = arith.constant 0 : index
      %53 = vector.load %arg9[%c0_20, %c0_21] : memref<8x128xf32, #tpu.memory_space<vmem>>, vector<8x128xf32>
      tpu.vector_store %arg9[%c0_20, %c0_21], %52 {strides = array<i32>} : memref<8x128xf32, #tpu.memory_space<vmem>>, vector<8x128xf32>,
      %c0_22 = arith.constant 0 : index
      %c0_23 = arith.constant 0 : index
      %54 = vector.load %arg8[%c0_22, %c0_23] : memref<8x128xf32, #tpu.memory_space<vmem>>, vector<8x128xf32>
      %55 = vector.shape_cast %48 : vector<8x1xi1> to vector<8x1xi1>
      %56 = vector.broadcast %55 : vector<8x1xi1> to vector<8x128xi1>
      %57 = arith.select %56, %46, %54 : vector<8x128xi1>, vector<8x128xf32>
      %c0_24 = arith.constant 0 : index
      %c0_25 = arith.constant 0 : index
      %58 = vector.load %arg8[%c0_24, %c0_25] : memref<8x128xf32, #tpu.memory_space<vmem>>, vector<8x128xf32>
      tpu.vector_store %arg8[%c0_24, %c0_25], %57 {strides = array<i32>} : memref<8x128xf32, #tpu.memory_space<vmem>>, vector<8x128xf32>,
      %cst_26 = arith.constant 0.000000e+00 : f32
      %59 = vector.shape_cast %48 : vector<8x1xi1> to vector<8x1xi1>
      %60 = vector.broadcast %59 : vector<8x1xi1> to vector<8x128xi1>
      %61 = vector.broadcast %cst_26 : f32 to vector<8x128xf32>
      %62 = arith.select %60, %46, %61 : vector<8x128xi1>, vector<8x128xf32>
      %63 = arith.index_cast %c0_i32_5 : i32 to index
      %c0_27 = arith.constant 0 : index
      %c0_28 = arith.constant 0 : index
      %64 = vector.load %arg6[%63, %c0_27, %c0_28] : memref<8x8x128xf32, #tpu.memory_space<vmem>>, vector<1x8x128xf32>
      %65 = vector.shape_cast %64 : vector<1x8x128xf32> to vector<8x128xf32>
      %66 = vector.shape_cast %62 : vector<8x128xf32> to vector<1x8x128xf32>
      tpu.vector_store %arg6[%63, %c0_27, %c0_28], %66 {strides = array<i32>} : memref<8x8x128xf32, #tpu.memory_space<vmem>>, vector<1x8x128xf32>,
      %c1_i32 = arith.constant 1 : i32
      %c8_i32_29 = arith.constant 8 : i32
      %67 = arith.muli %arg1, %c8_i32_29 : i32
      %68 = arith.addi %67, %c1_i32 : i32
      %c0_30 = arith.constant 0 : index
      %c0_31 = arith.constant 0 : index
      %69 = vector.load %arg8[%c0_30, %c0_31] : memref<8x128xf32, #tpu.memory_space<vmem>>, vector<8x128xf32>
      %c0_32 = arith.constant 0 : index
      %c0_33 = arith.constant 0 : index
      %70 = vector.load %arg7[%c0_32, %c0_33] : memref<128x512xf32, #tpu.memory_space<vmem>>, vector<128x512xf32>
      %cst_34 = arith.constant dense<0.000000e+00> : vector<8x512xf32>
      %71 = tpu.matmul %69, %70, %cst_34 {dimension_numbers = #tpu.dot_dimension_numbers<[1], [0], [0], [1], [0, 0, 1, 1], [], []>} : vector<8x128xf32>, vector<128x512xf32>, vector<8x512xf32> -> vector<8x512xf32>
      %72 = arith.index_cast %c1_i32 : i32 to index
      %c0_35 = arith.constant 0 : index
      %c0_36 = arith.constant 0 : index
      %73 = vector.load %arg3[%72, %c0_35, %c0_36] : memref<8x8x512xf32, #tpu.memory_space<vmem>>, vector<1x8x512xf32>
      %74 = vector.shape_cast %73 : vector<1x8x512xf32> to vector<8x512xf32>
      %75 = arith.addf %71, %74 : vector<8x512xf32>
      %76 = vector.extract_strided_slice %75 {offsets = [0, 0], sizes = [8, 128], strides = [1, 1]} : vector<8x512xf32> to vector<8x128xf32>
      %77 = arith.negf %76 : vector<8x128xf32>
      %78 = math.exp %77 : vector<8x128xf32>
      %cst_37 = arith.constant 1.000000e+00 : f32
      %79 = vector.broadcast %cst_37 : f32 to vector<8x128xf32>
      %80 = arith.addf %79, %78 : vector<8x128xf32>
      %81 = arith.divf %79, %80 : vector<8x128xf32>
      %82 = vector.extract_strided_slice %75 {offsets = [0, 128], sizes = [8, 128], strides = [1, 1]} : vector<8x512xf32> to vector<8x128xf32>
      %83 = arith.negf %82 : vector<8x128xf32>
      %84 = math.exp %83 : vector<8x128xf32>
      %cst_38 = arith.constant 1.000000e+00 : f32
      %85 = vector.broadcast %cst_38 : f32 to vector<8x128xf32>
      %86 = arith.addf %85, %84 : vector<8x128xf32>
      %87 = arith.divf %85, %86 : vector<8x128xf32>
      %88 = vector.extract_strided_slice %75 {offsets = [0, 256], sizes = [8, 128], strides = [1, 1]} : vector<8x512xf32> to vector<8x128xf32>
      %89 = math.tanh %88 : vector<8x128xf32>
      %90 = vector.extract_strided_slice %75 {offsets = [0, 384], sizes = [8, 128], strides = [1, 1]} : vector<8x512xf32> to vector<8x128xf32>
      %91 = arith.negf %90 : vector<8x128xf32>
      %92 = math.exp %91 : vector<8x128xf32>
      %cst_39 = arith.constant 1.000000e+00 : f32
      %93 = vector.broadcast %cst_39 : f32 to vector<8x128xf32>
      %94 = arith.addf %93, %92 : vector<8x128xf32>
      %95 = arith.divf %93, %94 : vector<8x128xf32>
      %c0_40 = arith.constant 0 : index
      %c0_41 = arith.constant 0 : index
      %96 = vector.load %arg9[%c0_40, %c0_41] : memref<8x128xf32, #tpu.memory_space<vmem>>, vector<8x128xf32>
      %97 = arith.mulf %87, %96 : vector<8x128xf32>
      %98 = arith.mulf %81, %89 : vector<8x128xf32>
      %99 = arith.addf %97, %98 : vector<8x128xf32>
      %100 = math.tanh %99 : vector<8x128xf32>
      %101 = arith.mulf %95, %100 : vector<8x128xf32>
      %102 = vector.broadcast %68 : i32 to vector<8x1xi32>
      %103 = arith.cmpi slt, %102, %11 : vector<8x1xi32>
      %c0_42 = arith.constant 0 : index
      %c0_43 = arith.constant 0 : index
      %104 = vector.load %arg9[%c0_42, %c0_43] : memref<8x128xf32, #tpu.memory_space<vmem>>, vector<8x128xf32>
      %105 = vector.shape_cast %103 : vector<8x1xi1> to vector<8x1xi1>
      %106 = vector.broadcast %105 : vector<8x1xi1> to vector<8x128xi1>
      %107 = arith.select %106, %99, %104 : vector<8x128xi1>, vector<8x128xf32>
      %c0_44 = arith.constant 0 : index
      %c0_45 = arith.constant 0 : index
      %108 = vector.load %arg9[%c0_44, %c0_45] : memref<8x128xf32, #tpu.memory_space<vmem>>, vector<8x128xf32>
      tpu.vector_store %arg9[%c0_44, %c0_45], %107 {strides = array<i32>} : memref<8x128xf32, #tpu.memory_space<vmem>>, vector<8x128xf32>,
      %c0_46 = arith.constant 0 : index
      %c0_47 = arith.constant 0 : index
      %109 = vector.load %arg8[%c0_46, %c0_47] : memref<8x128xf32, #tpu.memory_space<vmem>>, vector<8x128xf32>
      %110 = vector.shape_cast %103 : vector<8x1xi1> to vector<8x1xi1>
      %111 = vector.broadcast %110 : vector<8x1xi1> to vector<8x128xi1>
      %112 = arith.select %111, %101, %109 : vector<8x128xi1>, vector<8x128xf32>
      %c0_48 = arith.constant 0 : index
      %c0_49 = arith.constant 0 : index
      %113 = vector.load %arg8[%c0_48, %c0_49] : memref<8x128xf32, #tpu.memory_space<vmem>>, vector<8x128xf32>
      tpu.vector_store %arg8[%c0_48, %c0_49], %112 {strides = array<i32>} : memref<8x128xf32, #tpu.memory_space<vmem>>, vector<8x128xf32>,
      %cst_50 = arith.constant 0.000000e+00 : f32
      %114 = vector.shape_cast %103 : vector<8x1xi1> to vector<8x1xi1>
      %115 = vector.broadcast %114 : vector<8x1xi1> to vector<8x128xi1>
      %116 = vector.broadcast %cst_50 : f32 to vector<8x128xf32>
      %117 = arith.select %115, %101, %116 : vector<8x128xi1>, vector<8x128xf32>
      %118 = arith.index_cast %c1_i32 : i32 to index
      %c0_51 = arith.constant 0 : index
      %c0_52 = arith.constant 0 : index
      %119 = vector.load %arg6[%118, %c0_51, %c0_52] : memref<8x8x128xf32, #tpu.memory_space<vmem>>, vector<1x8x128xf32>
      %120 = vector.shape_cast %119 : vector<1x8x128xf32> to vector<8x128xf32>
      %121 = vector.shape_cast %117 : vector<8x128xf32> to vector<1x8x128xf32>
      tpu.vector_store %arg6[%118, %c0_51, %c0_52], %121 {strides = array<i32>} : memref<8x8x128xf32, #tpu.memory_space<vmem>>, vector<1x8x128xf32>,
      %c2_i32 = arith.constant 2 : i32
      %c8_i32_53 = arith.constant 8 : i32
      %122 = arith.muli %arg1, %c8_i32_53 : i32
      %123 = arith.addi %122, %c2_i32 : i32
      %c0_54 = arith.constant 0 : index
      %c0_55 = arith.constant 0 : index
      %124 = vector.load %arg8[%c0_54, %c0_55] : memref<8x128xf32, #tpu.memory_space<vmem>>, vector<8x128xf32>
      %c0_56 = arith.constant 0 : index
      %c0_57 = arith.constant 0 : index
      %125 = vector.load %arg7[%c0_56, %c0_57] : memref<128x512xf32, #tpu.memory_space<vmem>>, vector<128x512xf32>
      %cst_58 = arith.constant dense<0.000000e+00> : vector<8x512xf32>
      %126 = tpu.matmul %124, %125, %cst_58 {dimension_numbers = #tpu.dot_dimension_numbers<[1], [0], [0], [1], [0, 0, 1, 1], [], []>} : vector<8x128xf32>, vector<128x512xf32>, vector<8x512xf32> -> vector<8x512xf32>
      %127 = arith.index_cast %c2_i32 : i32 to index
      %c0_59 = arith.constant 0 : index
      %c0_60 = arith.constant 0 : index
      %128 = vector.load %arg3[%127, %c0_59, %c0_60] : memref<8x8x512xf32, #tpu.memory_space<vmem>>, vector<1x8x512xf32>
      %129 = vector.shape_cast %128 : vector<1x8x512xf32> to vector<8x512xf32>
      %130 = arith.addf %126, %129 : vector<8x512xf32>
      %131 = vector.extract_strided_slice %130 {offsets = [0, 0], sizes = [8, 128], strides = [1, 1]} : vector<8x512xf32> to vector<8x128xf32>
      %132 = arith.negf %131 : vector<8x128xf32>
      %133 = math.exp %132 : vector<8x128xf32>
      %cst_61 = arith.constant 1.000000e+00 : f32
      %134 = vector.broadcast %cst_61 : f32 to vector<8x128xf32>
      %135 = arith.addf %134, %133 : vector<8x128xf32>
      %136 = arith.divf %134, %135 : vector<8x128xf32>
      %137 = vector.extract_strided_slice %130 {offsets = [0, 128], sizes = [8, 128], strides = [1, 1]} : vector<8x512xf32> to vector<8x128xf32>
      %138 = arith.negf %137 : vector<8x128xf32>
      %139 = math.exp %138 : vector<8x128xf32>
      %cst_62 = arith.constant 1.000000e+00 : f32
      %140 = vector.broadcast %cst_62 : f32 to vector<8x128xf32>
      %141 = arith.addf %140, %139 : vector<8x128xf32>
      %142 = arith.divf %140, %141 : vector<8x128xf32>
      %143 = vector.extract_strided_slice %130 {offsets = [0, 256], sizes = [8, 128], strides = [1, 1]} : vector<8x512xf32> to vector<8x128xf32>
      %144 = math.tanh %143 : vector<8x128xf32>
      %145 = vector.extract_strided_slice %130 {offsets = [0, 384], sizes = [8, 128], strides = [1, 1]} : vector<8x512xf32> to vector<8x128xf32>
      %146 = arith.negf %145 : vector<8x128xf32>
      %147 = math.exp %146 : vector<8x128xf32>
      %cst_63 = arith.constant 1.000000e+00 : f32
      %148 = vector.broadcast %cst_63 : f32 to vector<8x128xf32>
      %149 = arith.addf %148, %147 : vector<8x128xf32>
      %150 = arith.divf %148, %149 : vector<8x128xf32>
      %c0_64 = arith.constant 0 : index
      %c0_65 = arith.constant 0 : index
      %151 = vector.load %arg9[%c0_64, %c0_65] : memref<8x128xf32, #tpu.memory_space<vmem>>, vector<8x128xf32>
      %152 = arith.mulf %142, %151 : vector<8x128xf32>
      %153 = arith.mulf %136, %144 : vector<8x128xf32>
      %154 = arith.addf %152, %153 : vector<8x128xf32>
      %155 = math.tanh %154 : vector<8x128xf32>
      %156 = arith.mulf %150, %155 : vector<8x128xf32>
      %157 = vector.broadcast %123 : i32 to vector<8x1xi32>
      %158 = arith.cmpi slt, %157, %11 : vector<8x1xi32>
      %c0_66 = arith.constant 0 : index
      %c0_67 = arith.constant 0 : index
      %159 = vector.load %arg9[%c0_66, %c0_67] : memref<8x128xf32, #tpu.memory_space<vmem>>, vector<8x128xf32>
      %160 = vector.shape_cast %158 : vector<8x1xi1> to vector<8x1xi1>
      %161 = vector.broadcast %160 : vector<8x1xi1> to vector<8x128xi1>
      %162 = arith.select %161, %154, %159 : vector<8x128xi1>, vector<8x128xf32>
      %c0_68 = arith.constant 0 : index
      %c0_69 = arith.constant 0 : index
      %163 = vector.load %arg9[%c0_68, %c0_69] : memref<8x128xf32, #tpu.memory_space<vmem>>, vector<8x128xf32>
      tpu.vector_store %arg9[%c0_68, %c0_69], %162 {strides = array<i32>} : memref<8x128xf32, #tpu.memory_space<vmem>>, vector<8x128xf32>,
      %c0_70 = arith.constant 0 : index
      %c0_71 = arith.constant 0 : index
      %164 = vector.load %arg8[%c0_70, %c0_71] : memref<8x128xf32, #tpu.memory_space<vmem>>, vector<8x128xf32>
      %165 = vector.shape_cast %158 : vector<8x1xi1> to vector<8x1xi1>
      %166 = vector.broadcast %165 : vector<8x1xi1> to vector<8x128xi1>
      %167 = arith.select %166, %156, %164 : vector<8x128xi1>, vector<8x128xf32>
      %c0_72 = arith.constant 0 : index
      %c0_73 = arith.constant 0 : index
      %168 = vector.load %arg8[%c0_72, %c0_73] : memref<8x128xf32, #tpu.memory_space<vmem>>, vector<8x128xf32>
      tpu.vector_store %arg8[%c0_72, %c0_73], %167 {strides = array<i32>} : memref<8x128xf32, #tpu.memory_space<vmem>>, vector<8x128xf32>,
      %cst_74 = arith.constant 0.000000e+00 : f32
      %169 = vector.shape_cast %158 : vector<8x1xi1> to vector<8x1xi1>
      %170 = vector.broadcast %169 : vector<8x1xi1> to vector<8x128xi1>
      %171 = vector.broadcast %cst_74 : f32 to vector<8x128xf32>
      %172 = arith.select %170, %156, %171 : vector<8x128xi1>, vector<8x128xf32>
      %173 = arith.index_cast %c2_i32 : i32 to index
      %c0_75 = arith.constant 0 : index
      %c0_76 = arith.constant 0 : index
      %174 = vector.load %arg6[%173, %c0_75, %c0_76] : memref<8x8x128xf32, #tpu.memory_space<vmem>>, vector<1x8x128xf32>
      %175 = vector.shape_cast %174 : vector<1x8x128xf32> to vector<8x128xf32>
      %176 = vector.shape_cast %172 : vector<8x128xf32> to vector<1x8x128xf32>
      tpu.vector_store %arg6[%173, %c0_75, %c0_76], %176 {strides = array<i32>} : memref<8x8x128xf32, #tpu.memory_space<vmem>>, vector<1x8x128xf32>,
      %c3_i32 = arith.constant 3 : i32
      %c8_i32_77 = arith.constant 8 : i32
      %177 = arith.muli %arg1, %c8_i32_77 : i32
      %178 = arith.addi %177, %c3_i32 : i32
      %c0_78 = arith.constant 0 : index
      %c0_79 = arith.constant 0 : index
      %179 = vector.load %arg8[%c0_78, %c0_79] : memref<8x128xf32, #tpu.memory_space<vmem>>, vector<8x128xf32>
      %c0_80 = arith.constant 0 : index
      %c0_81 = arith.constant 0 : index
      %180 = vector.load %arg7[%c0_80, %c0_81] : memref<128x512xf32, #tpu.memory_space<vmem>>, vector<128x512xf32>
      %cst_82 = arith.constant dense<0.000000e+00> : vector<8x512xf32>
      %181 = tpu.matmul %179, %180, %cst_82 {dimension_numbers = #tpu.dot_dimension_numbers<[1], [0], [0], [1], [0, 0, 1, 1], [], []>} : vector<8x128xf32>, vector<128x512xf32>, vector<8x512xf32> -> vector<8x512xf32>
      %182 = arith.index_cast %c3_i32 : i32 to index
      %c0_83 = arith.constant 0 : index
      %c0_84 = arith.constant 0 : index
      %183 = vector.load %arg3[%182, %c0_83, %c0_84] : memref<8x8x512xf32, #tpu.memory_space<vmem>>, vector<1x8x512xf32>
      %184 = vector.shape_cast %183 : vector<1x8x512xf32> to vector<8x512xf32>
      %185 = arith.addf %181, %184 : vector<8x512xf32>
      %186 = vector.extract_strided_slice %185 {offsets = [0, 0], sizes = [8, 128], strides = [1, 1]} : vector<8x512xf32> to vector<8x128xf32>
      %187 = arith.negf %186 : vector<8x128xf32>
      %188 = math.exp %187 : vector<8x128xf32>
      %cst_85 = arith.constant 1.000000e+00 : f32
      %189 = vector.broadcast %cst_85 : f32 to vector<8x128xf32>
      %190 = arith.addf %189, %188 : vector<8x128xf32>
      %191 = arith.divf %189, %190 : vector<8x128xf32>
      %192 = vector.extract_strided_slice %185 {offsets = [0, 128], sizes = [8, 128], strides = [1, 1]} : vector<8x512xf32> to vector<8x128xf32>
      %193 = arith.negf %192 : vector<8x128xf32>
      %194 = math.exp %193 : vector<8x128xf32>
      %cst_86 = arith.constant 1.000000e+00 : f32
      %195 = vector.broadcast %cst_86 : f32 to vector<8x128xf32>
      %196 = arith.addf %195, %194 : vector<8x128xf32>
      %197 = arith.divf %195, %196 : vector<8x128xf32>
      %198 = vector.extract_strided_slice %185 {offsets = [0, 256], sizes = [8, 128], strides = [1, 1]} : vector<8x512xf32> to vector<8x128xf32>
      %199 = math.tanh %198 : vector<8x128xf32>
      %200 = vector.extract_strided_slice %185 {offsets = [0, 384], sizes = [8, 128], strides = [1, 1]} : vector<8x512xf32> to vector<8x128xf32>
      %201 = arith.negf %200 : vector<8x128xf32>
      %202 = math.exp %201 : vector<8x128xf32>
      %cst_87 = arith.constant 1.000000e+00 : f32
      %203 = vector.broadcast %cst_87 : f32 to vector<8x128xf32>
      %204 = arith.addf %203, %202 : vector<8x128xf32>
      %205 = arith.divf %203, %204 : vector<8x128xf32>
      %c0_88 = arith.constant 0 : index
      %c0_89 = arith.constant 0 : index
      %206 = vector.load %arg9[%c0_88, %c0_89] : memref<8x128xf32, #tpu.memory_space<vmem>>, vector<8x128xf32>
      %207 = arith.mulf %197, %206 : vector<8x128xf32>
      %208 = arith.mulf %191, %199 : vector<8x128xf32>
      %209 = arith.addf %207, %208 : vector<8x128xf32>
      %210 = math.tanh %209 : vector<8x128xf32>
      %211 = arith.mulf %205, %210 : vector<8x128xf32>
      %212 = vector.broadcast %178 : i32 to vector<8x1xi32>
      %213 = arith.cmpi slt, %212, %11 : vector<8x1xi32>
      %c0_90 = arith.constant 0 : index
      %c0_91 = arith.constant 0 : index
      %214 = vector.load %arg9[%c0_90, %c0_91] : memref<8x128xf32, #tpu.memory_space<vmem>>, vector<8x128xf32>
      %215 = vector.shape_cast %213 : vector<8x1xi1> to vector<8x1xi1>
      %216 = vector.broadcast %215 : vector<8x1xi1> to vector<8x128xi1>
      %217 = arith.select %216, %209, %214 : vector<8x128xi1>, vector<8x128xf32>
      %c0_92 = arith.constant 0 : index
      %c0_93 = arith.constant 0 : index
      %218 = vector.load %arg9[%c0_92, %c0_93] : memref<8x128xf32, #tpu.memory_space<vmem>>, vector<8x128xf32>
      tpu.vector_store %arg9[%c0_92, %c0_93], %217 {strides = array<i32>} : memref<8x128xf32, #tpu.memory_space<vmem>>, vector<8x128xf32>,
      %c0_94 = arith.constant 0 : index
      %c0_95 = arith.constant 0 : index
      %219 = vector.load %arg8[%c0_94, %c0_95] : memref<8x128xf32, #tpu.memory_space<vmem>>, vector<8x128xf32>
      %220 = vector.shape_cast %213 : vector<8x1xi1> to vector<8x1xi1>
      %221 = vector.broadcast %220 : vector<8x1xi1> to vector<8x128xi1>
      %222 = arith.select %221, %211, %219 : vector<8x128xi1>, vector<8x128xf32>
      %c0_96 = arith.constant 0 : index
      %c0_97 = arith.constant 0 : index
      %223 = vector.load %arg8[%c0_96, %c0_97] : memref<8x128xf32, #tpu.memory_space<vmem>>, vector<8x128xf32>
      tpu.vector_store %arg8[%c0_96, %c0_97], %222 {strides = array<i32>} : memref<8x128xf32, #tpu.memory_space<vmem>>, vector<8x128xf32>,
      %cst_98 = arith.constant 0.000000e+00 : f32
      %224 = vector.shape_cast %213 : vector<8x1xi1> to vector<8x1xi1>
      %225 = vector.broadcast %224 : vector<8x1xi1> to vector<8x128xi1>
      %226 = vector.broadcast %cst_98 : f32 to vector<8x128xf32>
      %227 = arith.select %225, %211, %226 : vector<8x128xi1>, vector<8x128xf32>
      %228 = arith.index_cast %c3_i32 : i32 to index
      %c0_99 = arith.constant 0 : index
      %c0_100 = arith.constant 0 : index
      %229 = vector.load %arg6[%228, %c0_99, %c0_100] : memref<8x8x128xf32, #tpu.memory_space<vmem>>, vector<1x8x128xf32>
      %230 = vector.shape_cast %229 : vector<1x8x128xf32> to vector<8x128xf32>
      %231 = vector.shape_cast %227 : vector<8x128xf32> to vector<1x8x128xf32>
      tpu.vector_store %arg6[%228, %c0_99, %c0_100], %231 {strides = array<i32>} : memref<8x8x128xf32, #tpu.memory_space<vmem>>, vector<1x8x128xf32>,
      %c4_i32 = arith.constant 4 : i32
      %c8_i32_101 = arith.constant 8 : i32
      %232 = arith.muli %arg1, %c8_i32_101 : i32
      %233 = arith.addi %232, %c4_i32 : i32
      %c0_102 = arith.constant 0 : index
      %c0_103 = arith.constant 0 : index
      %234 = vector.load %arg8[%c0_102, %c0_103] : memref<8x128xf32, #tpu.memory_space<vmem>>, vector<8x128xf32>
      %c0_104 = arith.constant 0 : index
      %c0_105 = arith.constant 0 : index
      %235 = vector.load %arg7[%c0_104, %c0_105] : memref<128x512xf32, #tpu.memory_space<vmem>>, vector<128x512xf32>
      %cst_106 = arith.constant dense<0.000000e+00> : vector<8x512xf32>
      %236 = tpu.matmul %234, %235, %cst_106 {dimension_numbers = #tpu.dot_dimension_numbers<[1], [0], [0], [1], [0, 0, 1, 1], [], []>} : vector<8x128xf32>, vector<128x512xf32>, vector<8x512xf32> -> vector<8x512xf32>
      %237 = arith.index_cast %c4_i32 : i32 to index
      %c0_107 = arith.constant 0 : index
      %c0_108 = arith.constant 0 : index
      %238 = vector.load %arg3[%237, %c0_107, %c0_108] : memref<8x8x512xf32, #tpu.memory_space<vmem>>, vector<1x8x512xf32>
      %239 = vector.shape_cast %238 : vector<1x8x512xf32> to vector<8x512xf32>
      %240 = arith.addf %236, %239 : vector<8x512xf32>
      %241 = vector.extract_strided_slice %240 {offsets = [0, 0], sizes = [8, 128], strides = [1, 1]} : vector<8x512xf32> to vector<8x128xf32>
      %242 = arith.negf %241 : vector<8x128xf32>
      %243 = math.exp %242 : vector<8x128xf32>
      %cst_109 = arith.constant 1.000000e+00 : f32
      %244 = vector.broadcast %cst_109 : f32 to vector<8x128xf32>
      %245 = arith.addf %244, %243 : vector<8x128xf32>
      %246 = arith.divf %244, %245 : vector<8x128xf32>
      %247 = vector.extract_strided_slice %240 {offsets = [0, 128], sizes = [8, 128], strides = [1, 1]} : vector<8x512xf32> to vector<8x128xf32>
      %248 = arith.negf %247 : vector<8x128xf32>
      %249 = math.exp %248 : vector<8x128xf32>
      %cst_110 = arith.constant 1.000000e+00 : f32
      %250 = vector.broadcast %cst_110 : f32 to vector<8x128xf32>
      %251 = arith.addf %250, %249 : vector<8x128xf32>
      %252 = arith.divf %250, %251 : vector<8x128xf32>
      %253 = vector.extract_strided_slice %240 {offsets = [0, 256], sizes = [8, 128], strides = [1, 1]} : vector<8x512xf32> to vector<8x128xf32>
      %254 = math.tanh %253 : vector<8x128xf32>
      %255 = vector.extract_strided_slice %240 {offsets = [0, 384], sizes = [8, 128], strides = [1, 1]} : vector<8x512xf32> to vector<8x128xf32>
      %256 = arith.negf %255 : vector<8x128xf32>
      %257 = math.exp %256 : vector<8x128xf32>
      %cst_111 = arith.constant 1.000000e+00 : f32
      %258 = vector.broadcast %cst_111 : f32 to vector<8x128xf32>
      %259 = arith.addf %258, %257 : vector<8x128xf32>
      %260 = arith.divf %258, %259 : vector<8x128xf32>
      %c0_112 = arith.constant 0 : index
      %c0_113 = arith.constant 0 : index
      %261 = vector.load %arg9[%c0_112, %c0_113] : memref<8x128xf32, #tpu.memory_space<vmem>>, vector<8x128xf32>
      %262 = arith.mulf %252, %261 : vector<8x128xf32>
      %263 = arith.mulf %246, %254 : vector<8x128xf32>
      %264 = arith.addf %262, %263 : vector<8x128xf32>
      %265 = math.tanh %264 : vector<8x128xf32>
      %266 = arith.mulf %260, %265 : vector<8x128xf32>
      %267 = vector.broadcast %233 : i32 to vector<8x1xi32>
      %268 = arith.cmpi slt, %267, %11 : vector<8x1xi32>
      %c0_114 = arith.constant 0 : index
      %c0_115 = arith.constant 0 : index
      %269 = vector.load %arg9[%c0_114, %c0_115] : memref<8x128xf32, #tpu.memory_space<vmem>>, vector<8x128xf32>
      %270 = vector.shape_cast %268 : vector<8x1xi1> to vector<8x1xi1>
      %271 = vector.broadcast %270 : vector<8x1xi1> to vector<8x128xi1>
      %272 = arith.select %271, %264, %269 : vector<8x128xi1>, vector<8x128xf32>
      %c0_116 = arith.constant 0 : index
      %c0_117 = arith.constant 0 : index
      %273 = vector.load %arg9[%c0_116, %c0_117] : memref<8x128xf32, #tpu.memory_space<vmem>>, vector<8x128xf32>
      tpu.vector_store %arg9[%c0_116, %c0_117], %272 {strides = array<i32>} : memref<8x128xf32, #tpu.memory_space<vmem>>, vector<8x128xf32>,
      %c0_118 = arith.constant 0 : index
      %c0_119 = arith.constant 0 : index
      %274 = vector.load %arg8[%c0_118, %c0_119] : memref<8x128xf32, #tpu.memory_space<vmem>>, vector<8x128xf32>
      %275 = vector.shape_cast %268 : vector<8x1xi1> to vector<8x1xi1>
      %276 = vector.broadcast %275 : vector<8x1xi1> to vector<8x128xi1>
      %277 = arith.select %276, %266, %274 : vector<8x128xi1>, vector<8x128xf32>
      %c0_120 = arith.constant 0 : index
      %c0_121 = arith.constant 0 : index
      %278 = vector.load %arg8[%c0_120, %c0_121] : memref<8x128xf32, #tpu.memory_space<vmem>>, vector<8x128xf32>
      tpu.vector_store %arg8[%c0_120, %c0_121], %277 {strides = array<i32>} : memref<8x128xf32, #tpu.memory_space<vmem>>, vector<8x128xf32>,
      %cst_122 = arith.constant 0.000000e+00 : f32
      %279 = vector.shape_cast %268 : vector<8x1xi1> to vector<8x1xi1>
      %280 = vector.broadcast %279 : vector<8x1xi1> to vector<8x128xi1>
      %281 = vector.broadcast %cst_122 : f32 to vector<8x128xf32>
      %282 = arith.select %280, %266, %281 : vector<8x128xi1>, vector<8x128xf32>
      %283 = arith.index_cast %c4_i32 : i32 to index
      %c0_123 = arith.constant 0 : index
      %c0_124 = arith.constant 0 : index
      %284 = vector.load %arg6[%283, %c0_123, %c0_124] : memref<8x8x128xf32, #tpu.memory_space<vmem>>, vector<1x8x128xf32>
      %285 = vector.shape_cast %284 : vector<1x8x128xf32> to vector<8x128xf32>
      %286 = vector.shape_cast %282 : vector<8x128xf32> to vector<1x8x128xf32>
      tpu.vector_store %arg6[%283, %c0_123, %c0_124], %286 {strides = array<i32>} : memref<8x8x128xf32, #tpu.memory_space<vmem>>, vector<1x8x128xf32>,
      %c5_i32 = arith.constant 5 : i32
      %c8_i32_125 = arith.constant 8 : i32
      %287 = arith.muli %arg1, %c8_i32_125 : i32
      %288 = arith.addi %287, %c5_i32 : i32
      %c0_126 = arith.constant 0 : index
      %c0_127 = arith.constant 0 : index
      %289 = vector.load %arg8[%c0_126, %c0_127] : memref<8x128xf32, #tpu.memory_space<vmem>>, vector<8x128xf32>
      %c0_128 = arith.constant 0 : index
      %c0_129 = arith.constant 0 : index
      %290 = vector.load %arg7[%c0_128, %c0_129] : memref<128x512xf32, #tpu.memory_space<vmem>>, vector<128x512xf32>
      %cst_130 = arith.constant dense<0.000000e+00> : vector<8x512xf32>
      %291 = tpu.matmul %289, %290, %cst_130 {dimension_numbers = #tpu.dot_dimension_numbers<[1], [0], [0], [1], [0, 0, 1, 1], [], []>} : vector<8x128xf32>, vector<128x512xf32>, vector<8x512xf32> -> vector<8x512xf32>
      %292 = arith.index_cast %c5_i32 : i32 to index
      %c0_131 = arith.constant 0 : index
      %c0_132 = arith.constant 0 : index
      %293 = vector.load %arg3[%292, %c0_131, %c0_132] : memref<8x8x512xf32, #tpu.memory_space<vmem>>, vector<1x8x512xf32>
      %294 = vector.shape_cast %293 : vector<1x8x512xf32> to vector<8x512xf32>
      %295 = arith.addf %291, %294 : vector<8x512xf32>
      %296 = vector.extract_strided_slice %295 {offsets = [0, 0], sizes = [8, 128], strides = [1, 1]} : vector<8x512xf32> to vector<8x128xf32>
      %297 = arith.negf %296 : vector<8x128xf32>
      %298 = math.exp %297 : vector<8x128xf32>
      %cst_133 = arith.constant 1.000000e+00 : f32
      %299 = vector.broadcast %cst_133 : f32 to vector<8x128xf32>
      %300 = arith.addf %299, %298 : vector<8x128xf32>
      %301 = arith.divf %299, %300 : vector<8x128xf32>
      %302 = vector.extract_strided_slice %295 {offsets = [0, 128], sizes = [8, 128], strides = [1, 1]} : vector<8x512xf32> to vector<8x128xf32>
      %303 = arith.negf %302 : vector<8x128xf32>
      %304 = math.exp %303 : vector<8x128xf32>
      %cst_134 = arith.constant 1.000000e+00 : f32
      %305 = vector.broadcast %cst_134 : f32 to vector<8x128xf32>
      %306 = arith.addf %305, %304 : vector<8x128xf32>
      %307 = arith.divf %305, %306 : vector<8x128xf32>
      %308 = vector.extract_strided_slice %295 {offsets = [0, 256], sizes = [8, 128], strides = [1, 1]} : vector<8x512xf32> to vector<8x128xf32>
      %309 = math.tanh %308 : vector<8x128xf32>
      %310 = vector.extract_strided_slice %295 {offsets = [0, 384], sizes = [8, 128], strides = [1, 1]} : vector<8x512xf32> to vector<8x128xf32>
      %311 = arith.negf %310 : vector<8x128xf32>
      %312 = math.exp %311 : vector<8x128xf32>
      %cst_135 = arith.constant 1.000000e+00 : f32
      %313 = vector.broadcast %cst_135 : f32 to vector<8x128xf32>
      %314 = arith.addf %313, %312 : vector<8x128xf32>
      %315 = arith.divf %313, %314 : vector<8x128xf32>
      %c0_136 = arith.constant 0 : index
      %c0_137 = arith.constant 0 : index
      %316 = vector.load %arg9[%c0_136, %c0_137] : memref<8x128xf32, #tpu.memory_space<vmem>>, vector<8x128xf32>
      %317 = arith.mulf %307, %316 : vector<8x128xf32>
      %318 = arith.mulf %301, %309 : vector<8x128xf32>
      %319 = arith.addf %317, %318 : vector<8x128xf32>
      %320 = math.tanh %319 : vector<8x128xf32>
      %321 = arith.mulf %315, %320 : vector<8x128xf32>
      %322 = vector.broadcast %288 : i32 to vector<8x1xi32>
      %323 = arith.cmpi slt, %322, %11 : vector<8x1xi32>
      %c0_138 = arith.constant 0 : index
      %c0_139 = arith.constant 0 : index
      %324 = vector.load %arg9[%c0_138, %c0_139] : memref<8x128xf32, #tpu.memory_space<vmem>>, vector<8x128xf32>
      %325 = vector.shape_cast %323 : vector<8x1xi1> to vector<8x1xi1>
      %326 = vector.broadcast %325 : vector<8x1xi1> to vector<8x128xi1>
      %327 = arith.select %326, %319, %324 : vector<8x128xi1>, vector<8x128xf32>
      %c0_140 = arith.constant 0 : index
      %c0_141 = arith.constant 0 : index
      %328 = vector.load %arg9[%c0_140, %c0_141] : memref<8x128xf32, #tpu.memory_space<vmem>>, vector<8x128xf32>
      tpu.vector_store %arg9[%c0_140, %c0_141], %327 {strides = array<i32>} : memref<8x128xf32, #tpu.memory_space<vmem>>, vector<8x128xf32>,
      %c0_142 = arith.constant 0 : index
      %c0_143 = arith.constant 0 : index
      %329 = vector.load %arg8[%c0_142, %c0_143] : memref<8x128xf32, #tpu.memory_space<vmem>>, vector<8x128xf32>
      %330 = vector.shape_cast %323 : vector<8x1xi1> to vector<8x1xi1>
      %331 = vector.broadcast %330 : vector<8x1xi1> to vector<8x128xi1>
      %332 = arith.select %331, %321, %329 : vector<8x128xi1>, vector<8x128xf32>
      %c0_144 = arith.constant 0 : index
      %c0_145 = arith.constant 0 : index
      %333 = vector.load %arg8[%c0_144, %c0_145] : memref<8x128xf32, #tpu.memory_space<vmem>>, vector<8x128xf32>
      tpu.vector_store %arg8[%c0_144, %c0_145], %332 {strides = array<i32>} : memref<8x128xf32, #tpu.memory_space<vmem>>, vector<8x128xf32>,
      %cst_146 = arith.constant 0.000000e+00 : f32
      %334 = vector.shape_cast %323 : vector<8x1xi1> to vector<8x1xi1>
      %335 = vector.broadcast %334 : vector<8x1xi1> to vector<8x128xi1>
      %336 = vector.broadcast %cst_146 : f32 to vector<8x128xf32>
      %337 = arith.select %335, %321, %336 : vector<8x128xi1>, vector<8x128xf32>
      %338 = arith.index_cast %c5_i32 : i32 to index
      %c0_147 = arith.constant 0 : index
      %c0_148 = arith.constant 0 : index
      %339 = vector.load %arg6[%338, %c0_147, %c0_148] : memref<8x8x128xf32, #tpu.memory_space<vmem>>, vector<1x8x128xf32>
      %340 = vector.shape_cast %339 : vector<1x8x128xf32> to vector<8x128xf32>
      %341 = vector.shape_cast %337 : vector<8x128xf32> to vector<1x8x128xf32>
      tpu.vector_store %arg6[%338, %c0_147, %c0_148], %341 {strides = array<i32>} : memref<8x8x128xf32, #tpu.memory_space<vmem>>, vector<1x8x128xf32>,
      %c6_i32 = arith.constant 6 : i32
      %c8_i32_149 = arith.constant 8 : i32
      %342 = arith.muli %arg1, %c8_i32_149 : i32
      %343 = arith.addi %342, %c6_i32 : i32
      %c0_150 = arith.constant 0 : index
      %c0_151 = arith.constant 0 : index
      %344 = vector.load %arg8[%c0_150, %c0_151] : memref<8x128xf32, #tpu.memory_space<vmem>>, vector<8x128xf32>
      %c0_152 = arith.constant 0 : index
      %c0_153 = arith.constant 0 : index
      %345 = vector.load %arg7[%c0_152, %c0_153] : memref<128x512xf32, #tpu.memory_space<vmem>>, vector<128x512xf32>
      %cst_154 = arith.constant dense<0.000000e+00> : vector<8x512xf32>
      %346 = tpu.matmul %344, %345, %cst_154 {dimension_numbers = #tpu.dot_dimension_numbers<[1], [0], [0], [1], [0, 0, 1, 1], [], []>} : vector<8x128xf32>, vector<128x512xf32>, vector<8x512xf32> -> vector<8x512xf32>
      %347 = arith.index_cast %c6_i32 : i32 to index
      %c0_155 = arith.constant 0 : index
      %c0_156 = arith.constant 0 : index
      %348 = vector.load %arg3[%347, %c0_155, %c0_156] : memref<8x8x512xf32, #tpu.memory_space<vmem>>, vector<1x8x512xf32>
      %349 = vector.shape_cast %348 : vector<1x8x512xf32> to vector<8x512xf32>
      %350 = arith.addf %346, %349 : vector<8x512xf32>
      %351 = vector.extract_strided_slice %350 {offsets = [0, 0], sizes = [8, 128], strides = [1, 1]} : vector<8x512xf32> to vector<8x128xf32>
      %352 = arith.negf %351 : vector<8x128xf32>
      %353 = math.exp %352 : vector<8x128xf32>
      %cst_157 = arith.constant 1.000000e+00 : f32
      %354 = vector.broadcast %cst_157 : f32 to vector<8x128xf32>
      %355 = arith.addf %354, %353 : vector<8x128xf32>
      %356 = arith.divf %354, %355 : vector<8x128xf32>
      %357 = vector.extract_strided_slice %350 {offsets = [0, 128], sizes = [8, 128], strides = [1, 1]} : vector<8x512xf32> to vector<8x128xf32>
      %358 = arith.negf %357 : vector<8x128xf32>
      %359 = math.exp %358 : vector<8x128xf32>
      %cst_158 = arith.constant 1.000000e+00 : f32
      %360 = vector.broadcast %cst_158 : f32 to vector<8x128xf32>
      %361 = arith.addf %360, %359 : vector<8x128xf32>
      %362 = arith.divf %360, %361 : vector<8x128xf32>
      %363 = vector.extract_strided_slice %350 {offsets = [0, 256], sizes = [8, 128], strides = [1, 1]} : vector<8x512xf32> to vector<8x128xf32>
      %364 = math.tanh %363 : vector<8x128xf32>
      %365 = vector.extract_strided_slice %350 {offsets = [0, 384], sizes = [8, 128], strides = [1, 1]} : vector<8x512xf32> to vector<8x128xf32>
      %366 = arith.negf %365 : vector<8x128xf32>
      %367 = math.exp %366 : vector<8x128xf32>
      %cst_159 = arith.constant 1.000000e+00 : f32
      %368 = vector.broadcast %cst_159 : f32 to vector<8x128xf32>
      %369 = arith.addf %368, %367 : vector<8x128xf32>
      %370 = arith.divf %368, %369 : vector<8x128xf32>
      %c0_160 = arith.constant 0 : index
      %c0_161 = arith.constant 0 : index
      %371 = vector.load %arg9[%c0_160, %c0_161] : memref<8x128xf32, #tpu.memory_space<vmem>>, vector<8x128xf32>
      %372 = arith.mulf %362, %371 : vector<8x128xf32>
      %373 = arith.mulf %356, %364 : vector<8x128xf32>
      %374 = arith.addf %372, %373 : vector<8x128xf32>
      %375 = math.tanh %374 : vector<8x128xf32>
      %376 = arith.mulf %370, %375 : vector<8x128xf32>
      %377 = vector.broadcast %343 : i32 to vector<8x1xi32>
      %378 = arith.cmpi slt, %377, %11 : vector<8x1xi32>
      %c0_162 = arith.constant 0 : index
      %c0_163 = arith.constant 0 : index
      %379 = vector.load %arg9[%c0_162, %c0_163] : memref<8x128xf32, #tpu.memory_space<vmem>>, vector<8x128xf32>
      %380 = vector.shape_cast %378 : vector<8x1xi1> to vector<8x1xi1>
      %381 = vector.broadcast %380 : vector<8x1xi1> to vector<8x128xi1>
      %382 = arith.select %381, %374, %379 : vector<8x128xi1>, vector<8x128xf32>
      %c0_164 = arith.constant 0 : index
      %c0_165 = arith.constant 0 : index
      %383 = vector.load %arg9[%c0_164, %c0_165] : memref<8x128xf32, #tpu.memory_space<vmem>>, vector<8x128xf32>
      tpu.vector_store %arg9[%c0_164, %c0_165], %382 {strides = array<i32>} : memref<8x128xf32, #tpu.memory_space<vmem>>, vector<8x128xf32>,
      %c0_166 = arith.constant 0 : index
      %c0_167 = arith.constant 0 : index
      %384 = vector.load %arg8[%c0_166, %c0_167] : memref<8x128xf32, #tpu.memory_space<vmem>>, vector<8x128xf32>
      %385 = vector.shape_cast %378 : vector<8x1xi1> to vector<8x1xi1>
      %386 = vector.broadcast %385 : vector<8x1xi1> to vector<8x128xi1>
      %387 = arith.select %386, %376, %384 : vector<8x128xi1>, vector<8x128xf32>
      %c0_168 = arith.constant 0 : index
      %c0_169 = arith.constant 0 : index
      %388 = vector.load %arg8[%c0_168, %c0_169] : memref<8x128xf32, #tpu.memory_space<vmem>>, vector<8x128xf32>
      tpu.vector_store %arg8[%c0_168, %c0_169], %387 {strides = array<i32>} : memref<8x128xf32, #tpu.memory_space<vmem>>, vector<8x128xf32>,
      %cst_170 = arith.constant 0.000000e+00 : f32
      %389 = vector.shape_cast %378 : vector<8x1xi1> to vector<8x1xi1>
      %390 = vector.broadcast %389 : vector<8x1xi1> to vector<8x128xi1>
      %391 = vector.broadcast %cst_170 : f32 to vector<8x128xf32>
      %392 = arith.select %390, %376, %391 : vector<8x128xi1>, vector<8x128xf32>
      %393 = arith.index_cast %c6_i32 : i32 to index
      %c0_171 = arith.constant 0 : index
      %c0_172 = arith.constant 0 : index
      %394 = vector.load %arg6[%393, %c0_171, %c0_172] : memref<8x8x128xf32, #tpu.memory_space<vmem>>, vector<1x8x128xf32>
      %395 = vector.shape_cast %394 : vector<1x8x128xf32> to vector<8x128xf32>
      %396 = vector.shape_cast %392 : vector<8x128xf32> to vector<1x8x128xf32>
      tpu.vector_store %arg6[%393, %c0_171, %c0_172], %396 {strides = array<i32>} : memref<8x8x128xf32, #tpu.memory_space<vmem>>, vector<1x8x128xf32>,
      %c7_i32 = arith.constant 7 : i32
      %c8_i32_173 = arith.constant 8 : i32
      %397 = arith.muli %arg1, %c8_i32_173 : i32
      %398 = arith.addi %397, %c7_i32 : i32
      %c0_174 = arith.constant 0 : index
      %c0_175 = arith.constant 0 : index
      %399 = vector.load %arg8[%c0_174, %c0_175] : memref<8x128xf32, #tpu.memory_space<vmem>>, vector<8x128xf32>
      %c0_176 = arith.constant 0 : index
      %c0_177 = arith.constant 0 : index
      %400 = vector.load %arg7[%c0_176, %c0_177] : memref<128x512xf32, #tpu.memory_space<vmem>>, vector<128x512xf32>
      %cst_178 = arith.constant dense<0.000000e+00> : vector<8x512xf32>
      %401 = tpu.matmul %399, %400, %cst_178 {dimension_numbers = #tpu.dot_dimension_numbers<[1], [0], [0], [1], [0, 0, 1, 1], [], []>} : vector<8x128xf32>, vector<128x512xf32>, vector<8x512xf32> -> vector<8x512xf32>
      %402 = arith.index_cast %c7_i32 : i32 to index
      %c0_179 = arith.constant 0 : index
      %c0_180 = arith.constant 0 : index
      %403 = vector.load %arg3[%402, %c0_179, %c0_180] : memref<8x8x512xf32, #tpu.memory_space<vmem>>, vector<1x8x512xf32>
      %404 = vector.shape_cast %403 : vector<1x8x512xf32> to vector<8x512xf32>
      %405 = arith.addf %401, %404 : vector<8x512xf32>
      %406 = vector.extract_strided_slice %405 {offsets = [0, 0], sizes = [8, 128], strides = [1, 1]} : vector<8x512xf32> to vector<8x128xf32>
      %407 = arith.negf %406 : vector<8x128xf32>
      %408 = math.exp %407 : vector<8x128xf32>
      %cst_181 = arith.constant 1.000000e+00 : f32
      %409 = vector.broadcast %cst_181 : f32 to vector<8x128xf32>
      %410 = arith.addf %409, %408 : vector<8x128xf32>
      %411 = arith.divf %409, %410 : vector<8x128xf32>
      %412 = vector.extract_strided_slice %405 {offsets = [0, 128], sizes = [8, 128], strides = [1, 1]} : vector<8x512xf32> to vector<8x128xf32>
      %413 = arith.negf %412 : vector<8x128xf32>
      %414 = math.exp %413 : vector<8x128xf32>
      %cst_182 = arith.constant 1.000000e+00 : f32
      %415 = vector.broadcast %cst_182 : f32 to vector<8x128xf32>
      %416 = arith.addf %415, %414 : vector<8x128xf32>
      %417 = arith.divf %415, %416 : vector<8x128xf32>
      %418 = vector.extract_strided_slice %405 {offsets = [0, 256], sizes = [8, 128], strides = [1, 1]} : vector<8x512xf32> to vector<8x128xf32>
      %419 = math.tanh %418 : vector<8x128xf32>
      %420 = vector.extract_strided_slice %405 {offsets = [0, 384], sizes = [8, 128], strides = [1, 1]} : vector<8x512xf32> to vector<8x128xf32>
      %421 = arith.negf %420 : vector<8x128xf32>
      %422 = math.exp %421 : vector<8x128xf32>
      %cst_183 = arith.constant 1.000000e+00 : f32
      %423 = vector.broadcast %cst_183 : f32 to vector<8x128xf32>
      %424 = arith.addf %423, %422 : vector<8x128xf32>
      %425 = arith.divf %423, %424 : vector<8x128xf32>
      %c0_184 = arith.constant 0 : index
      %c0_185 = arith.constant 0 : index
      %426 = vector.load %arg9[%c0_184, %c0_185] : memref<8x128xf32, #tpu.memory_space<vmem>>, vector<8x128xf32>
      %427 = arith.mulf %417, %426 : vector<8x128xf32>
      %428 = arith.mulf %411, %419 : vector<8x128xf32>
      %429 = arith.addf %427, %428 : vector<8x128xf32>
      %430 = math.tanh %429 : vector<8x128xf32>
      %431 = arith.mulf %425, %430 : vector<8x128xf32>
      %432 = vector.broadcast %398 : i32 to vector<8x1xi32>
      %433 = arith.cmpi slt, %432, %11 : vector<8x1xi32>
      %c0_186 = arith.constant 0 : index
      %c0_187 = arith.constant 0 : index
      %434 = vector.load %arg9[%c0_186, %c0_187] : memref<8x128xf32, #tpu.memory_space<vmem>>, vector<8x128xf32>
      %435 = vector.shape_cast %433 : vector<8x1xi1> to vector<8x1xi1>
      %436 = vector.broadcast %435 : vector<8x1xi1> to vector<8x128xi1>
      %437 = arith.select %436, %429, %434 : vector<8x128xi1>, vector<8x128xf32>
      %c0_188 = arith.constant 0 : index
      %c0_189 = arith.constant 0 : index
      %438 = vector.load %arg9[%c0_188, %c0_189] : memref<8x128xf32, #tpu.memory_space<vmem>>, vector<8x128xf32>
      tpu.vector_store %arg9[%c0_188, %c0_189], %437 {strides = array<i32>} : memref<8x128xf32, #tpu.memory_space<vmem>>, vector<8x128xf32>,
      %c0_190 = arith.constant 0 : index
      %c0_191 = arith.constant 0 : index
      %439 = vector.load %arg8[%c0_190, %c0_191] : memref<8x128xf32, #tpu.memory_space<vmem>>, vector<8x128xf32>
      %440 = vector.shape_cast %433 : vector<8x1xi1> to vector<8x1xi1>
      %441 = vector.broadcast %440 : vector<8x1xi1> to vector<8x128xi1>
      %442 = arith.select %441, %431, %439 : vector<8x128xi1>, vector<8x128xf32>
      %c0_192 = arith.constant 0 : index
      %c0_193 = arith.constant 0 : index
      %443 = vector.load %arg8[%c0_192, %c0_193] : memref<8x128xf32, #tpu.memory_space<vmem>>, vector<8x128xf32>
      tpu.vector_store %arg8[%c0_192, %c0_193], %442 {strides = array<i32>} : memref<8x128xf32, #tpu.memory_space<vmem>>, vector<8x128xf32>,
      %cst_194 = arith.constant 0.000000e+00 : f32
      %444 = vector.shape_cast %433 : vector<8x1xi1> to vector<8x1xi1>
      %445 = vector.broadcast %444 : vector<8x1xi1> to vector<8x128xi1>
      %446 = vector.broadcast %cst_194 : f32 to vector<8x128xf32>
      %447 = arith.select %445, %431, %446 : vector<8x128xi1>, vector<8x128xf32>
      %448 = arith.index_cast %c7_i32 : i32 to index
      %c0_195 = arith.constant 0 : index
      %c0_196 = arith.constant 0 : index
      %449 = vector.load %arg6[%448, %c0_195, %c0_196] : memref<8x8x128xf32, #tpu.memory_space<vmem>>, vector<1x8x128xf32>
      %450 = vector.shape_cast %449 : vector<1x8x128xf32> to vector<8x128xf32>
      %451 = vector.shape_cast %447 : vector<8x128xf32> to vector<1x8x128xf32>
      tpu.vector_store %arg6[%448, %c0_195, %c0_196], %451 {strides = array<i32>} : memref<8x8x128xf32, #tpu.memory_space<vmem>>, vector<1x8x128xf32>,
      %c8_i32_197 = arith.constant 8 : i32
    } else {
    }
    %true = arith.constant true
    %8 = arith.xori %5, %true : i1
    %9 = arith.extui %8 : i1 to i32
    %c0_i32_2 = arith.constant 0 : i32
    %10 = arith.cmpi ne, %9, %c0_i32_2 : i32
    scf.if %10 {
      %cst = arith.constant 0.000000e+00 : f32
      %11 = vector.broadcast %cst : f32 to vector<8x8x128xf32>
      %c0_3 = arith.constant 0 : index
      %c0_4 = arith.constant 0 : index
      %c0_5 = arith.constant 0 : index
      %12 = vector.load %arg6[%c0_3, %c0_4, %c0_5] : memref<8x8x128xf32, #tpu.memory_space<vmem>>, vector<8x8x128xf32>
      tpu.vector_store %arg6[%c0_3, %c0_4, %c0_5], %11 {strides = array<i32>} : memref<8x8x128xf32, #tpu.memory_space<vmem>>, vector<8x8x128xf32>,
    } else {
    }
    return
  }
  func.func @transform_0(%arg0: i32, %arg1: i32, %arg2: memref<1xi32, #tpu.memory_space<smem>>) -> (i32, i32, i32) {
    %c0_i32 = arith.constant 0 : i32
    %c0_i32_0 = arith.constant 0 : i32
    return %arg1, %arg0, %c0_i32 : i32, i32, i32
  }
  func.func @transform_1(%arg0: i32, %arg1: i32, %arg2: memref<1xi32, #tpu.memory_space<smem>>) -> (i32, i32) {
    %c0_i32 = arith.constant 0 : i32
    %c0_i32_0 = arith.constant 0 : i32
    return %arg0, %c0_i32 : i32, i32
  }
  func.func @transform_3(%arg0: i32, %arg1: i32, %arg2: memref<1xi32, #tpu.memory_space<smem>>) -> (i32, i32, i32) {
    %c0_i32 = arith.constant 0 : i32
    %c0_i32_0 = arith.constant 0 : i32
    return %arg1, %arg0, %c0_i32 : i32, i32, i32
  }
}

</mosaic_0001>

<bundles_post_ra>
// kernel: seq2seq_encoder.2
= control target key start
LH: loop header
LB: loop body
LE: loop exit
PB: predicated region body
PF: predicated region fallthrough
CT: control target
= control target key end

     0   :  { %s630_s0 = inlined_call_operand.<no memory space> [shape: s32[1], index: 0, kind: input, shape index: {}]   ;;  %s631_s1 = inlined_call_operand.vmem [shape: f32[8,8,32], index: 1, kind: input, shape index: {}]   ;;  %s632_s2 = inlined_call_operand.vmem [shape: f32[32,512], index: 2, kind: input, shape index: {}]   ;;  %s633_s3 = inlined_call_operand.vmem [shape: f32[1,512], index: 3, kind: input, shape index: {}]   ;;  %s634_s4 = inlined_call_operand.vmem [shape: f32[8,8,512], index: 4, kind: output, shape index: {}]  }
   0x1   :  { %p356_p0 = scmp.le.s32.totalorder %s630_s0, 0 }
   0x3   :  { %21 = sbr.rel (%p356_p0) target bundleno = 244 (0xf4), region = 17 }
   0x8   :  { %v43_v0 = vld [vmem:[%s632_s2 + $0x68] sm:$0xff]  ;;  %v45_v1 = vld [vmem:[%s632_s2 + $0x78] sm:$0xff]  ;;  %v42_v2 = vld [vmem:[%s632_s2 + $0x60] sm:$0xff]  ;;  %vm68_vm0 = vcmask 261120   ;;  %v374_v17 = vmov 0.0   ;;  %v48_v25 = vlaneseq }
   0x9   :  { %117 = vmatprep.subr.mxu0 %v43_v0  ;;  %230 = vmatprep.subr.mxu1 %v45_v1  ;;  %v44_v3 = vld [vmem:[%s632_s2 + $0x70] sm:$0xff]  ;;  %v39_v4 = vld [vmem:[%s632_s2 + $0x48] sm:$0xff]  ;;  %v41_v5 = vld [vmem:[%s632_s2 + $0x58] sm:$0xff] }
   0xa   :  { %118 = vmatpush1.msra.mxu0 %v42_v2  ;;  %231 = vmatpush1.msra.mxu1 %v44_v3  ;;  %v38_v6 = vld [vmem:[%s632_s2 + $0x40] sm:$0xff]  ;;  %v40_v7 = vld [vmem:[%s632_s2 + $0x50] sm:$0xff]  ;;  %v35_v8 = vld [vmem:[%s632_s2 + $0x28] sm:$0xff]  ;;  %v49_v26 = vshrl.u32 %v48_v25, 7 }
   0xb   :  { %119 = vmatprep.subr.mxu0 %v39_v4  ;;  %232 = vmatprep.subr.mxu1 %v41_v5  ;;  %v37_v9 = vld [vmem:[%s632_s2 + $0x38] sm:$0xff]  ;;  %v34_v10 = vld [vmem:[%s632_s2 + $0x20] sm:$0xff]  ;;  %v36_v11 = vld [vmem:[%s632_s2 + $0x30] sm:$0xff] }
   0xc   :  { %120 = vmatpush1.msra.mxu0 %v38_v6  ;;  %233 = vmatpush1.msra.mxu1 %v40_v7  ;;  %v31_v12 = vld [vmem:[%s632_s2 + $0x8] sm:$0xff]  ;;  %v33_v13 = vld [vmem:[%s632_s2 + $0x18] sm:$0xff]  ;;  %v30_v14 = vld [vmem:[%s632_s2] sm:$0xff]  ;;  %v50_v27 = vsub.s32 0, %v49_v26  ;;  %v58_v28 = vsub.s32 2, %v49_v26  ;;  %v54_v30 = vsub.s32 1, %v49_v26 }
   0xd   :  { %121 = vmatprep.subr.mxu0 %v35_v8  ;;  %234 = vmatprep.subr.mxu1 %v37_v9  ;;  %v32_v15 = vld [vmem:[%s632_s2 + $0x10] sm:$0xff]  ;;  %v22_v16 = vld [vmem:[%s631_s1] sm:$0xff]  ;;  %v23_v18 = vld [vmem:[%s631_s1 + $0x8] sm:$0xff]  ;;  %v62_v31 = vsub.s32 3, %v49_v26 }
   0xe   :  { %122 = vmatpush1.msra.mxu0 %v34_v10  ;;  %235 = vmatpush1.msra.mxu1 %v36_v11  ;;  %v24_v19 = vld [vmem:[%s631_s1 + $0x10] sm:$0xff]  ;;  %v25_v20 = vld [vmem:[%s631_s1 + $0x18] sm:$0xff]  ;;  %v26_v21 = vld [vmem:[%s631_s1 + $0x20] sm:$0xff] }
   0xf   :  { %123 = vmatprep.subr.mxu0 %v31_v12  ;;  %236 = vmatprep.subr.mxu1 %v33_v13  ;;  %v27_v22 = vld [vmem:[%s631_s1 + $0x28] sm:$0xff]  ;;  %v28_v23 = vld [vmem:[%s631_s1 + $0x30] sm:$0xff]  ;;  %v29_v24 = vld [vmem:[%s631_s1 + $0x38] sm:$0xff] }
  0x10   :  { %124 = vmatpush1.msra.mxu0 %v30_v14  ;;  %157 = vmatprep.mubr.f32.mxu0 %v374_v17  ;;  %v46_v29 = vld [vmem:[%s633_s3] sm:$0xf] }
  0x11   :  { %237 = vmatpush1.msra.mxu1 %v32_v15  ;;  %270 = vmatprep.mubr.f32.mxu1 %v374_v17  ;;  %v494_v32 = vrot.slane %v46_v29, %v50_v27  ;;  %v496_v33 = vrot.slane %v46_v29, %v58_v28  ;;  %v498_v34 = vrot.slane %v46_v29, %v54_v30 }
  0x12   :  { %357 = vmatmul.mubr.msk.f32.vlgmr.msra.gmra.mxu0 %vm68_vm0, %v22_v16  ;;  %365 = vmatmul.mubr.msk.f32.vlgmr.msra.gmra.mxu1 %vm68_vm0, %v22_v16  ;;  %v500_v35 = vrot.slane %v46_v29, %v62_v31 }
  0x13   :  { %163 = vmatprep.mubr.f32.mxu0 %v374_v17  ;;  %276 = vmatprep.mubr.f32.mxu1 %v374_v17 }
  0x16   :  { %358 = vmatmul.mubr.msk.f32.gmra.mxu0 %vm68_vm0, %v23_v18  ;;  %366 = vmatmul.mubr.msk.f32.gmra.mxu1 %vm68_vm0, %v23_v18 }
  0x17   :  { %169 = vmatprep.mubr.f32.mxu0 %v374_v17  ;;  %282 = vmatprep.mubr.f32.mxu1 %v374_v17 }
  0x1a   :  { %359 = vmatmul.mubr.msk.f32.gmra.mxu0 %vm68_vm0, %v24_v19  ;;  %367 = vmatmul.mubr.msk.f32.gmra.mxu1 %vm68_vm0, %v24_v19 }
  0x1b   :  { %175 = vmatprep.mubr.f32.mxu0 %v374_v17  ;;  %288 = vmatprep.mubr.f32.mxu1 %v374_v17 }
  0x1e   :  { %360 = vmatmul.mubr.msk.f32.gmra.mxu0 %vm68_vm0, %v25_v20  ;;  %368 = vmatmul.mubr.msk.f32.gmra.mxu1 %vm68_vm0, %v25_v20 }
  0x1f   :  { %181 = vmatprep.mubr.f32.mxu0 %v374_v17  ;;  %294 = vmatprep.mubr.f32.mxu1 %v374_v17 }
  0x22   :  { %361 = vmatmul.mubr.msk.f32.gmra.mxu0 %vm68_vm0, %v26_v21  ;;  %369 = vmatmul.mubr.msk.f32.gmra.mxu1 %vm68_vm0, %v26_v21 }
  0x23   :  { %187 = vmatprep.mubr.f32.mxu0 %v374_v17  ;;  %300 = vmatprep.mubr.f32.mxu1 %v374_v17 }
  0x26   :  { %362 = vmatmul.mubr.msk.f32.gmra.mxu0 %vm68_vm0, %v27_v22  ;;  %370 = vmatmul.mubr.msk.f32.gmra.mxu1 %vm68_vm0, %v27_v22 }
  0x27   :  { %193 = vmatprep.mubr.f32.mxu0 %v374_v17  ;;  %306 = vmatprep.mubr.f32.mxu1 %v374_v17 }
  0x2a   :  { %363 = vmatmul.mubr.msk.f32.gmra.mxu0 %vm68_vm0, %v28_v23  ;;  %371 = vmatmul.mubr.msk.f32.gmra.mxu1 %vm68_vm0, %v28_v23 }
  0x2b   :  { %199 = vmatprep.mubr.f32.mxu0 %v374_v17  ;;  %312 = vmatprep.mubr.f32.mxu1 %v374_v17 }
  0x2e   :  { %364 = vmatmul.mubr.msk.f32.gmra.mxu0 %vm68_vm0, %v29_v24  ;;  %372 = vmatmul.mubr.msk.f32.gmra.mxu1 %vm68_vm0, %v29_v24 }
  0xd2   :  { %v159_v36 = vpop.f32.mrf.mxu0  ;;  %v272_v37 = vpop.f32.mrf.mxu1 }
  0xd3   :  { %v160_v38 = vadd.f32 %v159_v36, %v494_v32  ;;  %v273_v39 = vadd.f32 %v272_v37, %v496_v33 }
  0xd4   :  { %v161_v40 = vpop.f32.mrf.mxu0  ;;  %v274_v41 = vpop.f32.mrf.mxu1 }
  0xd5   :  { %319 = vst [vmem:[%s634_s4] sm:$0xff] %v160_v38  ;;  %321 = vst [vmem:[%s634_s4 + $0x10] sm:$0xff] %v273_v39  ;;  %v162_v42 = vadd.f32 %v161_v40, %v498_v34  ;;  %v275_v43 = vadd.f32 %v274_v41, %v500_v35 }
  0xd6   :  { %v165_v44 = vpop.f32.mrf.mxu0  ;;  %v278_v45 = vpop.f32.mrf.mxu1 }
  0xd7   :  { %320 = vst [vmem:[%s634_s4 + $0x8] sm:$0xff] %v162_v42  ;;  %322 = vst [vmem:[%s634_s4 + $0x18] sm:$0xff] %v275_v43  ;;  %v166_v46 = vadd.f32 %v165_v44, %v494_v32  ;;  %v279_v47 = vadd.f32 %v278_v45, %v496_v33 }
  0xd8   :  { %v167_v48 = vpop.f32.mrf.mxu0  ;;  %v280_v49 = vpop.f32.mrf.mxu1 }
  0xd9   :  { %323 = vst [vmem:[%s634_s4 + $0x20] sm:$0xff] %v166_v46  ;;  %325 = vst [vmem:[%s634_s4 + $0x30] sm:$0xff] %v279_v47  ;;  %v168_v50 = vadd.f32 %v167_v48, %v498_v34  ;;  %v281_v51 = vadd.f32 %v280_v49, %v500_v35 }
  0xda   :  { %v171_v52 = vpop.f32.mrf.mxu0  ;;  %v284_v53 = vpop.f32.mrf.mxu1 }
  0xdb   :  { %324 = vst [vmem:[%s634_s4 + $0x28] sm:$0xff] %v168_v50  ;;  %326 = vst [vmem:[%s634_s4 + $0x38] sm:$0xff] %v281_v51  ;;  %v172_v54 = vadd.f32 %v171_v52, %v494_v32  ;;  %v285_v55 = vadd.f32 %v284_v53, %v496_v33 }
  0xdc   :  { %v173_v56 = vpop.f32.mrf.mxu0  ;;  %v286_v57 = vpop.f32.mrf.mxu1 }
  0xdd   :  { %327 = vst [vmem:[%s634_s4 + $0x40] sm:$0xff] %v172_v54  ;;  %329 = vst [vmem:[%s634_s4 + $0x50] sm:$0xff] %v285_v55  ;;  %v174_v58 = vadd.f32 %v173_v56, %v498_v34  ;;  %v287_v59 = vadd.f32 %v286_v57, %v500_v35 }
  0xde   :  { %v177_v60 = vpop.f32.mrf.mxu0  ;;  %v290_v61 = vpop.f32.mrf.mxu1 }
  0xdf   :  { %328 = vst [vmem:[%s634_s4 + $0x48] sm:$0xff] %v174_v58  ;;  %330 = vst [vmem:[%s634_s4 + $0x58] sm:$0xff] %v287_v59  ;;  %v178_v62 = vadd.f32 %v177_v60, %v494_v32  ;;  %v291_v63 = vadd.f32 %v290_v61, %v496_v33 }
  0xe0   :  { %v179_v0 = vpop.f32.mrf.mxu0  ;;  %v292_v1 = vpop.f32.mrf.mxu1 }
  0xe1   :  { %331 = vst [vmem:[%s634_s4 + $0x60] sm:$0xff] %v178_v62  ;;  %333 = vst [vmem:[%s634_s4 + $0x70] sm:$0xff] %v291_v63  ;;  %v180_v2 = vadd.f32 %v179_v0, %v498_v34  ;;  %v293_v3 = vadd.f32 %v292_v1, %v500_v35 }
  0xe2   :  { %v183_v4 = vpop.f32.mrf.mxu0  ;;  %v296_v5 = vpop.f32.mrf.mxu1 }
  0xe3   :  { %332 = vst [vmem:[%s634_s4 + $0x68] sm:$0xff] %v180_v2  ;;  %334 = vst [vmem:[%s634_s4 + $0x78] sm:$0xff] %v293_v3  ;;  %v184_v6 = vadd.f32 %v183_v4, %v494_v32  ;;  %v297_v7 = vadd.f32 %v296_v5, %v496_v33 }
  0xe4   :  { %v185_v8 = vpop.f32.mrf.mxu0  ;;  %v298_v9 = vpop.f32.mrf.mxu1 }
  0xe5   :  { %335 = vst [vmem:[%s634_s4 + $0x80] sm:$0xff] %v184_v6  ;;  %337 = vst [vmem:[%s634_s4 + $0x90] sm:$0xff] %v297_v7  ;;  %v186_v10 = vadd.f32 %v185_v8, %v498_v34  ;;  %v299_v11 = vadd.f32 %v298_v9, %v500_v35 }
  0xe6   :  { %v189_v12 = vpop.f32.mrf.mxu0  ;;  %v302_v13 = vpop.f32.mrf.mxu1 }
  0xe7   :  { %336 = vst [vmem:[%s634_s4 + $0x88] sm:$0xff] %v186_v10  ;;  %338 = vst [vmem:[%s634_s4 + $0x98] sm:$0xff] %v299_v11  ;;  %v190_v14 = vadd.f32 %v189_v12, %v494_v32  ;;  %v303_v15 = vadd.f32 %v302_v13, %v496_v33 }
  0xe8   :  { %v191_v16 = vpop.f32.mrf.mxu0  ;;  %v304_v17 = vpop.f32.mrf.mxu1 }
  0xe9   :  { %339 = vst [vmem:[%s634_s4 + $0xa0] sm:$0xff] %v190_v14  ;;  %341 = vst [vmem:[%s634_s4 + $0xb0] sm:$0xff] %v303_v15  ;;  %v192_v18 = vadd.f32 %v191_v16, %v498_v34  ;;  %v305_v19 = vadd.f32 %v304_v17, %v500_v35 }
  0xea   :  { %v195_v20 = vpop.f32.mrf.mxu0  ;;  %v308_v21 = vpop.f32.mrf.mxu1 }
  0xeb   :  { %340 = vst [vmem:[%s634_s4 + $0xa8] sm:$0xff] %v192_v18  ;;  %342 = vst [vmem:[%s634_s4 + $0xb8] sm:$0xff] %v305_v19  ;;  %v196_v22 = vadd.f32 %v195_v20, %v494_v32  ;;  %v309_v23 = vadd.f32 %v308_v21, %v496_v33 }
  0xec   :  { %v197_v24 = vpop.f32.mrf.mxu0  ;;  %v310_v25 = vpop.f32.mrf.mxu1 }
  0xed   :  { %343 = vst [vmem:[%s634_s4 + $0xc0] sm:$0xff] %v196_v22  ;;  %345 = vst [vmem:[%s634_s4 + $0xd0] sm:$0xff] %v309_v23  ;;  %v198_v26 = vadd.f32 %v197_v24, %v498_v34  ;;  %v311_v27 = vadd.f32 %v310_v25, %v500_v35 }
  0xee   :  { %v201_v28 = vpop.f32.mrf.mxu0  ;;  %v314_v29 = vpop.f32.mrf.mxu1 }
  0xef   :  { %344 = vst [vmem:[%s634_s4 + $0xc8] sm:$0xff] %v198_v26  ;;  %346 = vst [vmem:[%s634_s4 + $0xd8] sm:$0xff] %v311_v27  ;;  %v202_v30 = vadd.f32 %v201_v28, %v494_v32  ;;  %v315_v31 = vadd.f32 %v314_v29, %v496_v33 }
  0xf0   :  { %v203_v36 = vpop.f32.mrf.mxu0  ;;  %v316_v37 = vpop.f32.mrf.mxu1 }
  0xf1   :  { %347 = vst [vmem:[%s634_s4 + $0xe0] sm:$0xff] %v202_v30  ;;  %349 = vst [vmem:[%s634_s4 + $0xf0] sm:$0xff] %v315_v31  ;;  %v204_v38 = vadd.f32 %v203_v36, %v498_v34  ;;  %v317_v39 = vadd.f32 %v316_v37, %v500_v35 }
  0xf3   :  { %348 = vst [vmem:[%s634_s4 + $0xe8] sm:$0xff] %v204_v38  ;;  %350 = vst [vmem:[%s634_s4 + $0xf8] sm:$0xff] %v317_v39 }
  0xf4 PF:  {}

// kernel: seq2seq_encoder.3
= control target key start
LH: loop header
LB: loop body
LE: loop exit
PB: predicated region body
PF: predicated region fallthrough
CT: control target
= control target key end

     0   :  { %s3802_s0 = inlined_call_operand.<no memory space> [shape: s32[1], index: 0, kind: input, shape index: {}]   ;;  %s3803_s1 = inlined_call_operand.vmem [shape: f32[8,8,512], index: 1, kind: input, shape index: {}]   ;;  %s3804_s2 = inlined_call_operand.vmem [shape: s32[8,1], index: 2, kind: input, shape index: {}]   ;;  %s3805_s3 = inlined_call_operand.vmem [shape: f32[128,512], index: 3, kind: input, shape index: {}]   ;;  %s3806_s4 = inlined_call_operand.vmem [shape: f32[8,8,128], index: 4, kind: output, shape index: {}]  }
   0x1   :  { %v51_v0 = vld [vmem:[%s3805_s3] sm:$0xff]  ;;  %v53_v1 = vld [vmem:[%s3805_s3 + $0x8] sm:$0xff]  ;;  %v55_v2 = vld [vmem:[%s3805_s3 + $0x10] sm:$0xff] }
   0x2   :  { %52 = vst [vmem:[#allocation2 + $0xb0] sm:$0xff] %v51_v0  ;;  %54 = vst [vmem:[#allocation2 + $0x1b0] sm:$0xff] %v53_v1  ;;  %v57_v3 = vld [vmem:[%s3805_s3 + $0x18] sm:$0xff]  ;;  %v59_v4 = vld [vmem:[%s3805_s3 + $0x20] sm:$0xff] }
   0x3   :  { %56 = vst [vmem:[#allocation2 + $0xd8] sm:$0xff] %v55_v2  ;;  %v61_v5 = vld [vmem:[%s3805_s3 + $0x28] sm:$0xff]  ;;  %58 = vst [vmem:[#allocation2 + $0x18] sm:$0xff] %v57_v3  ;;  %v63_v6 = vld [vmem:[%s3805_s3 + $0x30] sm:$0xff] }
   0x4   :  { %60 = vst [vmem:[#allocation2 + $0x50] sm:$0xff] %v59_v4  ;;  %62 = vst [vmem:[#allocation2 + $0x168] sm:$0xff] %v61_v5  ;;  %v65_v7 = vld [vmem:[%s3805_s3 + $0x38] sm:$0xff]  ;;  %v67_v8 = vld [vmem:[%s3805_s3 + $0x40] sm:$0xff] }
   0x5   :  { %64 = vst [vmem:[#allocation2 + $0x130] sm:$0xff] %v63_v6  ;;  %66 = vst [vmem:[#allocation2 + $0x48] sm:$0xff] %v65_v7  ;;  %v69_v9 = vld [vmem:[%s3805_s3 + $0x48] sm:$0xff]  ;;  %v71_v10 = vld [vmem:[%s3805_s3 + $0x50] sm:$0xff] }
   0x6   :  { %68 = vst [vmem:[#allocation2 + $0x180] sm:$0xff] %v67_v8  ;;  %v73_v11 = vld [vmem:[%s3805_s3 + $0x58] sm:$0xff]  ;;  %70 = vst [vmem:[#allocation2 + $0x110] sm:$0xff] %v69_v9  ;;  %v75_v12 = vld [vmem:[%s3805_s3 + $0x60] sm:$0xff] }
   0x7   :  { %72 = vst [vmem:[#allocation2 + $0x118] sm:$0xff] %v71_v10  ;;  %74 = vst [vmem:[#allocation2 + $0x98] sm:$0xff] %v73_v11  ;;  %v77_v13 = vld [vmem:[%s3805_s3 + $0x68] sm:$0xff]  ;;  %v79_v14 = vld [vmem:[%s3805_s3 + $0x70] sm:$0xff] }
   0x8   :  { %76 = vst [vmem:[#allocation2 + $0x120] sm:$0xff] %v75_v12  ;;  %78 = vst [vmem:[#allocation2 + $0x150] sm:$0xff] %v77_v13  ;;  %v81_v15 = vld [vmem:[%s3805_s3 + $0x78] sm:$0xff]  ;;  %v83_v16 = vld [vmem:[%s3805_s3 + $0x80] sm:$0xff] }
   0x9   :  { %80 = vst [vmem:[#allocation2 + $0x108] sm:$0xff] %v79_v14  ;;  %v85_v17 = vld [vmem:[%s3805_s3 + $0x88] sm:$0xff]  ;;  %82 = vst [vmem:[#allocation2 + $0x60] sm:$0xff] %v81_v15  ;;  %v87_v18 = vld [vmem:[%s3805_s3 + $0x90] sm:$0xff] }
   0xa   :  { %84 = vst [vmem:[#allocation2 + $0xe0] sm:$0xff] %v83_v16  ;;  %86 = vst [vmem:[#allocation2 + $0x188] sm:$0xff] %v85_v17  ;;  %v89_v19 = vld [vmem:[%s3805_s3 + $0x98] sm:$0xff]  ;;  %v91_v20 = vld [vmem:[%s3805_s3 + $0xa0] sm:$0xff] }
   0xb   :  { %88 = vst [vmem:[#allocation2 + $0x138] sm:$0xff] %v87_v18  ;;  %90 = vst [vmem:[#allocation2 + $0x140] sm:$0xff] %v89_v19  ;;  %v93_v21 = vld [vmem:[%s3805_s3 + $0xa8] sm:$0xff]  ;;  %v95_v22 = vld [vmem:[%s3805_s3 + $0xb0] sm:$0xff] }
   0xc   :  { %92 = vst [vmem:[#allocation2 + $0x80] sm:$0xff] %v91_v20  ;;  %v97_v23 = vld [vmem:[%s3805_s3 + $0xb8] sm:$0xff]  ;;  %94 = vst [vmem:[#allocation2 + $0x1a8] sm:$0xff] %v93_v21  ;;  %v99_v24 = vld [vmem:[%s3805_s3 + $0xc0] sm:$0xff] }
   0xd   :  { %96 = vst [vmem:[#allocation2 + $0x1b8] sm:$0xff] %v95_v22  ;;  %98 = vst [vmem:[#allocation2 + $0x28] sm:$0xff] %v97_v23  ;;  %v101_v25 = vld [vmem:[%s3805_s3 + $0xc8] sm:$0xff]  ;;  %v103_v26 = vld [vmem:[%s3805_s3 + $0xd0] sm:$0xff] }
   0xe   :  { %100 = vst [vmem:[#allocation2 + $0x1e8] sm:$0xff] %v99_v24  ;;  %102 = vst [vmem:[#allocation2 + $0xf8] sm:$0xff] %v101_v25  ;;  %v105_v27 = vld [vmem:[%s3805_s3 + $0xd8] sm:$0xff]  ;;  %v107_v28 = vld [vmem:[%s3805_s3 + $0xe0] sm:$0xff] }
   0xf   :  { %104 = vst [vmem:[#allocation2 + $0x160] sm:$0xff] %v103_v26  ;;  %v109_v29 = vld [vmem:[%s3805_s3 + $0xe8] sm:$0xff]  ;;  %106 = vst [vmem:[#allocation2 + $0x30] sm:$0xff] %v105_v27  ;;  %v111_v30 = vld [vmem:[%s3805_s3 + $0xf0] sm:$0xff] }
  0x10   :  { %108 = vst [vmem:[#allocation2 + $0x1e0] sm:$0xff] %v107_v28  ;;  %110 = vst [vmem:[#allocation2] sm:$0xff] %v109_v29  ;;  %v113_v31 = vld [vmem:[%s3805_s3 + $0xf8] sm:$0xff]  ;;  %v115_v32 = vld [vmem:[%s3805_s3 + $0x100] sm:$0xff] }
  0x11   :  { %112 = vst [vmem:[#allocation2 + $0xf0] sm:$0xff] %v111_v30  ;;  %114 = vst [vmem:[#allocation2 + $0x8] sm:$0xff] %v113_v31  ;;  %v117_v33 = vld [vmem:[%s3805_s3 + $0x108] sm:$0xff]  ;;  %v119_v34 = vld [vmem:[%s3805_s3 + $0x110] sm:$0xff] }
  0x12   :  { %116 = vst [vmem:[#allocation2 + $0x148] sm:$0xff] %v115_v32  ;;  %v121_v35 = vld [vmem:[%s3805_s3 + $0x118] sm:$0xff]  ;;  %118 = vst [vmem:[#allocation2 + $0x1d0] sm:$0xff] %v117_v33  ;;  %v123_v36 = vld [vmem:[%s3805_s3 + $0x120] sm:$0xff] }
  0x13   :  { %120 = vst [vmem:[#allocation2 + $0x100] sm:$0xff] %v119_v34  ;;  %122 = vst [vmem:[#allocation2 + $0xc8] sm:$0xff] %v121_v35  ;;  %v125_v37 = vld [vmem:[%s3805_s3 + $0x128] sm:$0xff]  ;;  %v127_v38 = vld [vmem:[%s3805_s3 + $0x130] sm:$0xff] }
  0x14   :  { %124 = vst [vmem:[#allocation2 + $0x40] sm:$0xff] %v123_v36  ;;  %126 = vst [vmem:[#allocation2 + $0x1f8] sm:$0xff] %v125_v37  ;;  %v129_v39 = vld [vmem:[%s3805_s3 + $0x138] sm:$0xff]  ;;  %v131_v40 = vld [vmem:[%s3805_s3 + $0x140] sm:$0xff] }
  0x15   :  { %128 = vst [vmem:[#allocation2 + $0x20] sm:$0xff] %v127_v38  ;;  %v133_v41 = vld [vmem:[%s3805_s3 + $0x148] sm:$0xff]  ;;  %130 = vst [vmem:[#allocation2 + $0x128] sm:$0xff] %v129_v39  ;;  %v135_v42 = vld [vmem:[%s3805_s3 + $0x150] sm:$0xff] }
  0x16   :  { %132 = vst [vmem:[#allocation2 + $0x1a0] sm:$0xff] %v131_v40  ;;  %134 = vst [vmem:[#allocation2 + $0x1f0] sm:$0xff] %v133_v41  ;;  %v137_v43 = vld [vmem:[%s3805_s3 + $0x158] sm:$0xff]  ;;  %v139_v44 = vld [vmem:[%s3805_s3 + $0x160] sm:$0xff] }
  0x17   :  { %136 = vst [vmem:[#allocation2 + $0xe8] sm:$0xff] %v135_v42  ;;  %138 = vst [vmem:[#allocation2 + $0x78] sm:$0xff] %v137_v43  ;;  %v141_v45 = vld [vmem:[%s3805_s3 + $0x168] sm:$0xff]  ;;  %v143_v46 = vld [vmem:[%s3805_s3 + $0x170] sm:$0xff] }
  0x18   :  { %140 = vst [vmem:[#allocation2 + $0x70] sm:$0xff] %v139_v44  ;;  %v145_v47 = vld [vmem:[%s3805_s3 + $0x178] sm:$0xff]  ;;  %142 = vst [vmem:[#allocation2 + $0x90] sm:$0xff] %v141_v45  ;;  %v147_v48 = vld [vmem:[%s3805_s3 + $0x180] sm:$0xff] }
  0x19   :  { %144 = vst [vmem:[#allocation2 + $0x1d8] sm:$0xff] %v143_v46  ;;  %146 = vst [vmem:[#allocation2 + $0xd0] sm:$0xff] %v145_v47  ;;  %v149_v49 = vld [vmem:[%s3805_s3 + $0x188] sm:$0xff]  ;;  %v151_v50 = vld [vmem:[%s3805_s3 + $0x190] sm:$0xff] }
  0x1a   :  { %148 = vst [vmem:[#allocation2 + $0xb8] sm:$0xff] %v147_v48  ;;  %150 = vst [vmem:[#allocation2 + $0x88] sm:$0xff] %v149_v49  ;;  %v153_v51 = vld [vmem:[%s3805_s3 + $0x198] sm:$0xff]  ;;  %v155_v52 = vld [vmem:[%s3805_s3 + $0x1a0] sm:$0xff] }
  0x1b   :  { %152 = vst [vmem:[#allocation2 + $0xa8] sm:$0xff] %v151_v50  ;;  %v157_v53 = vld [vmem:[%s3805_s3 + $0x1a8] sm:$0xff]  ;;  %154 = vst [vmem:[#allocation2 + $0x1c8] sm:$0xff] %v153_v51  ;;  %v159_v54 = vld [vmem:[%s3805_s3 + $0x1b0] sm:$0xff] }
  0x1c   :  { %156 = vst [vmem:[#allocation2 + $0x170] sm:$0xff] %v155_v52  ;;  %158 = vst [vmem:[#allocation2 + $0x178] sm:$0xff] %v157_v53  ;;  %v161_v55 = vld [vmem:[%s3805_s3 + $0x1b8] sm:$0xff]  ;;  %v163_v56 = vld [vmem:[%s3805_s3 + $0x1c0] sm:$0xff] }
  0x1d   :  { %160 = vst [vmem:[#allocation2 + $0x68] sm:$0xff] %v159_v54  ;;  %162 = vst [vmem:[#allocation2 + $0x190] sm:$0xff] %v161_v55  ;;  %v165_v57 = vld [vmem:[%s3805_s3 + $0x1c8] sm:$0xff]  ;;  %v167_v58 = vld [vmem:[%s3805_s3 + $0x1d0] sm:$0xff] }
  0x1e   :  { %164 = vst [vmem:[#allocation2 + $0x198] sm:$0xff] %v163_v56  ;;  %v169_v59 = vld [vmem:[%s3805_s3 + $0x1d8] sm:$0xff]  ;;  %166 = vst [vmem:[#allocation2 + $0x38] sm:$0xff] %v165_v57  ;;  %v171_v60 = vld [vmem:[%s3805_s3 + $0x1e0] sm:$0xff] }
  0x1f   :  { %168 = vst [vmem:[#allocation2 + $0xc0] sm:$0xff] %v167_v58  ;;  %170 = vst [vmem:[#allocation2 + $0x1c0] sm:$0xff] %v169_v59  ;;  %v173_v61 = vld [vmem:[%s3805_s3 + $0x1e8] sm:$0xff]  ;;  %v175_v62 = vld [vmem:[%s3805_s3 + $0x1f0] sm:$0xff] }
  0x20   :  { %172 = vst [vmem:[#allocation2 + $0x158] sm:$0xff] %v171_v60  ;;  %174 = vst [vmem:[#allocation2 + $0x10] sm:$0xff] %v173_v61  ;;  %v177_v63 = vld [vmem:[%s3805_s3 + $0x1f8] sm:$0xff] }
  0x21   :  { %176 = vst [vmem:[#allocation2 + $0x58] sm:$0xff] %v175_v62  ;;  %178 = vst [vmem:[#allocation2 + $0xa0] sm:$0xff] %v177_v63 }
  0x22   :  { %186 = vsyncadd [#allocation7], 8192 }
  0x23   :  { %2450 = dma.done.wait [#allocation7], 8192 }
  0x24   :  { %2451 = vsyncadd [#allocation7], 4294959104  ;;  %v2452_v0 = vmov 0.0   ;;  %p2246_p0 = scmp.le.s32.totalorder %s3802_s0, 0 }
  0x25   :  { %191 = vst [vmem:[#allocation3] sm:$0xff] %v2452_v0  ;;  %192 = vst [vmem:[#allocation4] sm:$0xff] %v2452_v0 }
  0x26   :  { %198 = sbr.rel (%p2246_p0) target bundleno = 2077 (0x81d), region = 52 }
  0x2b   :  { %v2676_v1 = vld [vmem:[#allocation2 + $0x10] sm:$0xff]  ;;  %v2678_v2 = vld [vmem:[#allocation2 + $0x158] sm:$0xff]  ;;  %v3807_v5 = vmov 0.0   ;;  %v3819_v8 = vmov 0   ;;  %v2695_v9 = vld [vmem:[#allocation2 + $0x88] sm:$0xff] }
  0x2c   :  { %v2680_v3 = vld [vmem:[#allocation2 + $0x38] sm:$0xff]  ;;  %269 = vmatprep.subr.mxu0 %v2676_v1  ;;  %333 = vmatprep.mubr.f32.mxu0 %v3807_v5  ;;  %v2691_v7 = vld [vmem:[#allocation2 + $0x170] sm:$0xff]  ;;  %v2701_v11 = vld [vmem:[#allocation2 + $0xa0] sm:$0xff] }
  0x2d   :  { %v2683_v4 = vld [vmem:[#allocation2 + $0x198] sm:$0xff]  ;;  %270 = vmatpush1.msra.mxu0 %v2678_v2  ;;  %404 = vmatprep.mubr.f32.mxu1 %v3807_v5  ;;  %3895 = vst [vmem:[#allocation10_spill] sm:$0xff] %v2701_v11  ;;  %v2704_v12 = vld [vmem:[#allocation2 + $0x90] sm:$0xff]  ;;  %v2713_v15 = vld [vmem:[#allocation2 + $0x1c0] sm:$0xff] }
  0x2e   :  { %v2687_v6 = vld [vmem:[#allocation2 + $0x178] sm:$0xff]  ;;  %271 = vmatprep.subr.mxu0 %v2680_v3  ;;  %2320 = vset.pattern.permute.xlu0 %v3819_v8  ;;  %v2710_v14 = vld [vmem:[#allocation2 + $0x70] sm:$0xff]  ;;  %v2715_v16 = vld [vmem:[#allocation2 + $0xc0] sm:$0xff] }
  0x2f   :  { %272 = vmatpush1.msra.mxu0 %v2683_v4  ;;  %2321 = vset.pattern.permute.xlu1 %v3819_v8  ;;  %v2699_v10 = vld [vmem:[#allocation2 + $0xb8] sm:$0xff]  ;;  %v2718_v17 = vld [vmem:[#allocation2 + $0x1f0] sm:$0xff]  ;;  %v2724_v19 = vld [vmem:[#allocation2 + $0x1a0] sm:$0xff] }
  0x30   :  { %273 = vmatprep.subr.mxu0 %v2687_v6  ;;  %340 = vmatprep.subr.mxu1 %v2701_v11  ;;  %v2707_v13 = vld [vmem:[#allocation2 + $0x58] sm:$0xff]  ;;  %v2721_v18 = vld [vmem:[#allocation2 + $0x190] sm:$0xff]  ;;  %v2727_v20 = vld [vmem:[#allocation2 + $0x68] sm:$0xff] }
  0x31   :  { %274 = vmatpush1.msra.mxu0 %v2691_v7  ;;  %341 = vmatpush1.msra.mxu1 %v2707_v13  ;;  %v2729_v21 = vld [vmem:[#allocation2 + $0x1c8] sm:$0xff]  ;;  %v2732_v22 = vld [vmem:[#allocation2 + $0x1f8] sm:$0xff]  ;;  %v2738_v24 = vld [vmem:[#allocation2 + $0x40] sm:$0xff] }
  0x32   :  { %275 = vmatprep.subr.mxu0 %v2695_v9  ;;  %342 = vmatprep.subr.mxu1 %v2713_v15  ;;  %v2735_v23 = vld [vmem:[#allocation2 + $0xa8] sm:$0xff]  ;;  %v2741_v25 = vld [vmem:[#allocation2 + $0xd0] sm:$0xff]  ;;  %v2747_v27 = vld [vmem:[#allocation2 + $0x1d8] sm:$0xff] }
  0x33   :  { %276 = vmatpush1.msra.mxu0 %v2699_v10  ;;  %343 = vmatpush1.msra.mxu1 %v2715_v16  ;;  %v2744_v26 = vld [vmem:[#allocation2 + $0x1d0] sm:$0xff]  ;;  %v2750_v28 = vld [vmem:[#allocation2 + $0x148] sm:$0xff]  ;;  %v2753_v29 = vld [vmem:[#allocation2 + $0x78] sm:$0xff] }
  0x34   :  { %277 = vmatprep.subr.mxu0 %v2704_v12  ;;  %344 = vmatprep.subr.mxu1 %v2721_v18  ;;  %v2756_v30 = vld [vmem:[#allocation2] sm:$0xff]  ;;  %v2759_v31 = vld [vmem:[#allocation2 + $0xe8] sm:$0xff]  ;;  %v2768_v34 = vld [vmem:[#allocation2 + $0xf8] sm:$0xff] }
  0x35   :  { %278 = vmatpush1.msra.mxu0 %v2710_v14  ;;  %345 = vmatpush1.msra.mxu1 %v2727_v20  ;;  %v2762_v32 = vld [vmem:[#allocation2 + $0x1e0] sm:$0xff]  ;;  %v2765_v33 = vld [vmem:[#allocation2 + $0x128] sm:$0xff]  ;;  %v2795_v43 = vld [vmem:[#allocation2 + $0xf0] sm:$0xff] }
  0x36   :  { %279 = vmatprep.subr.mxu0 %v2718_v17  ;;  %346 = vmatprep.subr.mxu1 %v2729_v21  ;;  %v2771_v35 = vld [vmem:[#allocation2 + $0x20] sm:$0xff]  ;;  %v2774_v36 = vld [vmem:[#allocation2 + $0x1e8] sm:$0xff]  ;;  %v2801_v45 = vld [vmem:[#allocation2 + $0x30] sm:$0xff] }
  0x37   :  { %280 = vmatpush1.msra.mxu0 %v2724_v19  ;;  %347 = vmatpush1.msra.mxu1 %v2735_v23  ;;  %v2777_v37 = vld [vmem:[#allocation2 + $0xc8] sm:$0xff]  ;;  %v2783_v39 = vld [vmem:[#allocation2 + $0x100] sm:$0xff]  ;;  %v2804_v46 = vld [vmem:[#allocation2 + $0x150] sm:$0xff] }
  0x38   :  { %281 = vmatprep.subr.mxu0 %v2732_v22  ;;  %348 = vmatprep.subr.mxu1 %v2741_v25  ;;  %v2780_v38 = vld [vmem:[#allocation2 + $0x1a8] sm:$0xff]  ;;  %v2786_v40 = vld [vmem:[#allocation2 + $0x80] sm:$0xff]  ;;  %3897 = vst [vmem:[#allocation12_spill] sm:$0xff] %v2804_v46  ;;  %v2816_v50 = vld [vmem:[#allocation2 + $0x110] sm:$0xff] }
  0x39   :  { %282 = vmatpush1.msra.mxu0 %v2738_v24  ;;  %349 = vmatpush1.msra.mxu1 %v2747_v27  ;;  %v2789_v41 = vld [vmem:[#allocation2 + $0x8] sm:$0xff]  ;;  %v2798_v44 = vld [vmem:[#allocation2 + $0xe0] sm:$0xff]  ;;  %3899 = vst [vmem:[#allocation14_spill] sm:$0xff] %v2816_v50  ;;  %v2819_v51 = vld [vmem:[#allocation2 + $0x1b8] sm:$0xff] }
  0x3a   :  { %283 = vmatprep.subr.mxu0 %v2744_v26  ;;  %350 = vmatprep.subr.mxu1 %v2753_v29  ;;  %v2792_v42 = vld [vmem:[#allocation2 + $0x188] sm:$0xff]  ;;  %3896 = vst [vmem:[#allocation11_spill] sm:$0xff] %v2798_v44  ;;  %v2807_v47 = vld [vmem:[#allocation2 + $0x160] sm:$0xff]  ;;  %v2836_v56 = vld [vmem:[#allocation2 + $0x138] sm:$0xff] }
  0x3b   :  { %284 = vmatpush1.msra.mxu0 %v2750_v28  ;;  %351 = vmatpush1.msra.mxu1 %v2759_v31  ;;  %v2810_v48 = vld [vmem:[#allocation2 + $0x120] sm:$0xff]  ;;  %v2813_v49 = vld [vmem:[#allocation2 + $0x28] sm:$0xff]  ;;  %3904 = vst [vmem:[#allocation19_spill] sm:$0xff] %v2836_v56  ;;  %v2839_v57 = vld [vmem:[#allocation2 + $0x50] sm:$0xff] }
  0x3c   :  { %285 = vmatprep.subr.mxu0 %v2756_v30  ;;  %352 = vmatprep.subr.mxu1 %v2765_v33  ;;  %3898 = vst [vmem:[#allocation13_spill] sm:$0xff] %v2810_v48  ;;  %v2822_v52 = vld [vmem:[#allocation2 + $0x180] sm:$0xff]  ;;  %v2833_v55 = vld [vmem:[#allocation2 + $0x168] sm:$0xff]  ;;  %3905 = vst [vmem:[#allocation20_spill] sm:$0xff] %v2839_v57 }
  0x3d   :  { %286 = vmatpush1.msra.mxu0 %v2762_v32  ;;  %353 = vmatpush1.msra.mxu1 %v2771_v35  ;;  %3900 = vst [vmem:[#allocation15_spill] sm:$0xff] %v2822_v52  ;;  %v2825_v53 = vld [vmem:[#allocation2 + $0x140] sm:$0xff]  ;;  %3903 = vst [vmem:[#allocation18_spill] sm:$0xff] %v2833_v55  ;;  %v2845_v59 = vld [vmem:[#allocation2 + $0x1b0] sm:$0xff] }
  0x3e   :  { %287 = vmatprep.subr.mxu0 %v2768_v34  ;;  %354 = vmatprep.subr.mxu1 %v2777_v37  ;;  %3901 = vst [vmem:[#allocation16_spill] sm:$0xff] %v2825_v53  ;;  %v2830_v54 = vld [vmem:[%s3804_s2] sm:$0xff]  ;;  %3907 = vst [vmem:[#allocation22_spill] sm:$0xff] %v2845_v59  ;;  %v2848_v60 = vld [vmem:[#allocation2 + $0x108] sm:$0xff] }
  0x3f   :  { %288 = vmatpush1.msra.mxu0 %v2774_v36  ;;  %355 = vmatpush1.msra.mxu1 %v2783_v39  ;;  %3902 = vst [vmem:[#allocation17_spill] sm:$0xff] %v2830_v54  ;;  %v2842_v58 = vld [vmem:[#allocation2 + $0x60] sm:$0xff]  ;;  %3908 = vst [vmem:[#allocation23_spill] sm:$0xff] %v2848_v60  ;;  %vm2250_vm0 = vcmp.gt.s32.totalorder %v2830_v54, 0  ;;  %v2852_v61 = vld [vmem:[#allocation2 + $0xb0] sm:$0xff]  ;;  %vm2258_vm1 = vcmp.gt.s32.totalorder %v2830_v54, 1 }
  0x40   :  { %289 = vmatprep.subr.mxu0 %v2780_v38  ;;  %356 = vmatprep.subr.mxu1 %v2789_v41  ;;  %3906 = vst [vmem:[#allocation21_spill] sm:$0xff] %v2842_v58  ;;  %3909 = vst [vmem:[#allocation24_spill] sm:$0xff] %v2852_v61  ;;  %v2855_v62 = vld [vmem:[#allocation2 + $0x98] sm:$0xff]  ;;  %v2858_v63 = vld [vmem:[#allocation3] sm:$0xff]  ;;  %vm2285_vm2 = vcmp.gt.s32.totalorder %v2830_v54, 4  ;;  %vm2303_vm3 = vcmp.gt.s32.totalorder %v2830_v54, 6 }
  0x41   :  { %290 = vmatpush1.msra.mxu0 %v2786_v40  ;;  %357 = vmatpush1.msra.mxu1 %v2795_v43  ;;  %3910 = vst [vmem:[#allocation25_spill] sm:$0xff] %v2855_v62  ;;  %v2861_v0 = vld [vmem:[#allocation2 + $0x118] sm:$0xff]  ;;  %v2865_v5 = vld [vmem:[#allocation2 + $0x48] sm:$0xff] }
  0x42   :  { %291 = vmatprep.subr.mxu0 %v2792_v42  ;;  %358 = vmatprep.subr.mxu1 %v2801_v45  ;;  %3911 = vst [vmem:[#allocation26_spill] sm:$0xff] %v2861_v0  ;;  %3912 = vst [vmem:[#allocation27_spill] sm:$0xff] %v2865_v5 }
  0x43   :  { %292 = vmatpush1.msra.mxu0 %v2798_v44  ;;  %359 = vmatpush1.msra.mxu1 %v2807_v47 }
  0x44   :  { %293 = vmatprep.subr.mxu0 %v2804_v46  ;;  %360 = vmatprep.subr.mxu1 %v2813_v49 }
  0x45   :  { %294 = vmatpush1.msra.mxu0 %v2810_v48  ;;  %361 = vmatpush1.msra.mxu1 %v2819_v51  ;;  %v3919_v54 = vld [vmem:[#allocation22_spill] sm:$0xff] }
  0x46   :  { %295 = vmatprep.subr.mxu0 %v2816_v50  ;;  %362 = vmatprep.subr.mxu1 %v2825_v53 }
  0x47   :  { %296 = vmatpush1.msra.mxu0 %v2822_v52  ;;  %363 = vmatpush1.msra.mxu1 %v2836_v56  ;;  %v2870_v52 = vld [vmem:[#allocation2 + $0x130] sm:$0xff] }
  0x48   :  { %297 = vmatprep.subr.mxu0 %v2833_v55  ;;  %364 = vmatprep.subr.mxu1 %v2842_v58  ;;  %v438_v55 = vsel %vm2250_vm0, 1, %v3819_v8  ;;  %3913 = vst [vmem:[#allocation28_spill] sm:$0xff] %v2870_v52 }
  0x49   :  { %298 = vmatpush1.msra.mxu0 %v2839_v57  ;;  %365 = vmatpush1.msra.mxu1 %v2848_v60  ;;  %v2875_v57 = vld [vmem:[#allocation2 + $0x18] sm:$0xff] }
  0x4a   :  { %299 = vmatprep.subr.mxu0 %v2845_v59  ;;  %366 = vmatprep.subr.mxu1 %v2855_v62  ;;  %3914 = vst [vmem:[#allocation29_spill] sm:$0xff] %v2875_v57  ;;  %v2878_v59 = vld [vmem:[#allocation2 + $0xd8] sm:$0xff] }
  0x4b   :  { %300 = vmatpush1.msra.mxu0 %v2852_v61  ;;  %367 = vmatpush1.msra.mxu1 %v2861_v0  ;;  %3915 = vst [vmem:[#allocation30_spill] sm:$0xff] %v2878_v59  ;;  %v690_v61 = vsel %vm2258_vm1, 1, %v3819_v8 }
  0x4c   :  { %334 = vmatmul.mubr.f32.vlgmr.msra.gmra.mxu0 %v2858_v63  ;;  %368 = vmatprep.subr.mxu1 %v2865_v5 }
  0x4d   :  { %440 = vperm.xlu0 %2320, %v438_v55   ;;  %369 = vmatpush1.msra.mxu1 %v2870_v52  ;;  %v1449_v55 = vsel %vm2285_vm2, 1, %v3819_v8 }
  0x4e   :  { %521 = vmatprep.subr.mxu0 %v2676_v1  ;;  %370 = vmatprep.subr.mxu1 %v2875_v57 }
  0x4f   :  { %522 = vmatpush1.msra.mxu0 %v2678_v2  ;;  %371 = vmatpush1.msra.mxu1 %v2878_v59 }
  0x50   :  { %523 = vmatprep.subr.mxu0 %v2680_v3  ;;  %405 = vmatmul.mubr.f32.vlgmr.msra.gmra.mxu1 %v2858_v63 }
  0x51   :  { %692 = vperm.xlu0 %2320, %v690_v61   ;;  %592 = vmatprep.subr.mxu1 %v2701_v11  ;;  %v1955_v61 = vsel %vm2303_vm3, 1, %v3819_v8  ;;  %v3918_v8 = vld [vmem:[#allocation20_spill] sm:$0xff] }
  0x52   :  { %524 = vmatpush1.msra.mxu0 %v2683_v4  ;;  %593 = vmatpush1.msra.mxu1 %v2707_v13 }
  0x53   :  { %525 = vmatprep.subr.mxu0 %v2687_v6  ;;  %594 = vmatprep.subr.mxu1 %v2713_v15 }
  0x54   :  { %526 = vmatpush1.msra.mxu0 %v2691_v7  ;;  %595 = vmatpush1.msra.mxu1 %v2715_v16 }
  0x55   :  { %1451 = vperm.xlu0 %2320, %v1449_v55   ;;  %596 = vmatprep.subr.mxu1 %v2721_v18  ;;  %v3916_v55 = vld [vmem:[#allocation15_spill] sm:$0xff] }
  0x56   :  { %527 = vmatprep.subr.mxu0 %v2695_v9  ;;  %597 = vmatpush1.msra.mxu1 %v2727_v20 }
  0x57   :  { %528 = vmatpush1.msra.mxu0 %v2699_v10  ;;  %598 = vmatprep.subr.mxu1 %v2729_v21 }
  0x58   :  { %529 = vmatprep.subr.mxu0 %v2704_v12  ;;  %599 = vmatpush1.msra.mxu1 %v2735_v23 }
  0x59   :  { %1957 = vperm.xlu0 %2320, %v1955_v61   ;;  %600 = vmatprep.subr.mxu1 %v2741_v25  ;;  %v3917_v61 = vld [vmem:[#allocation18_spill] sm:$0xff] }
  0x5a   :  { %530 = vmatpush1.msra.mxu0 %v2710_v14  ;;  %601 = vmatpush1.msra.mxu1 %v2747_v27 }
  0x5b   :  { %531 = vmatprep.subr.mxu0 %v2718_v17  ;;  %602 = vmatprep.subr.mxu1 %v2753_v29 }
  0x5c   :  { %532 = vmatpush1.msra.mxu0 %v2724_v19  ;;  %603 = vmatpush1.msra.mxu1 %v2759_v31 }
  0x5d   :  { %533 = vmatprep.subr.mxu0 %v2732_v22  ;;  %604 = vmatprep.subr.mxu1 %v2765_v33 }
  0x5e   :  { %534 = vmatpush1.msra.mxu0 %v2738_v24  ;;  %605 = vmatpush1.msra.mxu1 %v2771_v35 }
  0x5f   :  { %535 = vmatprep.subr.mxu0 %v2744_v26  ;;  %606 = vmatprep.subr.mxu1 %v2777_v37 }
  0x60   :  { %536 = vmatpush1.msra.mxu0 %v2750_v28  ;;  %607 = vmatpush1.msra.mxu1 %v2783_v39 }
  0x61   :  { %537 = vmatprep.subr.mxu0 %v2756_v30  ;;  %608 = vmatprep.subr.mxu1 %v2789_v41 }
  0x62   :  { %538 = vmatpush1.msra.mxu0 %v2762_v32  ;;  %609 = vmatpush1.msra.mxu1 %v2795_v43 }
  0x63   :  { %539 = vmatprep.subr.mxu0 %v2768_v34  ;;  %610 = vmatprep.subr.mxu1 %v2801_v45 }
  0x64   :  { %540 = vmatpush1.msra.mxu0 %v2774_v36  ;;  %611 = vmatpush1.msra.mxu1 %v2807_v47 }
  0x65   :  { %541 = vmatprep.subr.mxu0 %v2780_v38  ;;  %612 = vmatprep.subr.mxu1 %v2813_v49 }
  0x66   :  { %542 = vmatpush1.msra.mxu0 %v2786_v40  ;;  %613 = vmatpush1.msra.mxu1 %v2819_v51 }
  0x67   :  { %543 = vmatprep.subr.mxu0 %v2792_v42  ;;  %614 = vmatprep.subr.mxu1 %v2825_v53 }
  0x68   :  { %544 = vmatpush1.msra.mxu0 %v2798_v44  ;;  %615 = vmatpush1.msra.mxu1 %v2836_v56 }
  0x69   :  { %545 = vmatprep.subr.mxu0 %v2804_v46  ;;  %616 = vmatprep.subr.mxu1 %v2842_v58 }
  0x6a   :  { %546 = vmatpush1.msra.mxu0 %v2810_v48  ;;  %617 = vmatpush1.msra.mxu1 %v2848_v60  ;;  %v3920_v60 = vld [vmem:[#allocation24_spill] sm:$0xff] }
  0x6b   :  { %547 = vmatprep.subr.mxu0 %v2816_v50  ;;  %618 = vmatprep.subr.mxu1 %v2855_v62  ;;  %v3921_v50 = vmov 0.0  }
  0x6c   :  { %548 = vmatpush1.msra.mxu0 %v3916_v55  ;;  %619 = vmatpush1.msra.mxu1 %v2861_v0  ;;  %v267_v0 = vld [vmem:[%s3803_s1 + $0x10] sm:$0xff] }
  0x6d   :  { %549 = vmatprep.subr.mxu0 %v3917_v61  ;;  %620 = vmatprep.subr.mxu1 %v2865_v5 }
  0x6e   :  { %550 = vmatpush1.msra.mxu0 %v3918_v8  ;;  %621 = vmatpush1.msra.mxu1 %v2870_v52  ;;  %v265_v52 = vld [vmem:[%s3803_s1] sm:$0xff] }
  0x6f   :  { %551 = vmatprep.subr.mxu0 %v3919_v54  ;;  %622 = vmatprep.subr.mxu1 %v2875_v57  ;;  %v266_v57 = vld [vmem:[%s3803_s1 + $0x8] sm:$0xff] }
  0x70   :  { %552 = vmatpush1.msra.mxu0 %v3920_v60  ;;  %585 = vmatprep.mubr.f32.mxu0 %v3921_v50 }
  0x71   :  { %623 = vmatpush1.msra.mxu1 %v2878_v59  ;;  %656 = vmatprep.mubr.f32.mxu1 %v3921_v50 }
  0x72   :  { %774 = vmatprep.subr.mxu0 %v2676_v1  ;;  %845 = vmatprep.subr.mxu1 %v2701_v11  ;;  %v268_v1 = vld [vmem:[%s3803_s1 + $0x18] sm:$0xff] }
  0xc8   :  { %v441_v58 = vpop.permute.xlu0 %440 }
  0xc9   :  { %vm442_vm4 = vcmp.eq.s32.totalorder %v441_v58, 1 }
 0x10c   :  { %v335_v8 = vpop.f32.mrf.mxu0 }
 0x10d   :  { %v336_v60 = vadd.f32 %v335_v8, %v265_v52 }
 0x10e   :  { %v337_v54 = vpop.f32.mrf.mxu0 }
 0x10f   :  { %v2247_v5 = vmul.f32 -1.442695, %v336_v60  ;;  %v338_v61 = vadd.f32 %v337_v54, %v266_v57 }
 0x110   :  { %v406_v50 = vpop.f32.mrf.mxu1 }
 0x111   :  { %2322 = vpow2.f32 %v2247_v5  ;;  %v2248_v59 = vmul.f32 -1.442695, %v338_v61  ;;  %v407_v62 = vadd.f32 %v406_v50, %v267_v0  ;;  %v430_v61 = vld [vmem:[#allocation4] sm:$0xff] }
 0x112   :  { %v408_v11 = vpop.f32.mrf.mxu1 }
 0x113   :  { %2324 = vpow2.f32 %v2248_v59  ;;  %v409_v55 = vadd.f32 %v408_v11, %v268_v1 }
 0x114   :  { %2326 = vtanh.f32 %v407_v62 }
 0x115   :  { %v2249_v48 = vmul.f32 -1.442695, %v409_v55 }
 0x117   :  { %2328 = vpow2.f32 %v2249_v48 }
 0x11e   :  { %v2323_v8 = vpop.eup %2322 }
 0x11f   :  { %v414_v52 = vadd.f32 1.0, %v2323_v8 }
 0x120   :  { %v2325_v54 = vpop.eup %2324 }
 0x121   :  { %2330 = vrcp.f32 %v414_v52  ;;  %v420_v5 = vadd.f32 1.0, %v2325_v54  ;;  %v2327_v57 = vpop.eup %2326 }
 0x123   :  { %2332 = vrcp.f32 %v420_v5 }
 0x124   :  { %v2329_v59 = vpop.eup %2328 }
 0x125   :  { %v427_v56 = vadd.f32 1.0, %v2329_v59 }
 0x127   :  { %2334 = vrcp.f32 %v427_v56 }
 0x12e   :  { %v2331_v60 = vpop.eup %2330 }
 0x12f   :  { %v432_v53 = vmul.f32 %v2331_v60, %v2327_v57 }
 0x130   :  { %v2333_v46 = vpop.eup %2332 }
 0x131   :  { %v431_v44 = vmul.f32 %v2333_v46, %v430_v61 }
 0x133   :  { %v433_v11 = vadd.f32 %v432_v53, %v431_v44 }
 0x134   :  { %v2335_v62 = vpop.eup %2334 }
 0x135   :  { %2336 = vtanh.f32 %v433_v11  ;;  %v2969_v50 = vsel %vm442_vm4, %v433_v11, %v430_v61  ;;  %v693_v11 = vpop.permute.xlu0 %692 }
 0x136   :  { %vm694_vm9 = vcmp.eq.s32.totalorder %v693_v11, 1  ;;  %v3247_v11 = vld [vmem:[#allocation2 + $0x1b0] sm:$0xff] }
 0x142   :  { %v2337_v48 = vpop.eup %2336 }
 0x143   :  { %v435_v0 = vmul.f32 %v2337_v48, %v2335_v62 }
 0x145   :  { %v2972_v55 = vsel %vm442_vm4, %v435_v0, %v2858_v63  ;;  %v448_v1 = vsel %vm442_vm4, %v435_v0, 0.0 }
 0x146   :  { %449 = vst [vmem:[%s3806_s4] sm:$0xff] %v448_v1  ;;  %586 = vmatmul.mubr.f32.vlgmr.msra.gmra.mxu0 %v2972_v55  ;;  %657 = vmatmul.mubr.f32.vlgmr.msra.gmra.mxu1 %v2972_v55 }
 0x147   :  { %775 = vmatpush1.msra.mxu0 %v2678_v2  ;;  %846 = vmatpush1.msra.mxu1 %v2707_v13  ;;  %v3922_v2 = vld [vmem:[#allocation16_spill] sm:$0xff] }
 0x148   :  { %776 = vmatprep.subr.mxu0 %v2680_v3  ;;  %847 = vmatprep.subr.mxu1 %v2713_v15  ;;  %v3923_v3 = vld [vmem:[#allocation11_spill] sm:$0xff] }
 0x149   :  { %777 = vmatpush1.msra.mxu0 %v2683_v4  ;;  %848 = vmatpush1.msra.mxu1 %v2715_v16  ;;  %v3924_v4 = vld [vmem:[#allocation19_spill] sm:$0xff] }
 0x14a   :  { %778 = vmatprep.subr.mxu0 %v2687_v6  ;;  %849 = vmatprep.subr.mxu1 %v2721_v18  ;;  %v3925_v6 = vld [vmem:[#allocation12_spill] sm:$0xff] }
 0x14b   :  { %779 = vmatpush1.msra.mxu0 %v2691_v7  ;;  %850 = vmatpush1.msra.mxu1 %v2727_v20  ;;  %v3926_v7 = vld [vmem:[#allocation21_spill] sm:$0xff]  ;;  %v3933_v20 = vld [vmem:[#allocation18_spill] sm:$0xff] }
 0x14c   :  { %780 = vmatprep.subr.mxu0 %v2695_v9  ;;  %851 = vmatprep.subr.mxu1 %v2729_v21  ;;  %v3927_v9 = vld [vmem:[#allocation13_spill] sm:$0xff]  ;;  %v3934_v21 = vld [vmem:[#allocation27_spill] sm:$0xff] }
 0x14d   :  { %781 = vmatpush1.msra.mxu0 %v2699_v10  ;;  %852 = vmatpush1.msra.mxu1 %v2735_v23  ;;  %v3928_v10 = vld [vmem:[#allocation23_spill] sm:$0xff]  ;;  %v3936_v23 = vld [vmem:[#allocation28_spill] sm:$0xff] }
 0x14e   :  { %782 = vmatprep.subr.mxu0 %v2704_v12  ;;  %853 = vmatprep.subr.mxu1 %v2741_v25  ;;  %v3929_v12 = vld [vmem:[#allocation14_spill] sm:$0xff]  ;;  %v3938_v25 = vld [vmem:[#allocation29_spill] sm:$0xff] }
 0x14f   :  { %783 = vmatpush1.msra.mxu0 %v2710_v14  ;;  %854 = vmatpush1.msra.mxu1 %v2747_v27  ;;  %v3930_v14 = vld [vmem:[#allocation25_spill] sm:$0xff]  ;;  %v3940_v27 = vmov 0.0  }
 0x150   :  { %784 = vmatprep.subr.mxu0 %v2718_v17  ;;  %855 = vmatprep.subr.mxu1 %v2753_v29  ;;  %v3931_v17 = vld [vmem:[#allocation15_spill] sm:$0xff]  ;;  %v3942_v29 = vld [vmem:[#allocation10_spill] sm:$0xff] }
 0x151   :  { %785 = vmatpush1.msra.mxu0 %v2724_v19  ;;  %856 = vmatpush1.msra.mxu1 %v2759_v31  ;;  %v3932_v19 = vld [vmem:[#allocation26_spill] sm:$0xff]  ;;  %v3944_v31 = vmov 0  }
 0x152   :  { %786 = vmatprep.subr.mxu0 %v2732_v22  ;;  %857 = vmatprep.subr.mxu1 %v2765_v33  ;;  %v3935_v22 = vld [vmem:[#allocation20_spill] sm:$0xff] }
 0x153   :  { %787 = vmatpush1.msra.mxu0 %v2738_v24  ;;  %858 = vmatpush1.msra.mxu1 %v2771_v35  ;;  %v3937_v24 = vld [vmem:[#allocation22_spill] sm:$0xff] }
 0x154   :  { %788 = vmatprep.subr.mxu0 %v2744_v26  ;;  %859 = vmatprep.subr.mxu1 %v2777_v37  ;;  %v3939_v26 = vld [vmem:[#allocation24_spill] sm:$0xff] }
 0x155   :  { %789 = vmatpush1.msra.mxu0 %v2750_v28  ;;  %860 = vmatpush1.msra.mxu1 %v2783_v39  ;;  %v3941_v28 = vld [vmem:[#allocation30_spill] sm:$0xff] }
 0x156   :  { %790 = vmatprep.subr.mxu0 %v2756_v30  ;;  %861 = vmatprep.subr.mxu1 %v2789_v41  ;;  %v3943_v30 = vld [vmem:[#allocation17_spill] sm:$0xff] }
 0x157   :  { %791 = vmatpush1.msra.mxu0 %v2762_v32  ;;  %862 = vmatpush1.msra.mxu1 %v2795_v43  ;;  %vm2267_vm5 = vcmp.gt.s32.totalorder %v3943_v30, 2  ;;  %vm2276_vm6 = vcmp.gt.s32.totalorder %v3943_v30, 3  ;;  %vm2294_vm7 = vcmp.gt.s32.totalorder %v3943_v30, 5  ;;  %vm2312_vm8 = vcmp.gt.s32.totalorder %v3943_v30, 7  ;;  %v3151_v30 = vld [vmem:[#allocation2 + $0x1d0] sm:$0xff]  ;;  %3965 = vst [vmem:[#allocation17_spill] sm:$0xff] %v3247_v11 }
 0x158   :  { %792 = vmatprep.subr.mxu0 %v2768_v34  ;;  %863 = vmatprep.subr.mxu1 %v2801_v45  ;;  %v943_v32 = vsel %vm2267_vm5, 1, %v3944_v31  ;;  %v1196_v33 = vsel %vm2276_vm6, 1, %v3944_v31  ;;  %v1702_v34 = vsel %vm2294_vm7, 1, %v3944_v31  ;;  %v2208_v35 = vsel %vm2312_vm8, 1, %v3944_v31  ;;  %v2254_v45 = vld [vmem:[%s3803_s1 + $0x38] sm:$0xff]  ;;  %v3153_v31 = vld [vmem:[#allocation2 + $0xc8] sm:$0xff] }
 0x159   :  { %793 = vmatpush1.msra.mxu0 %v2774_v36  ;;  %864 = vmatpush1.msra.mxu1 %v2807_v47  ;;  %v2251_v36 = vld [vmem:[%s3803_s1 + $0x20] sm:$0xff] }
 0x15a   :  { %794 = vmatprep.subr.mxu0 %v2780_v38  ;;  %865 = vmatprep.subr.mxu1 %v2813_v49  ;;  %v2252_v38 = vld [vmem:[%s3803_s1 + $0x28] sm:$0xff]  ;;  %v2253_v49 = vld [vmem:[%s3803_s1 + $0x30] sm:$0xff] }
 0x15b   :  { %795 = vmatpush1.msra.mxu0 %v2786_v40  ;;  %866 = vmatpush1.msra.mxu1 %v2819_v51 }
 0x15c   :  { %796 = vmatprep.subr.mxu0 %v2792_v42  ;;  %867 = vmatprep.subr.mxu1 %v3922_v2 }
 0x15d   :  { %797 = vmatpush1.msra.mxu0 %v3923_v3  ;;  %868 = vmatpush1.msra.mxu1 %v3924_v4 }
 0x15e   :  { %798 = vmatprep.subr.mxu0 %v3925_v6  ;;  %869 = vmatprep.subr.mxu1 %v3926_v7  ;;  %v3086_v6 = vld [vmem:[#allocation2 + $0x38] sm:$0xff] }
 0x15f   :  { %799 = vmatpush1.msra.mxu0 %v3927_v9  ;;  %870 = vmatpush1.msra.mxu1 %v3928_v10  ;;  %v3089_v7 = vld [vmem:[#allocation2 + $0x198] sm:$0xff]  ;;  %v3105_v9 = vld [vmem:[#allocation2 + $0x1c8] sm:$0xff] }
 0x160   :  { %800 = vmatprep.subr.mxu0 %v3929_v12  ;;  %871 = vmatprep.subr.mxu1 %v3930_v14  ;;  %v3109_v10 = vld [vmem:[#allocation2 + $0xb8] sm:$0xff]  ;;  %v3111_v12 = vld [vmem:[#allocation2 + $0xa8] sm:$0xff]  ;;  %v3115_v14 = vld [vmem:[#allocation2 + $0x90] sm:$0xff] }
 0x161   :  { %801 = vmatpush1.msra.mxu0 %v3931_v17  ;;  %872 = vmatpush1.msra.mxu1 %v3932_v19  ;;  %v3117_v17 = vld [vmem:[#allocation2 + $0xd0] sm:$0xff] }
 0x162   :  { %802 = vmatprep.subr.mxu0 %v3933_v20  ;;  %873 = vmatprep.subr.mxu1 %v3934_v21  ;;  %v3121_v19 = vld [vmem:[#allocation2 + $0x70] sm:$0xff]  ;;  %v3123_v20 = vld [vmem:[#allocation2 + $0x1d8] sm:$0xff] }
 0x163   :  { %803 = vmatpush1.msra.mxu0 %v3935_v22  ;;  %874 = vmatpush1.msra.mxu1 %v3936_v23  ;;  %v3127_v21 = vld [vmem:[#allocation2 + $0x1f0] sm:$0xff]  ;;  %v3129_v22 = vld [vmem:[#allocation2 + $0x78] sm:$0xff]  ;;  %v3133_v23 = vld [vmem:[#allocation2 + $0x1a0] sm:$0xff] }
 0x164   :  { %804 = vmatprep.subr.mxu0 %v3937_v24  ;;  %875 = vmatprep.subr.mxu1 %v3938_v25  ;;  %v3135_v24 = vld [vmem:[#allocation2 + $0xe8] sm:$0xff]  ;;  %v3139_v25 = vld [vmem:[#allocation2 + $0x1f8] sm:$0xff] }
 0x165   :  { %805 = vmatpush1.msra.mxu0 %v3939_v26  ;;  %838 = vmatprep.mubr.f32.mxu0 %v3940_v27  ;;  %v3141_v26 = vld [vmem:[#allocation2 + $0x128] sm:$0xff] }
 0x166   :  { %876 = vmatpush1.msra.mxu1 %v3941_v28  ;;  %909 = vmatprep.mubr.f32.mxu1 %v3940_v27  ;;  %v3145_v28 = vld [vmem:[#allocation2 + $0x40] sm:$0xff] }
 0x167   :  { %1098 = vmatprep.subr.mxu1 %v3942_v29  ;;  %945 = vperm.xlu1 %2321, %v943_v32   ;;  %v3147_v29 = vld [vmem:[#allocation2 + $0x20] sm:$0xff]  ;;  %v3157_v32 = vld [vmem:[#allocation2 + $0x148] sm:$0xff] }
 0x16b   :  { %1198 = vperm.xlu1 %2321, %v1196_v33   ;;  %v3159_v33 = vld [vmem:[#allocation2 + $0x100] sm:$0xff] }
 0x16f   :  { %1704 = vperm.xlu1 %2321, %v1702_v34   ;;  %v3163_v34 = vld [vmem:[#allocation2] sm:$0xff] }
 0x173   :  { %2210 = vperm.xlu1 %2321, %v2208_v35   ;;  %v3165_v35 = vld [vmem:[#allocation2 + $0x8] sm:$0xff] }
 0x206   :  { %v587_v37 = vpop.f32.mrf.mxu0  ;;  %v658_v43 = vpop.f32.mrf.mxu1 }
 0x207   :  { %v588_v39 = vadd.f32 %v2251_v36, %v587_v37  ;;  %v659_v56 = vadd.f32 %v2253_v49, %v658_v43  ;;  %v3169_v36 = vld [vmem:[#allocation2 + $0x1e0] sm:$0xff]  ;;  %v3171_v37 = vld [vmem:[#allocation2 + $0xf0] sm:$0xff]  ;;  %v3189_v43 = vld [vmem:[#allocation2 + $0x28] sm:$0xff] }
 0x208   :  { %v589_v40 = vpop.f32.mrf.mxu0  ;;  %v660_v46 = vpop.f32.mrf.mxu1  ;;  %3945 = vst [vmem:[#allocation16_spill] sm:$0xff] %v3171_v37  ;;  %3948 = vst [vmem:[#allocation12_spill] sm:$0xff] %v3189_v43  ;;  %v3205_v49 = vld [vmem:[#allocation2 + $0xe0] sm:$0xff] }
 0x209   :  { %v2255_v41 = vmul.f32 -1.442695, %v588_v39  ;;  %v590_v42 = vadd.f32 %v2252_v38, %v589_v40  ;;  %v661_v47 = vadd.f32 %v2254_v45, %v660_v46  ;;  %v3175_v38 = vld [vmem:[#allocation2 + $0xf8] sm:$0xff]  ;;  %v3177_v39 = vld [vmem:[#allocation2 + $0x30] sm:$0xff]  ;;  %v3181_v40 = vld [vmem:[#allocation2 + $0x1e8] sm:$0xff]  ;;  %3951 = vst [vmem:[#allocation23_spill] sm:$0xff] %v3205_v49 }
 0x20a   :  { %3946 = vst [vmem:[#allocation11_spill] sm:$0xff] %v3177_v39  ;;  %v3195_v45 = vld [vmem:[#allocation2 + $0x1b8] sm:$0xff]  ;;  %v3199_v46 = vld [vmem:[#allocation2 + $0x188] sm:$0xff] }
 0x20b   :  { %2338 = vpow2.f32 %v2255_v41  ;;  %v2256_v44 = vmul.f32 -1.442695, %v590_v42  ;;  %v2257_v51 = vmul.f32 -1.442695, %v661_v47  ;;  %v3183_v41 = vld [vmem:[#allocation2 + $0x160] sm:$0xff]  ;;  %v3187_v42 = vld [vmem:[#allocation2 + $0x1a8] sm:$0xff] }
 0x20c   :  { %3947 = vst [vmem:[#allocation19_spill] sm:$0xff] %v3183_v41  ;;  %3949 = vst [vmem:[#allocation21_spill] sm:$0xff] %v3195_v45  ;;  %v3201_v47 = vld [vmem:[#allocation2 + $0x140] sm:$0xff] }
 0x20d   :  { %2340 = vpow2.f32 %v2256_v44  ;;  %v3193_v44 = vld [vmem:[#allocation2 + $0x80] sm:$0xff]  ;;  %3950 = vst [vmem:[#allocation13_spill] sm:$0xff] %v3201_v47 }
 0x20e   :  { %2342 = vpow2.f32 %v2257_v51  ;;  %v3207_v51 = vld [vmem:[#allocation2 + $0x138] sm:$0xff] }
 0x20f   :  { %3952 = vst [vmem:[#allocation14_spill] sm:$0xff] %v3207_v51 }
 0x218   :  { %v2339_v53 = vpop.eup %2338 }
 0x219   :  { %v666_v58 = vadd.f32 1.0, %v2339_v53  ;;  %v3211_v53 = vld [vmem:[#allocation2 + $0x150] sm:$0xff] }
 0x21a   :  { %v2341_v63 = vpop.eup %2340  ;;  %3953 = vst [vmem:[#allocation25_spill] sm:$0xff] %v3211_v53 }
 0x21b   :  { %2344 = vrcp.f32 %v666_v58  ;;  %v672_v8 = vadd.f32 1.0, %v2341_v63  ;;  %v2343_v52 = vpop.eup %2342  ;;  %v3217_v58 = vld [vmem:[#allocation2 + $0x120] sm:$0xff]  ;;  %v3219_v63 = vld [vmem:[#allocation2 + $0x108] sm:$0xff] }
 0x21c   :  { %2346 = vtanh.f32 %v659_v56  ;;  %v679_v59 = vadd.f32 1.0, %v2343_v52  ;;  %v3213_v56 = vld [vmem:[#allocation2 + $0x60] sm:$0xff]  ;;  %3955 = vst [vmem:[#allocation26_spill] sm:$0xff] %v3217_v58  ;;  %3956 = vst [vmem:[#allocation18_spill] sm:$0xff] %v3219_v63  ;;  %v3225_v52 = vld [vmem:[#allocation2 + $0x98] sm:$0xff] }
 0x21d   :  { %2348 = vrcp.f32 %v672_v8  ;;  %3954 = vst [vmem:[#allocation15_spill] sm:$0xff] %v3213_v56  ;;  %v3223_v8 = vld [vmem:[#allocation2 + $0x110] sm:$0xff]  ;;  %3958 = vst [vmem:[#allocation20_spill] sm:$0xff] %v3225_v52 }
 0x21e   :  { %2350 = vrcp.f32 %v679_v59  ;;  %3957 = vst [vmem:[#allocation27_spill] sm:$0xff] %v3223_v8  ;;  %v3237_v59 = vld [vmem:[#allocation2 + $0x48] sm:$0xff] }
 0x21f   :  { %3962 = vst [vmem:[#allocation24_spill] sm:$0xff] %v3237_v59 }
 0x228   :  { %v2345_v54 = vpop.eup %2344 }
 0x229   :  { %v2347_v5 = vpop.eup %2346 }
 0x22a   :  { %v2349_v57 = vpop.eup %2348  ;;  %v684_v60 = vmul.f32 %v2347_v5, %v2345_v54  ;;  %v3229_v54 = vld [vmem:[#allocation2 + $0x180] sm:$0xff]  ;;  %v3231_v5 = vld [vmem:[#allocation2 + $0x118] sm:$0xff] }
 0x22b   :  { %v683_v61 = vmul.f32 %v2349_v57, %v2969_v50  ;;  %v2351_v0 = vpop.eup %2350  ;;  %3959 = vst [vmem:[#allocation28_spill] sm:$0xff] %v3229_v54  ;;  %3960 = vst [vmem:[#allocation22_spill] sm:$0xff] %v3231_v5  ;;  %v3235_v57 = vld [vmem:[#allocation2 + $0x168] sm:$0xff] }
 0x22c   :  { %3961 = vst [vmem:[#allocation29_spill] sm:$0xff] %v3235_v57 }
 0x22d   :  { %v685_v62 = vadd.f32 %v684_v60, %v683_v61  ;;  %v3241_v60 = vld [vmem:[#allocation2 + $0x50] sm:$0xff] }
 0x22e   :  { %3963 = vst [vmem:[#allocation30_spill] sm:$0xff] %v3241_v60  ;;  %v3243_v61 = vld [vmem:[#allocation2 + $0x130] sm:$0xff] }
 0x22f   :  { %2352 = vtanh.f32 %v685_v62  ;;  %v3066_v48 = vsel %vm694_vm9, %v685_v62, %v2969_v50  ;;  %v3082_v50 = vld [vmem:[#allocation2 + $0x10] sm:$0xff]  ;;  %3964 = vst [vmem:[#allocation10_spill] sm:$0xff] %v3243_v61  ;;  %v3249_v62 = vld [vmem:[#allocation2 + $0x18] sm:$0xff] }
 0x230   :  { %1027 = vmatprep.subr.mxu0 %v3082_v50  ;;  %3966 = vst [vmem:[#allocation31_spill] sm:$0xff] %v3249_v62 }
 0x23c   :  { %v2353_v1 = vpop.eup %2352 }
 0x23d   :  { %v687_v2 = vmul.f32 %v2353_v1, %v2351_v0  ;;  %v3253_v0 = vld [vmem:[#allocation2 + $0xb0] sm:$0xff]  ;;  %v3255_v1 = vld [vmem:[#allocation2 + $0xd8] sm:$0xff] }
 0x23e   :  { %3967 = vst [vmem:[#allocation32_spill] sm:$0xff] %v3253_v0  ;;  %3968 = vst [vmem:[#allocation33_spill] sm:$0xff] %v3255_v1 }
 0x23f   :  { %v3069_v3 = vsel %vm694_vm9, %v687_v2, %v2972_v55  ;;  %v700_v4 = vsel %vm694_vm9, %v687_v2, 0.0  ;;  %v3084_v55 = vld [vmem:[#allocation2 + $0x158] sm:$0xff]  ;;  %v2260_v2 = vld [vmem:[%s3803_s1 + $0x40] sm:$0xff] }
 0x240   :  { %2259 = vst [vmem:[%s3806_s4 + $0x8] sm:$0xff] %v700_v4  ;;  %839 = vmatmul.mubr.f32.vlgmr.msra.gmra.mxu0 %v3069_v3  ;;  %910 = vmatmul.mubr.f32.vlgmr.msra.gmra.mxu1 %v3069_v3 }
 0x241   :  { %1099 = vmatpush1.msra.mxu1 %v2707_v13  ;;  %1091 = vmatprep.mubr.f32.mxu0 %v3940_v27  ;;  %v3092_v13 = vld [vmem:[#allocation2 + $0x178] sm:$0xff] }
 0x242   :  { %1100 = vmatprep.subr.mxu1 %v2713_v15  ;;  %1162 = vmatprep.mubr.f32.mxu1 %v3940_v27  ;;  %v3097_v15 = vld [vmem:[#allocation2 + $0x170] sm:$0xff] }
 0x243   :  { %1101 = vmatpush1.msra.mxu1 %v2715_v16  ;;  %1028 = vmatpush1.msra.mxu0 %v3084_v55  ;;  %v3099_v16 = vld [vmem:[#allocation2 + $0x68] sm:$0xff] }
 0x244   :  { %1102 = vmatprep.subr.mxu1 %v2721_v18  ;;  %1029 = vmatprep.subr.mxu0 %v3086_v6  ;;  %v3103_v18 = vld [vmem:[#allocation2 + $0x88] sm:$0xff] }
 0x245   :  { %1030 = vmatpush1.msra.mxu0 %v3089_v7  ;;  %1103 = vmatpush1.msra.mxu1 %v3099_v16 }
 0x246   :  { %1031 = vmatprep.subr.mxu0 %v3092_v13  ;;  %1104 = vmatprep.subr.mxu1 %v3105_v9 }
 0x247   :  { %1032 = vmatpush1.msra.mxu0 %v3097_v15  ;;  %1105 = vmatpush1.msra.mxu1 %v3111_v12 }
 0x248   :  { %1033 = vmatprep.subr.mxu0 %v3103_v18  ;;  %1106 = vmatprep.subr.mxu1 %v3117_v17 }
 0x249   :  { %1034 = vmatpush1.msra.mxu0 %v3109_v10  ;;  %1107 = vmatpush1.msra.mxu1 %v3123_v20 }
 0x24a   :  { %1035 = vmatprep.subr.mxu0 %v3115_v14  ;;  %1108 = vmatprep.subr.mxu1 %v3129_v22 }
 0x24b   :  { %1036 = vmatpush1.msra.mxu0 %v3121_v19  ;;  %1109 = vmatpush1.msra.mxu1 %v3135_v24 }
 0x24c   :  { %1037 = vmatprep.subr.mxu0 %v3127_v21  ;;  %1110 = vmatprep.subr.mxu1 %v3141_v26 }
 0x24d   :  { %1038 = vmatpush1.msra.mxu0 %v3133_v23  ;;  %1111 = vmatpush1.msra.mxu1 %v3147_v29 }
 0x24e   :  { %1039 = vmatprep.subr.mxu0 %v3139_v25  ;;  %1112 = vmatprep.subr.mxu1 %v3153_v31 }
 0x24f   :  { %1040 = vmatpush1.msra.mxu0 %v3145_v28  ;;  %1113 = vmatpush1.msra.mxu1 %v3159_v33 }
 0x250   :  { %1041 = vmatprep.subr.mxu0 %v3151_v30  ;;  %1114 = vmatprep.subr.mxu1 %v3165_v35 }
 0x251   :  { %1042 = vmatpush1.msra.mxu0 %v3157_v32  ;;  %1115 = vmatpush1.msra.mxu1 %v3171_v37 }
 0x252   :  { %1043 = vmatprep.subr.mxu0 %v3163_v34  ;;  %1116 = vmatprep.subr.mxu1 %v3177_v39 }
 0x253   :  { %1044 = vmatpush1.msra.mxu0 %v3169_v36  ;;  %1117 = vmatpush1.msra.mxu1 %v3183_v41 }
 0x254   :  { %1045 = vmatprep.subr.mxu0 %v3175_v38  ;;  %1118 = vmatprep.subr.mxu1 %v3189_v43 }
 0x255   :  { %1046 = vmatpush1.msra.mxu0 %v3181_v40  ;;  %1119 = vmatpush1.msra.mxu1 %v3195_v45  ;;  %v2262_v45 = vld [vmem:[%s3803_s1 + $0x50] sm:$0xff] }
 0x256   :  { %1047 = vmatprep.subr.mxu0 %v3187_v42  ;;  %1120 = vmatprep.subr.mxu1 %v3201_v47 }
 0x257   :  { %1048 = vmatpush1.msra.mxu0 %v3193_v44  ;;  %1121 = vmatpush1.msra.mxu1 %v3207_v51 }
 0x258   :  { %1049 = vmatprep.subr.mxu0 %v3199_v46  ;;  %1122 = vmatprep.subr.mxu1 %v3213_v56 }
 0x259   :  { %1050 = vmatpush1.msra.mxu0 %v3205_v49  ;;  %1123 = vmatpush1.msra.mxu1 %v3219_v63 }
 0x25a   :  { %1051 = vmatprep.subr.mxu0 %v3211_v53  ;;  %1124 = vmatprep.subr.mxu1 %v3225_v52 }
 0x25b   :  { %1052 = vmatpush1.msra.mxu0 %v3217_v58  ;;  %1125 = vmatpush1.msra.mxu1 %v3231_v5 }
 0x25c   :  { %1053 = vmatprep.subr.mxu0 %v3223_v8  ;;  %1126 = vmatprep.subr.mxu1 %v3237_v59 }
 0x25d   :  { %1054 = vmatpush1.msra.mxu0 %v3229_v54  ;;  %1127 = vmatpush1.msra.mxu1 %v3243_v61  ;;  %v2261_v61 = vld [vmem:[%s3803_s1 + $0x48] sm:$0xff] }
 0x25e   :  { %1055 = vmatprep.subr.mxu0 %v3235_v57  ;;  %1128 = vmatprep.subr.mxu1 %v3249_v62 }
 0x25f   :  { %1056 = vmatpush1.msra.mxu0 %v3241_v60  ;;  %1129 = vmatpush1.msra.mxu1 %v3255_v1  ;;  %v2263_v1 = vld [vmem:[%s3803_s1 + $0x58] sm:$0xff] }
 0x260   :  { %1057 = vmatprep.subr.mxu0 %v3247_v11 }
 0x261   :  { %1058 = vmatpush1.msra.mxu0 %v3253_v0 }
 0x262   :  { %1280 = vmatprep.subr.mxu0 %v3082_v50 }
 0x300   :  { %v840_v4 = vpop.f32.mrf.mxu0  ;;  %v911_v63 = vpop.f32.mrf.mxu1 }
 0x301   :  { %v841_v62 = vadd.f32 %v2260_v2, %v840_v4  ;;  %v912_v2 = vadd.f32 %v2262_v45, %v911_v63 }
 0x302   :  { %v842_v59 = vpop.f32.mrf.mxu0  ;;  %v913_v51 = vpop.f32.mrf.mxu1 }
 0x303   :  { %v2264_v5 = vmul.f32 -1.442695, %v841_v62  ;;  %v843_v52 = vadd.f32 %v2261_v61, %v842_v59  ;;  %v914_v47 = vadd.f32 %v2263_v1, %v913_v51  ;;  %v946_v61 = vpop.permute.xlu1 %945 }
 0x304   :  { %vm947_vm10 = vcmp.eq.s32.totalorder %v946_v61, 1  ;;  %v3975_v61 = vld [vmem:[#allocation13_spill] sm:$0xff] }
 0x305   :  { %2354 = vpow2.f32 %v2264_v5  ;;  %v2265_v56 = vmul.f32 -1.442695, %v843_v52  ;;  %v2266_v43 = vmul.f32 -1.442695, %v914_v47 }
 0x307   :  { %2356 = vpow2.f32 %v2265_v56 }
 0x308   :  { %2358 = vpow2.f32 %v2266_v43 }
 0x312   :  { %v2355_v41 = vpop.eup %2354 }
 0x313   :  { %v919_v4 = vadd.f32 1.0, %v2355_v41 }
 0x314   :  { %v2357_v62 = vpop.eup %2356 }
 0x315   :  { %2360 = vrcp.f32 %v919_v4  ;;  %v925_v5 = vadd.f32 1.0, %v2357_v62  ;;  %v2359_v56 = vpop.eup %2358  ;;  %v3330_v62 = vld [vmem:[#allocation2 + $0x190] sm:$0xff] }
 0x316   :  { %2362 = vtanh.f32 %v912_v2  ;;  %v932_v51 = vadd.f32 1.0, %v2359_v56  ;;  %v3972_v56 = vld [vmem:[#allocation19_spill] sm:$0xff] }
 0x317   :  { %2364 = vrcp.f32 %v925_v5  ;;  %v3971_v5 = vld [vmem:[#allocation11_spill] sm:$0xff] }
 0x318   :  { %2366 = vrcp.f32 %v932_v51  ;;  %v3976_v51 = vld [vmem:[#allocation14_spill] sm:$0xff] }
 0x322   :  { %v2361_v52 = vpop.eup %2360 }
 0x323   :  { %v2363_v59 = vpop.eup %2362 }
 0x324   :  { %v2365_v39 = vpop.eup %2364  ;;  %v937_v37 = vmul.f32 %v2363_v59, %v2361_v52  ;;  %v3973_v52 = vld [vmem:[#allocation12_spill] sm:$0xff]  ;;  %v3974_v59 = vld [vmem:[#allocation21_spill] sm:$0xff] }
 0x325   :  { %v936_v1 = vmul.f32 %v2365_v39, %v3066_v48  ;;  %v2367_v43 = vpop.eup %2366  ;;  %v3327_v39 = vld [vmem:[#allocation2 + $0xc0] sm:$0xff] }
 0x327   :  { %v938_v47 = vadd.f32 %v937_v37, %v936_v1  ;;  %v3324_v37 = vld [vmem:[#allocation2 + $0x1c0] sm:$0xff]  ;;  %v3977_v1 = vld [vmem:[#allocation15_spill] sm:$0xff] }
 0x329   :  { %2368 = vtanh.f32 %v938_v47  ;;  %v3274_v41 = vsel %vm947_vm10, %v938_v47, %v3066_v48  ;;  %v3318_v48 = vld [vmem:[#allocation2 + $0xa0] sm:$0xff]  ;;  %v3978_v47 = vld [vmem:[#allocation18_spill] sm:$0xff] }
 0x32a   :  { %3969 = vst [vmem:[#allocation34_spill] sm:$0xff] %v3318_v48  ;;  %1351 = vmatprep.subr.mxu1 %v3318_v48 }
 0x336   :  { %v2369_v45 = vpop.eup %2368 }
 0x337   :  { %v940_v63 = vmul.f32 %v2369_v45, %v2367_v43  ;;  %v3979_v43 = vld [vmem:[#allocation20_spill] sm:$0xff]  ;;  %v3980_v45 = vld [vmem:[#allocation22_spill] sm:$0xff] }
 0x339   :  { %v3277_v2 = vsel %vm947_vm10, %v940_v63, %v3069_v3  ;;  %v953_v4 = vsel %vm947_vm10, %v940_v63, 0.0  ;;  %v3321_v3 = vld [vmem:[#allocation2 + $0x58] sm:$0xff]  ;;  %v3981_v63 = vld [vmem:[#allocation24_spill] sm:$0xff] }
 0x33a   :  { %2268 = vst [vmem:[%s3806_s4 + $0x10] sm:$0xff] %v953_v4  ;;  %1092 = vmatmul.mubr.f32.vlgmr.msra.gmra.mxu0 %v3277_v2  ;;  %1163 = vmatmul.mubr.f32.vlgmr.msra.gmra.mxu1 %v3277_v2  ;;  %v3982_v4 = vld [vmem:[#allocation10_spill] sm:$0xff] }
 0x33b   :  { %1281 = vmatpush1.msra.mxu0 %v3084_v55  ;;  %1344 = vmatprep.mubr.f32.mxu0 %v3940_v27 }
 0x33c   :  { %1282 = vmatprep.subr.mxu0 %v3086_v6  ;;  %1415 = vmatprep.mubr.f32.mxu1 %v3940_v27  ;;  %v3983_v27 = vld [vmem:[#allocation31_spill] sm:$0xff] }
 0x33d   :  { %1283 = vmatpush1.msra.mxu0 %v3089_v7  ;;  %1352 = vmatpush1.msra.mxu1 %v3321_v3 }
 0x33e   :  { %1284 = vmatprep.subr.mxu0 %v3092_v13  ;;  %1353 = vmatprep.subr.mxu1 %v3324_v37 }
 0x33f   :  { %1285 = vmatpush1.msra.mxu0 %v3097_v15  ;;  %1354 = vmatpush1.msra.mxu1 %v3327_v39 }
 0x340   :  { %1286 = vmatprep.subr.mxu0 %v3103_v18  ;;  %1355 = vmatprep.subr.mxu1 %v3330_v62 }
 0x341   :  { %1287 = vmatpush1.msra.mxu0 %v3109_v10  ;;  %1356 = vmatpush1.msra.mxu1 %v3099_v16 }
 0x342   :  { %1288 = vmatprep.subr.mxu0 %v3115_v14  ;;  %1357 = vmatprep.subr.mxu1 %v3105_v9 }
 0x343   :  { %1289 = vmatpush1.msra.mxu0 %v3121_v19  ;;  %1358 = vmatpush1.msra.mxu1 %v3111_v12 }
 0x344   :  { %1290 = vmatprep.subr.mxu0 %v3127_v21  ;;  %1359 = vmatprep.subr.mxu1 %v3117_v17 }
 0x345   :  { %1291 = vmatpush1.msra.mxu0 %v3133_v23  ;;  %1360 = vmatpush1.msra.mxu1 %v3123_v20 }
 0x346   :  { %1292 = vmatprep.subr.mxu0 %v3139_v25  ;;  %1361 = vmatprep.subr.mxu1 %v3129_v22 }
 0x347   :  { %1293 = vmatpush1.msra.mxu0 %v3145_v28  ;;  %1362 = vmatpush1.msra.mxu1 %v3135_v24 }
 0x348   :  { %1294 = vmatprep.subr.mxu0 %v3151_v30  ;;  %1363 = vmatprep.subr.mxu1 %v3141_v26 }
 0x349   :  { %1295 = vmatpush1.msra.mxu0 %v3157_v32  ;;  %1364 = vmatpush1.msra.mxu1 %v3147_v29 }
 0x34a   :  { %1296 = vmatprep.subr.mxu0 %v3163_v34  ;;  %1365 = vmatprep.subr.mxu1 %v3153_v31 }
 0x34b   :  { %1297 = vmatpush1.msra.mxu0 %v3169_v36  ;;  %1366 = vmatpush1.msra.mxu1 %v3159_v33 }
 0x34c   :  { %1298 = vmatprep.subr.mxu0 %v3175_v38  ;;  %1367 = vmatprep.subr.mxu1 %v3165_v35 }
 0x34d   :  { %1299 = vmatpush1.msra.mxu0 %v3181_v40 }
 0x34e   :  { %1300 = vmatprep.subr.mxu0 %v3187_v42 }
 0x34f   :  { %1301 = vmatpush1.msra.mxu0 %v3193_v44 }
 0x350   :  { %1302 = vmatprep.subr.mxu0 %v3199_v46 }
 0x351   :  { %1303 = vmatpush1.msra.mxu0 %v3205_v49 }
 0x352   :  { %1304 = vmatprep.subr.mxu0 %v3211_v53 }
 0x353   :  { %1305 = vmatpush1.msra.mxu0 %v3217_v58 }
 0x354   :  { %1306 = vmatprep.subr.mxu0 %v3223_v8 }
 0x355   :  { %1307 = vmatpush1.msra.mxu0 %v3229_v54 }
 0x356   :  { %1308 = vmatprep.subr.mxu0 %v3235_v57  ;;  %v2270_v57 = vld [vmem:[%s3803_s1 + $0x68] sm:$0xff] }
 0x357   :  { %1309 = vmatpush1.msra.mxu0 %v3241_v60 }
 0x358   :  { %1310 = vmatprep.subr.mxu0 %v3247_v11  ;;  %v2269_v11 = vld [vmem:[%s3803_s1 + $0x60] sm:$0xff] }
 0x359   :  { %1311 = vmatpush1.msra.mxu0 %v3253_v0  ;;  %v3984_v0 = vld [vmem:[#allocation33_spill] sm:$0xff] }
 0x35a   :  { %1533 = vmatprep.subr.mxu0 %v3082_v50  ;;  %v3970_v50 = vld [vmem:[#allocation16_spill] sm:$0xff] }
 0x35b   :  { %1368 = vmatpush1.msra.mxu1 %v3970_v50 }
 0x35c   :  { %1369 = vmatprep.subr.mxu1 %v3971_v5 }
 0x35d   :  { %1370 = vmatpush1.msra.mxu1 %v3972_v56 }
 0x35e   :  { %1371 = vmatprep.subr.mxu1 %v3973_v52 }
 0x35f   :  { %1372 = vmatpush1.msra.mxu1 %v3974_v59 }
 0x360   :  { %1373 = vmatprep.subr.mxu1 %v3975_v61 }
 0x361   :  { %1374 = vmatpush1.msra.mxu1 %v3976_v51  ;;  %v1199_v51 = vpop.permute.xlu1 %1198 }
 0x362   :  { %1375 = vmatprep.subr.mxu1 %v3977_v1  ;;  %vm1200_vm11 = vcmp.eq.s32.totalorder %v1199_v51, 1 }
 0x363   :  { %1376 = vmatpush1.msra.mxu1 %v3978_v47  ;;  %v2271_v47 = vld [vmem:[%s3803_s1 + $0x70] sm:$0xff] }
 0x364   :  { %1377 = vmatprep.subr.mxu1 %v3979_v43 }
 0x365   :  { %1378 = vmatpush1.msra.mxu1 %v3980_v45 }
 0x366   :  { %1379 = vmatprep.subr.mxu1 %v3981_v63 }
 0x367   :  { %1380 = vmatpush1.msra.mxu1 %v3982_v4 }
 0x368   :  { %1381 = vmatprep.subr.mxu1 %v3983_v27 }
 0x369   :  { %1382 = vmatpush1.msra.mxu1 %v3984_v0 }
 0x36a   :  { %1604 = vmatprep.subr.mxu1 %v3318_v48  ;;  %v2272_v48 = vld [vmem:[%s3803_s1 + $0x78] sm:$0xff] }
 0x3fa   :  { %v1093_v60 = vpop.f32.mrf.mxu0  ;;  %v1164_v4 = vpop.f32.mrf.mxu1 }
 0x3fb   :  { %v1094_v45 = vadd.f32 %v2269_v11, %v1093_v60  ;;  %v1165_v60 = vadd.f32 %v2271_v47, %v1164_v4 }
 0x3fc   :  { %v1095_v54 = vpop.f32.mrf.mxu0  ;;  %v1166_v0 = vpop.f32.mrf.mxu1 }
 0x3fd   :  { %v2273_v63 = vmul.f32 -1.442695, %v1094_v45  ;;  %v1096_v43 = vadd.f32 %v2270_v57, %v1095_v54  ;;  %v1167_v8 = vadd.f32 %v2272_v48, %v1166_v0 }
 0x3ff   :  { %2370 = vpow2.f32 %v2273_v63  ;;  %v2274_v27 = vmul.f32 -1.442695, %v1096_v43  ;;  %v2275_v58 = vmul.f32 -1.442695, %v1167_v8 }
 0x401   :  { %2372 = vpow2.f32 %v2274_v27 }
 0x402   :  { %2374 = vpow2.f32 %v2275_v58 }
 0x40c   :  { %v2371_v1 = vpop.eup %2370 }
 0x40d   :  { %v1172_v11 = vadd.f32 1.0, %v2371_v1 }
 0x40e   :  { %v2373_v45 = vpop.eup %2372 }
 0x40f   :  { %2376 = vrcp.f32 %v1172_v11  ;;  %v1178_v54 = vadd.f32 1.0, %v2373_v45  ;;  %v2375_v27 = vpop.eup %2374  ;;  %v1452_v45 = vpop.permute.xlu0 %1451 }
 0x410   :  { %2378 = vtanh.f32 %v1165_v60  ;;  %v1185_v53 = vadd.f32 1.0, %v2375_v27  ;;  %vm1453_vm12 = vcmp.eq.s32.totalorder %v1452_v45, 1  ;;  %v3645_v45 = vld [vmem:[#allocation2 + $0x1b0] sm:$0xff] }
 0x411   :  { %2380 = vrcp.f32 %v1178_v54 }
 0x412   :  { %2382 = vrcp.f32 %v1185_v53 }
 0x41c   :  { %v2377_v57 = vpop.eup %2376 }
 0x41d   :  { %v2379_v43 = vpop.eup %2378 }
 0x41e   :  { %v2381_v63 = vpop.eup %2380  ;;  %v1190_v0 = vmul.f32 %v2379_v43, %v2377_v57 }
 0x41f   :  { %v1189_v48 = vmul.f32 %v2381_v63, %v3274_v41  ;;  %v2383_v58 = vpop.eup %2382 }
 0x421   :  { %v1191_v49 = vadd.f32 %v1190_v0, %v1189_v48 }
 0x423   :  { %2384 = vtanh.f32 %v1191_v49  ;;  %v3375_v8 = vsel %vm1200_vm11, %v1191_v49, %v3274_v41 }
 0x430   :  { %v2385_v1 = vpop.eup %2384 }
 0x431   :  { %v1193_v47 = vmul.f32 %v2385_v1, %v2383_v58  ;;  %v3483_v58 = vld [vmem:[#allocation2 + $0x158] sm:$0xff] }
 0x432   :  { %v3486_v1 = vld [vmem:[#allocation2 + $0x38] sm:$0xff] }
 0x433   :  { %v3378_v4 = vsel %vm1200_vm11, %v1193_v47, %v3277_v2  ;;  %v1206_v60 = vsel %vm1200_vm11, %v1193_v47, 0.0  ;;  %v3501_v47 = vld [vmem:[#allocation2 + $0x88] sm:$0xff] }
 0x434   :  { %2277 = vst [vmem:[%s3806_s4 + $0x18] sm:$0xff] %v1206_v60  ;;  %1345 = vmatmul.mubr.f32.vlgmr.msra.gmra.mxu0 %v3378_v4  ;;  %1416 = vmatmul.mubr.f32.vlgmr.msra.gmra.mxu1 %v3378_v4  ;;  %v3507_v60 = vld [vmem:[#allocation2 + $0xb8] sm:$0xff] }
 0x435   :  { %1534 = vmatpush1.msra.mxu0 %v3084_v55  ;;  %1605 = vmatpush1.msra.mxu1 %v3321_v3  ;;  %v3985_v55 = vld [vmem:[#allocation23_spill] sm:$0xff] }
 0x436   :  { %1535 = vmatprep.subr.mxu0 %v3086_v6  ;;  %1606 = vmatprep.subr.mxu1 %v3324_v37  ;;  %v3986_v6 = vld [vmem:[#allocation14_spill] sm:$0xff] }
 0x437   :  { %1536 = vmatpush1.msra.mxu0 %v3089_v7  ;;  %1607 = vmatpush1.msra.mxu1 %v3327_v39  ;;  %v3987_v7 = vld [vmem:[#allocation25_spill] sm:$0xff] }
 0x438   :  { %1537 = vmatprep.subr.mxu0 %v3092_v13  ;;  %1608 = vmatprep.subr.mxu1 %v3330_v62  ;;  %v3988_v13 = vld [vmem:[#allocation15_spill] sm:$0xff] }
 0x439   :  { %1538 = vmatpush1.msra.mxu0 %v3097_v15  ;;  %1609 = vmatpush1.msra.mxu1 %v3099_v16  ;;  %v3989_v15 = vld [vmem:[#allocation26_spill] sm:$0xff] }
 0x43a   :  { %1539 = vmatprep.subr.mxu0 %v3103_v18  ;;  %1610 = vmatprep.subr.mxu1 %v3105_v9  ;;  %v3990_v16 = vld [vmem:[#allocation18_spill] sm:$0xff]  ;;  %v3991_v18 = vld [vmem:[#allocation27_spill] sm:$0xff]  ;;  %v3992_v9 = vld [vmem:[#allocation20_spill] sm:$0xff] }
 0x43b   :  { %1540 = vmatpush1.msra.mxu0 %v3109_v10  ;;  %1611 = vmatpush1.msra.mxu1 %v3111_v12  ;;  %v3993_v10 = vld [vmem:[#allocation28_spill] sm:$0xff]  ;;  %v3994_v12 = vld [vmem:[#allocation22_spill] sm:$0xff] }
 0x43c   :  { %1541 = vmatprep.subr.mxu0 %v3115_v14  ;;  %1612 = vmatprep.subr.mxu1 %v3117_v17  ;;  %v3995_v14 = vld [vmem:[#allocation29_spill] sm:$0xff]  ;;  %v3996_v17 = vld [vmem:[#allocation24_spill] sm:$0xff] }
 0x43d   :  { %1542 = vmatpush1.msra.mxu0 %v3121_v19  ;;  %1613 = vmatpush1.msra.mxu1 %v3123_v20  ;;  %v3997_v19 = vld [vmem:[#allocation30_spill] sm:$0xff] }
 0x43e   :  { %1543 = vmatprep.subr.mxu0 %v3127_v21  ;;  %1614 = vmatprep.subr.mxu1 %v3129_v22  ;;  %v3998_v20 = vld [vmem:[#allocation10_spill] sm:$0xff]  ;;  %v3999_v21 = vld [vmem:[#allocation17_spill] sm:$0xff]  ;;  %v4000_v22 = vld [vmem:[#allocation31_spill] sm:$0xff] }
 0x43f   :  { %1544 = vmatpush1.msra.mxu0 %v3133_v23  ;;  %1615 = vmatpush1.msra.mxu1 %v3135_v24  ;;  %v4001_v23 = vld [vmem:[#allocation32_spill] sm:$0xff]  ;;  %v4002_v24 = vmov 0.0  }
 0x440   :  { %1545 = vmatprep.subr.mxu0 %v3139_v25  ;;  %1616 = vmatprep.subr.mxu1 %v3141_v26  ;;  %v4003_v25 = vld [vmem:[#allocation33_spill] sm:$0xff]  ;;  %v4004_v26 = vld [vmem:[#allocation34_spill] sm:$0xff] }
 0x441   :  { %1546 = vmatpush1.msra.mxu0 %v3145_v28  ;;  %1617 = vmatpush1.msra.mxu1 %v3147_v29  ;;  %v2278_v28 = vld [vmem:[%s3803_s1 + $0x80] sm:$0xff] }
 0x442   :  { %1547 = vmatprep.subr.mxu0 %v3151_v30  ;;  %1618 = vmatprep.subr.mxu1 %v3153_v31  ;;  %v2279_v30 = vld [vmem:[%s3803_s1 + $0x88] sm:$0xff] }
 0x443   :  { %1548 = vmatpush1.msra.mxu0 %v3157_v32  ;;  %1619 = vmatpush1.msra.mxu1 %v3159_v33 }
 0x444   :  { %1549 = vmatprep.subr.mxu0 %v3163_v34  ;;  %1620 = vmatprep.subr.mxu1 %v3165_v35 }
 0x445   :  { %1550 = vmatpush1.msra.mxu0 %v3169_v36  ;;  %1621 = vmatpush1.msra.mxu1 %v3970_v50 }
 0x446   :  { %1551 = vmatprep.subr.mxu0 %v3175_v38  ;;  %1622 = vmatprep.subr.mxu1 %v3971_v5  ;;  %v2281_v38 = vld [vmem:[%s3803_s1 + $0x98] sm:$0xff] }
 0x447   :  { %1552 = vmatpush1.msra.mxu0 %v3181_v40  ;;  %1623 = vmatpush1.msra.mxu1 %v3972_v56 }
 0x448   :  { %1553 = vmatprep.subr.mxu0 %v3187_v42  ;;  %1624 = vmatprep.subr.mxu1 %v3973_v52 }
 0x449   :  { %1554 = vmatpush1.msra.mxu0 %v3193_v44  ;;  %1625 = vmatpush1.msra.mxu1 %v3974_v59  ;;  %v2280_v44 = vld [vmem:[%s3803_s1 + $0x90] sm:$0xff] }
 0x44a   :  { %1555 = vmatprep.subr.mxu0 %v3199_v46  ;;  %1626 = vmatprep.subr.mxu1 %v3975_v61 }
 0x44b   :  { %1556 = vmatpush1.msra.mxu0 %v3985_v55  ;;  %1627 = vmatpush1.msra.mxu1 %v3986_v6  ;;  %v3509_v55 = vld [vmem:[#allocation2 + $0xa8] sm:$0xff]  ;;  %v3513_v6 = vld [vmem:[#allocation2 + $0x90] sm:$0xff] }
 0x44c   :  { %1557 = vmatprep.subr.mxu0 %v3987_v7  ;;  %1628 = vmatprep.subr.mxu1 %v3988_v13  ;;  %v3515_v7 = vld [vmem:[#allocation2 + $0xd0] sm:$0xff] }
 0x44d   :  { %1558 = vmatpush1.msra.mxu0 %v3989_v15  ;;  %1629 = vmatpush1.msra.mxu1 %v3990_v16  ;;  %v3519_v13 = vld [vmem:[#allocation2 + $0x70] sm:$0xff]  ;;  %v3521_v15 = vld [vmem:[#allocation2 + $0x1d8] sm:$0xff] }
 0x44e   :  { %1559 = vmatprep.subr.mxu0 %v3991_v18  ;;  %1630 = vmatprep.subr.mxu1 %v3992_v9  ;;  %v3525_v16 = vld [vmem:[#allocation2 + $0x1f0] sm:$0xff]  ;;  %v3527_v18 = vld [vmem:[#allocation2 + $0x78] sm:$0xff]  ;;  %v3531_v9 = vld [vmem:[#allocation2 + $0x1a0] sm:$0xff] }
 0x44f   :  { %1560 = vmatpush1.msra.mxu0 %v3993_v10  ;;  %1631 = vmatpush1.msra.mxu1 %v3994_v12  ;;  %v3533_v10 = vld [vmem:[#allocation2 + $0xe8] sm:$0xff]  ;;  %v3537_v12 = vld [vmem:[#allocation2 + $0x1f8] sm:$0xff] }
 0x450   :  { %1561 = vmatprep.subr.mxu0 %v3995_v14  ;;  %1632 = vmatprep.subr.mxu1 %v3996_v17  ;;  %v3539_v14 = vld [vmem:[#allocation2 + $0x128] sm:$0xff]  ;;  %v3543_v17 = vld [vmem:[#allocation2 + $0x40] sm:$0xff] }
 0x451   :  { %1562 = vmatpush1.msra.mxu0 %v3997_v19  ;;  %1633 = vmatpush1.msra.mxu1 %v3998_v20  ;;  %v3545_v19 = vld [vmem:[#allocation2 + $0x20] sm:$0xff]  ;;  %v3549_v20 = vld [vmem:[#allocation2 + $0x1d0] sm:$0xff] }
 0x452   :  { %1563 = vmatprep.subr.mxu0 %v3999_v21  ;;  %1634 = vmatprep.subr.mxu1 %v4000_v22  ;;  %v3551_v21 = vld [vmem:[#allocation2 + $0xc8] sm:$0xff] }
 0x453   :  { %1564 = vmatpush1.msra.mxu0 %v4001_v23  ;;  %1597 = vmatprep.mubr.f32.mxu0 %v4002_v24  ;;  %v3555_v22 = vld [vmem:[#allocation2 + $0x148] sm:$0xff]  ;;  %v3557_v23 = vld [vmem:[#allocation2 + $0x100] sm:$0xff] }
 0x454   :  { %1635 = vmatpush1.msra.mxu1 %v4003_v25  ;;  %1668 = vmatprep.mubr.f32.mxu1 %v4002_v24  ;;  %v3561_v25 = vld [vmem:[#allocation2] sm:$0xff] }
 0x455   :  { %1857 = vmatprep.subr.mxu1 %v4004_v26  ;;  %v3563_v26 = vld [vmem:[#allocation2 + $0x8] sm:$0xff] }
 0x4f4   :  { %v1346_v29 = vpop.f32.mrf.mxu0  ;;  %v1417_v35 = vpop.f32.mrf.mxu1 }
 0x4f5   :  { %v1347_v31 = vadd.f32 %v2278_v28, %v1346_v29  ;;  %v1418_v53 = vadd.f32 %v2280_v44, %v1417_v35  ;;  %v3567_v28 = vld [vmem:[#allocation2 + $0x1e0] sm:$0xff]  ;;  %v3569_v29 = vld [vmem:[#allocation2 + $0xf0] sm:$0xff]  ;;  %v3587_v35 = vld [vmem:[#allocation2 + $0x28] sm:$0xff] }
 0x4f6   :  { %v1348_v32 = vpop.f32.mrf.mxu0  ;;  %v1419_v40 = vpop.f32.mrf.mxu1  ;;  %4005 = vst [vmem:[#allocation16_spill] sm:$0xff] %v3569_v29  ;;  %4008 = vst [vmem:[#allocation12_spill] sm:$0xff] %v3587_v35  ;;  %v3603_v44 = vld [vmem:[#allocation2 + $0xe0] sm:$0xff] }
 0x4f7   :  { %v2282_v33 = vmul.f32 -1.442695, %v1347_v31  ;;  %v1349_v34 = vadd.f32 %v2279_v30, %v1348_v32  ;;  %v1420_v42 = vadd.f32 %v2281_v38, %v1419_v40  ;;  %v3573_v30 = vld [vmem:[#allocation2 + $0xf8] sm:$0xff]  ;;  %v3575_v31 = vld [vmem:[#allocation2 + $0x30] sm:$0xff]  ;;  %v3579_v32 = vld [vmem:[#allocation2 + $0x1e8] sm:$0xff] }
 0x4f8   :  { %4006 = vst [vmem:[#allocation11_spill] sm:$0xff] %v3575_v31  ;;  %v3593_v38 = vld [vmem:[#allocation2 + $0x1b8] sm:$0xff]  ;;  %v3597_v40 = vld [vmem:[#allocation2 + $0x188] sm:$0xff] }
 0x4f9   :  { %2386 = vpow2.f32 %v2282_v33  ;;  %v2283_v36 = vmul.f32 -1.442695, %v1349_v34  ;;  %v2284_v46 = vmul.f32 -1.442695, %v1420_v42  ;;  %v3581_v33 = vld [vmem:[#allocation2 + $0x160] sm:$0xff]  ;;  %v3585_v34 = vld [vmem:[#allocation2 + $0x1a8] sm:$0xff] }
 0x4fa   :  { %4007 = vst [vmem:[#allocation19_spill] sm:$0xff] %v3581_v33  ;;  %4009 = vst [vmem:[#allocation21_spill] sm:$0xff] %v3593_v38  ;;  %v3599_v42 = vld [vmem:[#allocation2 + $0x140] sm:$0xff] }
 0x4fb   :  { %2388 = vpow2.f32 %v2283_v36  ;;  %v3591_v36 = vld [vmem:[#allocation2 + $0x80] sm:$0xff]  ;;  %4010 = vst [vmem:[#allocation13_spill] sm:$0xff] %v3599_v42 }
 0x4fc   :  { %2390 = vpow2.f32 %v2284_v46  ;;  %v3605_v46 = vld [vmem:[#allocation2 + $0x138] sm:$0xff] }
 0x4fd   :  { %4011 = vst [vmem:[#allocation23_spill] sm:$0xff] %v3605_v46 }
 0x506   :  { %v2387_v49 = vpop.eup %2386 }
 0x507   :  { %v1425_v41 = vadd.f32 1.0, %v2387_v49  ;;  %v3609_v49 = vld [vmem:[#allocation2 + $0x150] sm:$0xff] }
 0x508   :  { %v2389_v2 = vpop.eup %2388 }
 0x509   :  { %2392 = vrcp.f32 %v1425_v41  ;;  %v1431_v50 = vadd.f32 1.0, %v2389_v2  ;;  %v2391_v5 = vpop.eup %2390  ;;  %v3615_v41 = vld [vmem:[#allocation2 + $0x120] sm:$0xff]  ;;  %v3617_v2 = vld [vmem:[#allocation2 + $0x108] sm:$0xff] }
 0x50a   :  { %2394 = vtanh.f32 %v1418_v53  ;;  %v1438_v61 = vadd.f32 1.0, %v2391_v5  ;;  %v3611_v53 = vld [vmem:[#allocation2 + $0x60] sm:$0xff]  ;;  %4013 = vst [vmem:[#allocation25_spill] sm:$0xff] %v3617_v2  ;;  %v3623_v5 = vld [vmem:[#allocation2 + $0x98] sm:$0xff] }
 0x50b   :  { %2396 = vrcp.f32 %v1431_v50  ;;  %4012 = vst [vmem:[#allocation14_spill] sm:$0xff] %v3611_v53  ;;  %v3621_v50 = vld [vmem:[#allocation2 + $0x110] sm:$0xff]  ;;  %4014 = vst [vmem:[#allocation15_spill] sm:$0xff] %v3623_v5 }
 0x50c   :  { %2398 = vrcp.f32 %v1438_v61  ;;  %v3635_v61 = vld [vmem:[#allocation2 + $0x48] sm:$0xff] }
 0x50d   :  { %4016 = vst [vmem:[#allocation18_spill] sm:$0xff] %v3635_v61 }
 0x516   :  { %v2393_v56 = vpop.eup %2392 }
 0x517   :  { %v2395_v52 = vpop.eup %2394 }
 0x518   :  { %v2397_v59 = vpop.eup %2396  ;;  %v1443_v51 = vmul.f32 %v2395_v52, %v2393_v56  ;;  %v3627_v56 = vld [vmem:[#allocation2 + $0x180] sm:$0xff]  ;;  %v3629_v52 = vld [vmem:[#allocation2 + $0x118] sm:$0xff] }
 0x519   :  { %v1442_v11 = vmul.f32 %v2397_v59, %v3375_v8  ;;  %v2399_v57 = vpop.eup %2398  ;;  %4015 = vst [vmem:[#allocation26_spill] sm:$0xff] %v3629_v52  ;;  %v3633_v59 = vld [vmem:[#allocation2 + $0x168] sm:$0xff] }
 0x51b   :  { %v1444_v54 = vadd.f32 %v1443_v51, %v1442_v11  ;;  %v3639_v51 = vld [vmem:[#allocation2 + $0x50] sm:$0xff] }
 0x51c   :  { %v3641_v11 = vld [vmem:[#allocation2 + $0x130] sm:$0xff] }
 0x51d   :  { %2400 = vtanh.f32 %v1444_v54  ;;  %v3464_v27 = vsel %vm1453_vm12, %v1444_v54, %v3375_v8  ;;  %v3480_v8 = vld [vmem:[#allocation2 + $0x10] sm:$0xff]  ;;  %4017 = vst [vmem:[#allocation27_spill] sm:$0xff] %v3641_v11  ;;  %v3647_v54 = vld [vmem:[#allocation2 + $0x18] sm:$0xff] }
 0x51e   :  { %1786 = vmatprep.subr.mxu0 %v3480_v8  ;;  %4018 = vst [vmem:[#allocation20_spill] sm:$0xff] %v3647_v54 }
 0x52a   :  { %v2401_v43 = vpop.eup %2400 }
 0x52b   :  { %v1446_v63 = vmul.f32 %v2401_v43, %v2399_v57  ;;  %v3651_v57 = vld [vmem:[#allocation2 + $0xb0] sm:$0xff]  ;;  %v3653_v43 = vld [vmem:[#allocation2 + $0xd8] sm:$0xff] }
 0x52c   :  { %4019 = vst [vmem:[#allocation28_spill] sm:$0xff] %v3653_v43 }
 0x52d   :  { %v3467_v0 = vsel %vm1453_vm12, %v1446_v63, %v3378_v4  ;;  %v1459_v48 = vsel %vm1453_vm12, %v1446_v63, 0.0  ;;  %v3503_v4 = vld [vmem:[#allocation2 + $0x1c8] sm:$0xff]  ;;  %v2287_v63 = vld [vmem:[%s3803_s1 + $0xa0] sm:$0xff] }
 0x52e   :  { %2286 = vst [vmem:[%s3806_s4 + $0x20] sm:$0xff] %v1459_v48  ;;  %1598 = vmatmul.mubr.f32.vlgmr.msra.gmra.mxu0 %v3467_v0  ;;  %1669 = vmatmul.mubr.f32.vlgmr.msra.gmra.mxu1 %v3467_v0 }
 0x52f   :  { %1858 = vmatpush1.msra.mxu1 %v3321_v3  ;;  %1850 = vmatprep.mubr.f32.mxu0 %v4002_v24  ;;  %v3489_v3 = vld [vmem:[#allocation2 + $0x198] sm:$0xff] }
 0x530   :  { %1859 = vmatprep.subr.mxu1 %v3324_v37  ;;  %1921 = vmatprep.mubr.f32.mxu1 %v4002_v24  ;;  %v3492_v37 = vld [vmem:[#allocation2 + $0x178] sm:$0xff] }
 0x531   :  { %1860 = vmatpush1.msra.mxu1 %v3327_v39  ;;  %1787 = vmatpush1.msra.mxu0 %v3483_v58  ;;  %v3495_v39 = vld [vmem:[#allocation2 + $0x170] sm:$0xff] }
 0x532   :  { %1861 = vmatprep.subr.mxu1 %v3330_v62  ;;  %1788 = vmatprep.subr.mxu0 %v3486_v1  ;;  %v3497_v62 = vld [vmem:[#allocation2 + $0x68] sm:$0xff] }
 0x533   :  { %1789 = vmatpush1.msra.mxu0 %v3489_v3  ;;  %1862 = vmatpush1.msra.mxu1 %v3497_v62 }
 0x534   :  { %1790 = vmatprep.subr.mxu0 %v3492_v37  ;;  %1863 = vmatprep.subr.mxu1 %v3503_v4 }
 0x535   :  { %1791 = vmatpush1.msra.mxu0 %v3495_v39  ;;  %1864 = vmatpush1.msra.mxu1 %v3509_v55 }
 0x536   :  { %1792 = vmatprep.subr.mxu0 %v3501_v47  ;;  %1865 = vmatprep.subr.mxu1 %v3515_v7 }
 0x537   :  { %1793 = vmatpush1.msra.mxu0 %v3507_v60  ;;  %1866 = vmatpush1.msra.mxu1 %v3521_v15 }
 0x538   :  { %1794 = vmatprep.subr.mxu0 %v3513_v6  ;;  %1867 = vmatprep.subr.mxu1 %v3527_v18 }
 0x539   :  { %1795 = vmatpush1.msra.mxu0 %v3519_v13  ;;  %1868 = vmatpush1.msra.mxu1 %v3533_v10 }
 0x53a   :  { %1796 = vmatprep.subr.mxu0 %v3525_v16  ;;  %1869 = vmatprep.subr.mxu1 %v3539_v14 }
 0x53b   :  { %1797 = vmatpush1.msra.mxu0 %v3531_v9  ;;  %1870 = vmatpush1.msra.mxu1 %v3545_v19 }
 0x53c   :  { %1798 = vmatprep.subr.mxu0 %v3537_v12  ;;  %1871 = vmatprep.subr.mxu1 %v3551_v21 }
 0x53d   :  { %1799 = vmatpush1.msra.mxu0 %v3543_v17  ;;  %1872 = vmatpush1.msra.mxu1 %v3557_v23 }
 0x53e   :  { %1800 = vmatprep.subr.mxu0 %v3549_v20  ;;  %1873 = vmatprep.subr.mxu1 %v3563_v26 }
 0x53f   :  { %1801 = vmatpush1.msra.mxu0 %v3555_v22  ;;  %1874 = vmatpush1.msra.mxu1 %v3569_v29 }
 0x540   :  { %1802 = vmatprep.subr.mxu0 %v3561_v25  ;;  %1875 = vmatprep.subr.mxu1 %v3575_v31  ;;  %v1705_v31 = vpop.permute.xlu1 %1704 }
 0x541   :  { %1803 = vmatpush1.msra.mxu0 %v3567_v28  ;;  %1876 = vmatpush1.msra.mxu1 %v3581_v33  ;;  %vm1706_vm13 = vcmp.eq.s32.totalorder %v1705_v31, 1 }
 0x542   :  { %1804 = vmatprep.subr.mxu0 %v3573_v30  ;;  %1877 = vmatprep.subr.mxu1 %v3587_v35 }
 0x543   :  { %1805 = vmatpush1.msra.mxu0 %v3579_v32  ;;  %1878 = vmatpush1.msra.mxu1 %v3593_v38 }
 0x544   :  { %1806 = vmatprep.subr.mxu0 %v3585_v34  ;;  %1879 = vmatprep.subr.mxu1 %v3599_v42  ;;  %v2289_v42 = vld [vmem:[%s3803_s1 + $0xb0] sm:$0xff] }
 0x545   :  { %1807 = vmatpush1.msra.mxu0 %v3591_v36  ;;  %1880 = vmatpush1.msra.mxu1 %v3605_v46 }
 0x546   :  { %1808 = vmatprep.subr.mxu0 %v3597_v40  ;;  %1881 = vmatprep.subr.mxu1 %v3611_v53 }
 0x547   :  { %1809 = vmatpush1.msra.mxu0 %v3603_v44  ;;  %1882 = vmatpush1.msra.mxu1 %v3617_v2 }
 0x548   :  { %1810 = vmatprep.subr.mxu0 %v3609_v49  ;;  %1883 = vmatprep.subr.mxu1 %v3623_v5 }
 0x549   :  { %1811 = vmatpush1.msra.mxu0 %v3615_v41  ;;  %1884 = vmatpush1.msra.mxu1 %v3629_v52 }
 0x54a   :  { %1812 = vmatprep.subr.mxu0 %v3621_v50  ;;  %1885 = vmatprep.subr.mxu1 %v3635_v61 }
 0x54b   :  { %1813 = vmatpush1.msra.mxu0 %v3627_v56  ;;  %1886 = vmatpush1.msra.mxu1 %v3641_v11  ;;  %v2288_v11 = vld [vmem:[%s3803_s1 + $0xa8] sm:$0xff] }
 0x54c   :  { %1814 = vmatprep.subr.mxu0 %v3633_v59  ;;  %1887 = vmatprep.subr.mxu1 %v3647_v54 }
 0x54d   :  { %1815 = vmatpush1.msra.mxu0 %v3639_v51  ;;  %1888 = vmatpush1.msra.mxu1 %v3653_v43 }
 0x54e   :  { %1816 = vmatprep.subr.mxu0 %v3645_v45 }
 0x54f   :  { %1817 = vmatpush1.msra.mxu0 %v3651_v57 }
 0x550   :  { %2039 = vmatprep.subr.mxu0 %v3480_v8  ;;  %v2290_v8 = vld [vmem:[%s3803_s1 + $0xb8] sm:$0xff] }
 0x5ee   :  { %v1599_v48 = vpop.f32.mrf.mxu0  ;;  %v1670_v2 = vpop.f32.mrf.mxu1 }
 0x5ef   :  { %v1600_v54 = vadd.f32 %v2287_v63, %v1599_v48  ;;  %v1671_v63 = vadd.f32 %v2289_v42, %v1670_v2 }
 0x5f0   :  { %v1601_v61 = vpop.f32.mrf.mxu0  ;;  %v1672_v43 = vpop.f32.mrf.mxu1 }
 0x5f1   :  { %v2291_v52 = vmul.f32 -1.442695, %v1600_v54  ;;  %v1602_v5 = vadd.f32 %v2288_v11, %v1601_v61  ;;  %v1673_v46 = vadd.f32 %v2290_v8, %v1672_v43 }
 0x5f3   :  { %2402 = vpow2.f32 %v2291_v52  ;;  %v2292_v53 = vmul.f32 -1.442695, %v1602_v5  ;;  %v2293_v38 = vmul.f32 -1.442695, %v1673_v46 }
 0x5f5   :  { %2404 = vpow2.f32 %v2292_v53 }
 0x5f6   :  { %2406 = vpow2.f32 %v2293_v38 }
 0x600   :  { %v2403_v35 = vpop.eup %2402 }
 0x601   :  { %v1678_v48 = vadd.f32 1.0, %v2403_v35 }
 0x602   :  { %v2405_v54 = vpop.eup %2404 }
 0x603   :  { %2408 = vrcp.f32 %v1678_v48  ;;  %v1684_v52 = vadd.f32 1.0, %v2405_v54  ;;  %v2407_v53 = vpop.eup %2406 }
 0x604   :  { %2410 = vtanh.f32 %v1671_v63  ;;  %v1691_v33 = vadd.f32 1.0, %v2407_v53 }
 0x605   :  { %2412 = vrcp.f32 %v1684_v52 }
 0x606   :  { %2414 = vrcp.f32 %v1691_v33 }
 0x610   :  { %v2409_v5 = vpop.eup %2408 }
 0x611   :  { %v2411_v61 = vpop.eup %2410 }
 0x612   :  { %v2413_v11 = vpop.eup %2412  ;;  %v1696_v43 = vmul.f32 %v2411_v61, %v2409_v5  ;;  %v2305_v61 = vld [vmem:[%s3803_s1 + $0xe0] sm:$0xff] }
 0x613   :  { %v1695_v8 = vmul.f32 %v2413_v11, %v3464_v27  ;;  %v2415_v38 = vpop.eup %2414 }
 0x615   :  { %v1697_v29 = vadd.f32 %v1696_v43, %v1695_v8  ;;  %v2306_v43 = vld [vmem:[%s3803_s1 + $0xe8] sm:$0xff] }
 0x617   :  { %2416 = vtanh.f32 %v1697_v29  ;;  %v3672_v35 = vsel %vm1706_vm13, %v1697_v29, %v3464_v27  ;;  %v2032_v27 = vld [vmem:[#allocation2 + $0x58] sm:$0xff]  ;;  %v2298_v29 = vld [vmem:[%s3803_s1 + $0xd0] sm:$0xff] }
 0x624   :  { %v2417_v42 = vpop.eup %2416 }
 0x625   :  { %v1699_v46 = vmul.f32 %v2417_v42, %v2415_v38 }
 0x627   :  { %v3675_v2 = vsel %vm1706_vm13, %v1699_v46, %v3467_v0  ;;  %v1712_v63 = vsel %vm1706_vm13, %v1699_v46, 0.0  ;;  %v2029_v0 = vld [vmem:[#allocation2 + $0x1c0] sm:$0xff] }
 0x628   :  { %2295 = vst [vmem:[%s3806_s4 + $0x28] sm:$0xff] %v1712_v63  ;;  %1851 = vmatmul.mubr.f32.vlgmr.msra.gmra.mxu0 %v3675_v2  ;;  %1922 = vmatmul.mubr.f32.vlgmr.msra.gmra.mxu1 %v3675_v2  ;;  %v2308_v63 = vld [vmem:[%s3803_s1 + $0xf8] sm:$0xff] }
 0x629   :  { %2040 = vmatpush1.msra.mxu0 %v3483_v58  ;;  %2103 = vmatprep.mubr.f32.mxu0 %v4002_v24  ;;  %v2028_v58 = vld [vmem:[#allocation2 + $0xc0] sm:$0xff] }
 0x62a   :  { %2041 = vmatprep.subr.mxu0 %v3486_v1  ;;  %2174 = vmatprep.mubr.f32.mxu1 %v4002_v24  ;;  %v2033_v24 = vld [vmem:[#allocation2 + $0xa0] sm:$0xff]  ;;  %v2025_v1 = vld [vmem:[#allocation2 + $0x190] sm:$0xff] }
 0x62b   :  { %2042 = vmatpush1.msra.mxu0 %v3489_v3  ;;  %2110 = vmatprep.subr.mxu1 %v2033_v24  ;;  %v4020_v3 = vld [vmem:[#allocation16_spill] sm:$0xff] }
 0x62c   :  { %2043 = vmatprep.subr.mxu0 %v3492_v37  ;;  %2111 = vmatpush1.msra.mxu1 %v2032_v27  ;;  %v4021_v37 = vld [vmem:[#allocation11_spill] sm:$0xff] }
 0x62d   :  { %2044 = vmatpush1.msra.mxu0 %v3495_v39  ;;  %2112 = vmatprep.subr.mxu1 %v2029_v0  ;;  %v4022_v39 = vld [vmem:[#allocation19_spill] sm:$0xff]  ;;  %v2307_v0 = vld [vmem:[%s3803_s1 + $0xf0] sm:$0xff] }
 0x62e   :  { %2045 = vmatprep.subr.mxu0 %v3501_v47  ;;  %2113 = vmatpush1.msra.mxu1 %v2028_v58  ;;  %v4024_v47 = vld [vmem:[#allocation21_spill] sm:$0xff] }
 0x62f   :  { %2046 = vmatpush1.msra.mxu0 %v3507_v60  ;;  %2114 = vmatprep.subr.mxu1 %v2025_v1  ;;  %v4026_v60 = vld [vmem:[#allocation23_spill] sm:$0xff] }
 0x630   :  { %2047 = vmatprep.subr.mxu0 %v3513_v6  ;;  %2115 = vmatpush1.msra.mxu1 %v3497_v62  ;;  %v4023_v62 = vld [vmem:[#allocation12_spill] sm:$0xff]  ;;  %v4028_v6 = vld [vmem:[#allocation25_spill] sm:$0xff] }
 0x631   :  { %2048 = vmatpush1.msra.mxu0 %v3519_v13  ;;  %2116 = vmatprep.subr.mxu1 %v3503_v4  ;;  %v4025_v4 = vld [vmem:[#allocation13_spill] sm:$0xff]  ;;  %v4030_v13 = vld [vmem:[#allocation26_spill] sm:$0xff] }
 0x632   :  { %2049 = vmatprep.subr.mxu0 %v3525_v16  ;;  %2117 = vmatpush1.msra.mxu1 %v3509_v55  ;;  %v4027_v55 = vld [vmem:[#allocation14_spill] sm:$0xff]  ;;  %v4032_v16 = vld [vmem:[#allocation27_spill] sm:$0xff] }
 0x633   :  { %2050 = vmatpush1.msra.mxu0 %v3531_v9  ;;  %2118 = vmatprep.subr.mxu1 %v3515_v7  ;;  %v4029_v7 = vld [vmem:[#allocation15_spill] sm:$0xff]  ;;  %v4034_v9 = vld [vmem:[#allocation28_spill] sm:$0xff] }
 0x634   :  { %2051 = vmatprep.subr.mxu0 %v3537_v12  ;;  %2119 = vmatpush1.msra.mxu1 %v3521_v15  ;;  %v4031_v15 = vld [vmem:[#allocation18_spill] sm:$0xff] }
 0x635   :  { %2052 = vmatpush1.msra.mxu0 %v3543_v17  ;;  %2120 = vmatprep.subr.mxu1 %v3527_v18  ;;  %v4033_v18 = vld [vmem:[#allocation20_spill] sm:$0xff] }
 0x636   :  { %2053 = vmatprep.subr.mxu0 %v3549_v20  ;;  %2121 = vmatpush1.msra.mxu1 %v3533_v10  ;;  %v2296_v10 = vld [vmem:[%s3803_s1 + $0xc0] sm:$0xff] }
 0x637   :  { %2054 = vmatpush1.msra.mxu0 %v3555_v22  ;;  %2122 = vmatprep.subr.mxu1 %v3539_v14  ;;  %v2297_v14 = vld [vmem:[%s3803_s1 + $0xc8] sm:$0xff] }
 0x638   :  { %2055 = vmatprep.subr.mxu0 %v3561_v25  ;;  %2123 = vmatpush1.msra.mxu1 %v3545_v19  ;;  %v2299_v25 = vld [vmem:[%s3803_s1 + $0xd8] sm:$0xff] }
 0x639   :  { %2056 = vmatpush1.msra.mxu0 %v3567_v28  ;;  %2124 = vmatprep.subr.mxu1 %v3551_v21 }
 0x63a   :  { %2057 = vmatprep.subr.mxu0 %v3573_v30  ;;  %2125 = vmatpush1.msra.mxu1 %v3557_v23 }
 0x63b   :  { %2058 = vmatpush1.msra.mxu0 %v3579_v32  ;;  %2126 = vmatprep.subr.mxu1 %v3563_v26 }
 0x63c   :  { %2059 = vmatprep.subr.mxu0 %v3585_v34  ;;  %2127 = vmatpush1.msra.mxu1 %v4020_v3 }
 0x63d   :  { %2060 = vmatpush1.msra.mxu0 %v3591_v36  ;;  %2128 = vmatprep.subr.mxu1 %v4021_v37 }
 0x63e   :  { %2061 = vmatprep.subr.mxu0 %v3597_v40  ;;  %2129 = vmatpush1.msra.mxu1 %v4022_v39 }
 0x63f   :  { %2062 = vmatpush1.msra.mxu0 %v3603_v44  ;;  %2130 = vmatprep.subr.mxu1 %v4023_v62 }
 0x640   :  { %2063 = vmatprep.subr.mxu0 %v3609_v49  ;;  %2131 = vmatpush1.msra.mxu1 %v4024_v47 }
 0x641   :  { %2064 = vmatpush1.msra.mxu0 %v3615_v41  ;;  %2132 = vmatprep.subr.mxu1 %v4025_v4 }
 0x642   :  { %2065 = vmatprep.subr.mxu0 %v3621_v50  ;;  %2133 = vmatpush1.msra.mxu1 %v4026_v60 }
 0x643   :  { %2066 = vmatpush1.msra.mxu0 %v3627_v56  ;;  %2134 = vmatprep.subr.mxu1 %v4027_v55  ;;  %v1958_v56 = vpop.permute.xlu0 %1957 }
 0x644   :  { %2067 = vmatprep.subr.mxu0 %v3633_v59  ;;  %2135 = vmatpush1.msra.mxu1 %v4028_v6  ;;  %vm1959_vm14 = vcmp.eq.s32.totalorder %v1958_v56, 1 }
 0x645   :  { %2068 = vmatpush1.msra.mxu0 %v3639_v51  ;;  %2136 = vmatprep.subr.mxu1 %v4029_v7  ;;  %v2211_v7 = vpop.permute.xlu1 %2210 }
 0x646   :  { %2069 = vmatprep.subr.mxu0 %v3645_v45  ;;  %2137 = vmatpush1.msra.mxu1 %v4030_v13  ;;  %vm2212_vm15 = vcmp.eq.s32.totalorder %v2211_v7, 1 }
 0x647   :  { %2070 = vmatpush1.msra.mxu0 %v3651_v57  ;;  %2138 = vmatprep.subr.mxu1 %v4031_v15 }
 0x648   :  { %2139 = vmatpush1.msra.mxu1 %v4032_v16 }
 0x649   :  { %2140 = vmatprep.subr.mxu1 %v4033_v18 }
 0x64a   :  { %2141 = vmatpush1.msra.mxu1 %v4034_v9 }
 0x6e8   :  { %v1852_v12 = vpop.f32.mrf.mxu0  ;;  %v1923_v22 = vpop.f32.mrf.mxu1 }
 0x6e9   :  { %v1853_v17 = vadd.f32 %v2296_v10, %v1852_v12  ;;  %v1924_v32 = vadd.f32 %v2298_v29, %v1923_v22 }
 0x6ea   :  { %v1854_v19 = vpop.f32.mrf.mxu0  ;;  %v1925_v26 = vpop.f32.mrf.mxu1 }
 0x6eb   :  { %v2300_v20 = vmul.f32 -1.442695, %v1853_v17  ;;  %v1855_v21 = vadd.f32 %v2297_v14, %v1854_v19  ;;  %v1926_v28 = vadd.f32 %v2299_v25, %v1925_v26 }
 0x6ed   :  { %2418 = vpow2.f32 %v2300_v20  ;;  %v2301_v23 = vmul.f32 -1.442695, %v1855_v21  ;;  %v2302_v30 = vmul.f32 -1.442695, %v1926_v28 }
 0x6ef   :  { %2420 = vpow2.f32 %v2301_v23 }
 0x6f0   :  { %2422 = vpow2.f32 %v2302_v30 }
 0x6fa   :  { %v2419_v31 = vpop.eup %2418 }
 0x6fb   :  { %v1931_v33 = vadd.f32 1.0, %v2419_v31 }
 0x6fc   :  { %v2421_v34 = vpop.eup %2420 }
 0x6fd   :  { %2424 = vrcp.f32 %v1931_v33  ;;  %v1937_v36 = vadd.f32 1.0, %v2421_v34  ;;  %v2423_v40 = vpop.eup %2422 }
 0x6fe   :  { %2426 = vtanh.f32 %v1924_v32  ;;  %v1944_v50 = vadd.f32 1.0, %v2423_v40 }
 0x6ff   :  { %2428 = vrcp.f32 %v1937_v36 }
 0x700   :  { %2430 = vrcp.f32 %v1944_v50 }
 0x70a   :  { %v2425_v44 = vpop.eup %2424 }
 0x70b   :  { %v2427_v49 = vpop.eup %2426 }
 0x70c   :  { %v2429_v41 = vpop.eup %2428  ;;  %v1949_v59 = vmul.f32 %v2427_v49, %v2425_v44 }
 0x70d   :  { %v1948_v51 = vmul.f32 %v2429_v41, %v3672_v35  ;;  %v2431_v48 = vpop.eup %2430 }
 0x70f   :  { %v1950_v45 = vadd.f32 %v1949_v59, %v1948_v51 }
 0x711   :  { %2432 = vtanh.f32 %v1950_v45  ;;  %v1960_v57 = vsel %vm1959_vm14, %v1950_v45, %v3672_v35 }
 0x71e   :  { %v2433_v54 = vpop.eup %2432 }
 0x71f   :  { %v1952_v52 = vmul.f32 %v2433_v54, %v2431_v48 }
 0x721   :  { %v1963_v53 = vsel %vm1959_vm14, %v1952_v52, %v3675_v2  ;;  %v1965_v5 = vsel %vm1959_vm14, %v1952_v52, 0.0 }
 0x722   :  { %2304 = vst [vmem:[%s3806_s4 + $0x30] sm:$0xff] %v1965_v5  ;;  %2104 = vmatmul.mubr.f32.vlgmr.msra.gmra.mxu0 %v1963_v53  ;;  %2175 = vmatmul.mubr.f32.vlgmr.msra.gmra.mxu1 %v1963_v53 }
 0x7e2   :  { %v2105_v11 = vpop.f32.mrf.mxu0  ;;  %v2176_v46 = vpop.f32.mrf.mxu1 }
 0x7e3   :  { %v2106_v8 = vadd.f32 %v2305_v61, %v2105_v11  ;;  %v2177_v3 = vadd.f32 %v2307_v0, %v2176_v46 }
 0x7e4   :  { %v2107_v35 = vpop.f32.mrf.mxu0  ;;  %v2178_v24 = vpop.f32.mrf.mxu1 }
 0x7e5   :  { %v2309_v38 = vmul.f32 -1.442695, %v2106_v8  ;;  %v2108_v42 = vadd.f32 %v2306_v43, %v2107_v35  ;;  %v2179_v27 = vadd.f32 %v2308_v63, %v2178_v24 }
 0x7e7   :  { %2434 = vpow2.f32 %v2309_v38  ;;  %v2310_v2 = vmul.f32 -1.442695, %v2108_v42  ;;  %v2311_v58 = vmul.f32 -1.442695, %v2179_v27 }
 0x7e9   :  { %2436 = vpow2.f32 %v2310_v2 }
 0x7ea   :  { %2438 = vpow2.f32 %v2311_v58 }
 0x7f4   :  { %v2435_v1 = vpop.eup %2434 }
 0x7f5   :  { %v2184_v37 = vadd.f32 1.0, %v2435_v1 }
 0x7f6   :  { %v2437_v39 = vpop.eup %2436 }
 0x7f7   :  { %2440 = vrcp.f32 %v2184_v37  ;;  %v2190_v62 = vadd.f32 1.0, %v2437_v39  ;;  %v2439_v47 = vpop.eup %2438 }
 0x7f8   :  { %2442 = vtanh.f32 %v2177_v3  ;;  %v2197_v6 = vadd.f32 1.0, %v2439_v47 }
 0x7f9   :  { %2444 = vrcp.f32 %v2190_v62 }
 0x7fa   :  { %2446 = vrcp.f32 %v2197_v6 }
 0x804   :  { %v2441_v4 = vpop.eup %2440 }
 0x805   :  { %v2443_v60 = vpop.eup %2442 }
 0x806   :  { %v2445_v55 = vpop.eup %2444  ;;  %v2202_v13 = vmul.f32 %v2443_v60, %v2441_v4 }
 0x807   :  { %v2201_v15 = vmul.f32 %v2445_v55, %v1960_v57  ;;  %v2447_v9 = vpop.eup %2446 }
 0x809   :  { %v2203_v16 = vadd.f32 %v2202_v13, %v2201_v15 }
 0x80b   :  { %2448 = vtanh.f32 %v2203_v16  ;;  %v2213_v18 = vsel %vm2212_vm15, %v2203_v16, %v1960_v57 }
 0x80c   :  { %2214 = vst [vmem:[#allocation4] sm:$0xff] %v2213_v18 }
 0x818   :  { %v2449_v10 = vpop.eup %2448 }
 0x819   :  { %v2205_v12 = vmul.f32 %v2449_v10, %v2447_v9 }
 0x81b   :  { %v2216_v14 = vsel %vm2212_vm15, %v2205_v12, %v1963_v53  ;;  %v2218_v17 = vsel %vm2212_vm15, %v2205_v12, 0.0 }
 0x81c   :  { %2217 = vst [vmem:[#allocation3] sm:$0xff] %v2216_v14  ;;  %2313 = vst [vmem:[%s3806_s4 + $0x38] sm:$0xff] %v2218_v17 }
 0x81d PF:  { %p2315_p1 = scmp.gt.s32.totalorder %s3802_s0, 0 }
 0x81f   :  { %2224 = sbr.rel (%p2315_p1) target bundleno = 2089 (0x829), region = 56 }
 0x824   :  { %v2455_v19 = vmov 0.0  }
 0x825   :  { %2225 = vst [vmem:[%s3806_s4] sm:$0xff] %v2455_v19  ;;  %2226 = vst [vmem:[%s3806_s4 + $0x8] sm:$0xff] %v2455_v19 }
 0x826   :  { %2227 = vst [vmem:[%s3806_s4 + $0x10] sm:$0xff] %v2455_v19  ;;  %2228 = vst [vmem:[%s3806_s4 + $0x18] sm:$0xff] %v2455_v19 }
 0x827   :  { %2229 = vst [vmem:[%s3806_s4 + $0x20] sm:$0xff] %v2455_v19  ;;  %2230 = vst [vmem:[%s3806_s4 + $0x28] sm:$0xff] %v2455_v19 }
 0x828   :  { %2231 = vst [vmem:[%s3806_s4 + $0x30] sm:$0xff] %v2455_v19  ;;  %2232 = vst [vmem:[%s3806_s4 + $0x38] sm:$0xff] %v2455_v19 }
 0x829 PF:  {}

</bundles_post_ra>
